<compile_context>
chip_gen: v7x
topology: tpu7x:2x2x1
jax: 0.10.0
libtpu: 0.0.40
codegen_flags: <defaults>
</compile_context>

<pallas_src>
import numpy as np
import jax
import jax.numpy as jnp
from jax.experimental import pallas as pl
from jax.experimental.pallas import tpu as pltpu

# ---------------------------------------------------------------------------
# Static architecture constants (agent_type in ['oracle', 'oracle-ego', 'no-map'])
# ---------------------------------------------------------------------------
MAP_SIZE = 16
N_INPUT_MAP = 34
OUTPUT_SIZE = 32
C1, C2, C3 = 32, 64, 32
OH1 = (MAP_SIZE - 4) // 2 + 1   # 7   (conv1: k=4, s=2)
OH2 = OH1 - 3 + 1               # 5   (conv2: k=3, s=1)
OH3 = OH2 - 2 + 1               # 4   (conv3: k=2, s=1)
K1 = 4 * 4 * N_INPUT_MAP        # 544
K2 = 3 * 3 * C1                 # 288
K3 = 2 * 2 * C2                 # 256
FLAT = C3 * OH3 * OH3           # 512
HALF = MAP_SIZE // 2            # 8
CPAIR = 2 * N_INPUT_MAP         # 68  (one even + one odd map column, side by side)


def _stack_b(pieces):
    """Stack per-batch-element pieces along the sublane (row / M) dimension."""
    return pieces[0] if len(pieces) == 1 else jnp.concatenate(pieces, axis=0)


# ---------------------------------------------------------------------------
# Fused forward kernel factory: one grid program == TB batch elements.
# ---------------------------------------------------------------------------
def _make_fwd_kernel(tb):
    def kernel(x_ref, w1_ref, b1_ref, w2_ref, b2_ref, w3_ref, b3_ref,
               wl_ref, bl_ref, o_ref):
        # x_ref block: (tb, 16, 8, 68); lanes [0:34] = even column, [34:68] = odd column.
        xs = [x_ref[b] for b in range(tb)]                       # tb x (16, 8, 68)

        # Hoist weight / bias loads (and bias broadcasts) out of the row loops.
        w1 = w1_ref[...]
        w2 = w2_ref[...]
        w3 = w3_ref[...]
        wl = wl_ref[...]
        b1 = jnp.broadcast_to(b1_ref[...], (tb * OH1, C1))
        b2 = jnp.broadcast_to(b2_ref[...], (tb * OH2, C2))
        b3 = jnp.broadcast_to(b3_ref[...], (tb * OH3, C3))
        bl = jnp.broadcast_to(bl_ref[...], (tb, OUTPUT_SIZE))

        # ---- conv1: 16x16x34 -> 7x7x32, k=(4,4), s=(2,2), + ReLU -------------------
        # Tap (i, j) at output (oh, ow) reads obs[2*oh+i, 2*ow+j, :].  With the paired
        # layout, taps j=2q and j=2q+1 are exactly lanes [0:34] / [34:68] of row slice
        # xs[b][2*oh+i, q:q+7, :], so each (i, q) pair is ONE 68-lane piece and the K
        # ordering (i*4 + j)*34 + c matches the HWIO-flattened w1.
        act1 = []                                      # list over oh of (tb*7, 32)
        for oh in range(OH1):
            taps = []
            for i in range(4):
                h = 2 * oh + i
                for q in range(2):
                    taps.append(_stack_b(
                        [xs[b][h, q:q + OH1, :] for b in range(tb)]))   # (tb*7, 68)
            patch = jnp.concatenate(taps, axis=-1)                      # (tb*7, 544)
            y = jnp.dot(patch, w1, preferred_element_type=jnp.float32) + b1
            act1.append(jnp.maximum(y, 0.0))

        # ---- conv2: 7x7x32 -> 5x5x64, k=(3,3), s=(1,1), + ReLU ---------------------
        # act1[oh'] rows are indexed r = b*7 + ow'.
        act2 = []                                      # list over oh of (tb*5, 64)
        for oh in range(OH2):
            taps = []
            for i in range(3):
                src = act1[oh + i]
                for j in range(3):
                    taps.append(_stack_b(
                        [src[b * OH1 + j:b * OH1 + j + OH2, :]
                         for b in range(tb)]))                           # (tb*5, 32)
            patch = jnp.concatenate(taps, axis=-1)                       # (tb*5, 288)
            y = jnp.dot(patch, w2, preferred_element_type=jnp.float32) + b2
            act2.append(jnp.maximum(y, 0.0))

        # ---- conv3: 5x5x64 -> 4x4x32, k=(2,2), s=(1,1), no ReLU --------------------
        # act2[oh'] rows are indexed r = b*5 + ow'.
        act3 = []                                      # list over oh of (tb*4, 32)
        for oh in range(OH3):
            taps = []
            for i in range(2):
                src = act2[oh + i]
                for j in range(2):
                    taps.append(_stack_b(
                        [src[b * OH2 + j:b * OH2 + j + OH3, :]
                         for b in range(tb)]))                           # (tb*4, 64)
            patch = jnp.concatenate(taps, axis=-1)                       # (tb*4, 256)
            act3.append(jnp.dot(patch, w3, preferred_element_type=jnp.float32) + b3)

        # ---- flatten (h, w, c) + Linear + ReLU ------------------------------------
        # wl rows were pre-permuted outside the kernel to fold torch's NCHW Flatten,
        # so the kernel consumes its natural (h, w, c) order with no transpose.
        feat = _stack_b([
            jnp.concatenate(
                [act3[oh][b * OH3 + ow:b * OH3 + ow + 1, :]
                 for oh in range(OH3) for ow in range(OH3)], axis=-1)    # (1, 512)
            for b in range(tb)])                                         # (tb, 512)
        out = jnp.maximum(
            jnp.dot(feat, wl, preferred_element_type=jnp.float32) + bl, 0.0)
        o_ref[0] = out                                                   # (tb, 32)

    return kernel


# ---------------------------------------------------------------------------
# Wrapper: one pallas_call for the whole forward.
# ---------------------------------------------------------------------------
def trajmap_cnn_forward(obs, w1, b1, w2, b2, w3, b3, wl_k, bl):
    """obs: [B, 16, 16, 34] NHWC.  wl_k already has the NCHW-flatten fold applied."""
    B = obs.shape[0]
    # Largest batch tile <= 8 that divides B (B=2 -> TB=2, grid=(1,)).
    TB = max(d for d in range(1, min(B, 8) + 1) if B % d == 0)
    G = B // TB

    # Free, contiguous reshape: column pair (2q, 2q+1) -> 68 lanes of half-column q.
    xr = obs.reshape(B, MAP_SIZE, HALF, CPAIR)

    w1f = w1.reshape(K1, C1)
    w2f = w2.reshape(K2, C2)
    w3f = w3.reshape(K3, C3)

    flops = 2 * B * (OH1 * OH1 * K1 * C1 + OH2 * OH2 * K2 * C2
                     + OH3 * OH3 * K3 * C3 + FLAT * OUTPUT_SIZE)
    bytes_accessed = 4 * (B * MAP_SIZE * MAP_SIZE * N_INPUT_MAP
                          + K1 * C1 + C1 + K2 * C2 + C2 + K3 * C3 + C3
                          + FLAT * OUTPUT_SIZE + OUTPUT_SIZE
                          + B * OUTPUT_SIZE)

    out = pl.pallas_call(
        _make_fwd_kernel(TB),
        out_shape=jax.ShapeDtypeStruct((G, TB, OUTPUT_SIZE), jnp.float32),
        grid=(G,),
        in_specs=[
            pl.BlockSpec((TB, MAP_SIZE, HALF, CPAIR), lambda g: (g, 0, 0, 0)),  # obs
            pl.BlockSpec((K1, C1), lambda g: (0, 0)),             # w1
            pl.BlockSpec((1, C1), lambda g: (0, 0)),              # b1
            pl.BlockSpec((K2, C2), lambda g: (0, 0)),             # w2
            pl.BlockSpec((1, C2), lambda g: (0, 0)),              # b2
            pl.BlockSpec((K3, C3), lambda g: (0, 0)),             # w3
            pl.BlockSpec((1, C3), lambda g: (0, 0)),              # b3
            pl.BlockSpec((FLAT, OUTPUT_SIZE), lambda g: (0, 0)),  # wl (permuted)
            pl.BlockSpec((1, OUTPUT_SIZE), lambda g: (0, 0)),     # bl
        ],
        out_specs=pl.BlockSpec((1, TB, OUTPUT_SIZE), lambda g: (g, 0, 0)),
        compiler_params=pltpu.CompilerParams(dimension_semantics=("parallel",)),
        cost_estimate=pl.CostEstimate(flops=flops, transcendentals=0,
                                      bytes_accessed=bytes_accessed),
    )(xr, w1f, b1.reshape(1, C1), w2f, b2.reshape(1, C2),
      w3f, b3.reshape(1, C3), wl_k, bl.reshape(1, OUTPUT_SIZE))

    return out.reshape(B, OUTPUT_SIZE)


# ---------------------------------------------------------------------------
# Parameter init (kaiming_normal_ with relu gain, fan_in mode; bias = 0)
# ---------------------------------------------------------------------------
def kaiming_normal(key, shape, fan_in):
    std = jnp.sqrt(2.0 / float(fan_in))
    return (std * jax.random.normal(key, shape, dtype=jnp.float32)).astype(jnp.float32)


if __name__ == "__main__":
    B = 2
    key = jax.random.PRNGKey(0)
    k_obs, kk1, kk2, kk3, kk4 = jax.random.split(key, 5)

    # Observations arrive NHWC, exactly as in the PyTorch forward (it permutes to NCHW).
    obs = jax.random.normal(k_obs, (B, MAP_SIZE, MAP_SIZE, N_INPUT_MAP), dtype=jnp.float32)

    # Weights in HWIO layout (mathematically equivalent to torch's NCHW convs).
    w1 = kaiming_normal(kk1, (4, 4, N_INPUT_MAP, C1), fan_in=4 * 4 * N_INPUT_MAP)
    b1 = jnp.zeros((C1,), jnp.float32)
    w2 = kaiming_normal(kk2, (3, 3, C1, C2), fan_in=3 * 3 * C1)
    b2 = jnp.zeros((C2,), jnp.float32)
    w3 = kaiming_normal(kk3, (2, 2, C2, C3), fan_in=2 * 2 * C2)
    b3 = jnp.zeros((C3,), jnp.float32)
    # Linear weight with rows in torch's Flatten(NCHW) order: row index = c*16 + h*4 + w.
    wl_nchw = kaiming_normal(kk4, (FLAT, OUTPUT_SIZE), fan_in=FLAT)
    bl = jnp.zeros((OUTPUT_SIZE,), jnp.float32)

    # One-time fold of the NCHW flatten permutation into the Linear weight:
    # kernel flatten order is (h, w, c) -> row index = (h*4 + w)*32 + c.
    wl_k = wl_nchw.reshape(C3, OH3, OH3, OUTPUT_SIZE).transpose(1, 2, 0, 3).reshape(FLAT, OUTPUT_SIZE)

    fwd = jax.jit(trajmap_cnn_forward)
    out = fwd(obs, w1, b1, w2, b2, w3, b3, wl_k, bl)
    jax.block_until_ready(out)
    assert out.shape == (B, OUTPUT_SIZE), out.shape

    # Pure-JAX reference mirroring the PyTorch module (incl. the NCHW Flatten).
    def reference(x):
        def conv(h, w, b, s):
            y = jax.lax.conv_general_dilated(
                h, w, window_strides=s, padding="VALID",
                dimension_numbers=("NHWC", "HWIO", "NHWC"))
            return y + b
        h = jax.nn.relu(conv(x, w1, b1, (2, 2)))
        h = jax.nn.relu(conv(h, w2, b2, (1, 1)))
        h = conv(h, w3, b3, (1, 1))
        h = jnp.transpose(h, (0, 3, 1, 2)).reshape(h.shape[0], -1)   # torch Flatten on NCHW
        return jax.nn.relu(h @ wl_nchw + bl)

    ref = jax.jit(reference)(obs)
    jax.block_until_ready(ref)
    np.testing.assert_allclose(np.asarray(out), np.asarray(ref), rtol=5e-2, atol=5e-2)
    assert bool(np.all(np.asarray(out) >= 0.0))   # final ReLU
    print("KERNEL_OK")
</pallas_src>

<mosaic_0001>
module attributes {stable_mosaic.version = 11 : i64} {
  func.func @kernel(%arg0: i32, %arg1: memref<2x16x8x68xf32, #tpu.memory_space<vmem>>, %arg2: memref<544x32xf32, #tpu.memory_space<vmem>>, %arg3: memref<1x32xf32, #tpu.memory_space<vmem>>, %arg4: memref<288x64xf32, #tpu.memory_space<vmem>>, %arg5: memref<1x64xf32, #tpu.memory_space<vmem>>, %arg6: memref<256x32xf32, #tpu.memory_space<vmem>>, %arg7: memref<1x32xf32, #tpu.memory_space<vmem>>, %arg8: memref<512x32xf32, #tpu.memory_space<vmem>>, %arg9: memref<1x32xf32, #tpu.memory_space<vmem>>, %arg10: memref<1x2x32xf32, #tpu.memory_space<vmem>>) attributes {dimension_semantics = [#tpu.dimension_semantics<parallel>], iteration_bounds = array<i64: 1>, scalar_prefetch = 0 : i64, scratch_operands = 0 : i64, tpu.core_type = #tpu.core_type<tc>, window_params = [{transform_indices = @transform_0, window_bounds = array<i64: 2, 16, 8, 68>}, {pipeline_mode = #tpu.pipeline_mode<synchronous>, transform_indices = @transform_1, window_bounds = array<i64: 544, 32>}, {pipeline_mode = #tpu.pipeline_mode<synchronous>, transform_indices = @transform_2, window_bounds = array<i64: 1, 32>}, {pipeline_mode = #tpu.pipeline_mode<synchronous>, transform_indices = @transform_3, window_bounds = array<i64: 288, 64>}, {pipeline_mode = #tpu.pipeline_mode<synchronous>, transform_indices = @transform_4, window_bounds = array<i64: 1, 64>}, {pipeline_mode = #tpu.pipeline_mode<synchronous>, transform_indices = @transform_5, window_bounds = array<i64: 256, 32>}, {pipeline_mode = #tpu.pipeline_mode<synchronous>, transform_indices = @transform_6, window_bounds = array<i64: 1, 32>}, {pipeline_mode = #tpu.pipeline_mode<synchronous>, transform_indices = @transform_7, window_bounds = array<i64: 512, 32>}, {pipeline_mode = #tpu.pipeline_mode<synchronous>, transform_indices = @transform_8, window_bounds = array<i64: 1, 32>}, {transform_indices = @transform_9, window_bounds = array<i64: 1, 2, 32>}]} {
    %c0 = arith.constant 0 : index
    %c0_0 = arith.constant 0 : index
    %c0_1 = arith.constant 0 : index
    %c0_2 = arith.constant 0 : index
    %0 = vector.load %arg1[%c0, %c0_0, %c0_1, %c0_2] : memref<2x16x8x68xf32, #tpu.memory_space<vmem>>, vector<1x16x8x68xf32>
    %1 = vector.shape_cast %0 : vector<1x16x8x68xf32> to vector<16x8x68xf32>
    %c1 = arith.constant 1 : index
    %c0_3 = arith.constant 0 : index
    %c0_4 = arith.constant 0 : index
    %c0_5 = arith.constant 0 : index
    %2 = vector.load %arg1[%c1, %c0_3, %c0_4, %c0_5] : memref<2x16x8x68xf32, #tpu.memory_space<vmem>>, vector<1x16x8x68xf32>
    %3 = vector.shape_cast %2 : vector<1x16x8x68xf32> to vector<16x8x68xf32>
    %c0_6 = arith.constant 0 : index
    %c0_7 = arith.constant 0 : index
    %4 = vector.load %arg2[%c0_6, %c0_7] : memref<544x32xf32, #tpu.memory_space<vmem>>, vector<544x32xf32>
    %c0_8 = arith.constant 0 : index
    %c0_9 = arith.constant 0 : index
    %5 = vector.load %arg4[%c0_8, %c0_9] : memref<288x64xf32, #tpu.memory_space<vmem>>, vector<288x64xf32>
    %c0_10 = arith.constant 0 : index
    %c0_11 = arith.constant 0 : index
    %6 = vector.load %arg6[%c0_10, %c0_11] : memref<256x32xf32, #tpu.memory_space<vmem>>, vector<256x32xf32>
    %c0_12 = arith.constant 0 : index
    %c0_13 = arith.constant 0 : index
    %7 = vector.load %arg8[%c0_12, %c0_13] : memref<512x32xf32, #tpu.memory_space<vmem>>, vector<512x32xf32>
    %c0_14 = arith.constant 0 : index
    %c0_15 = arith.constant 0 : index
    %8 = vector.load %arg3[%c0_14, %c0_15] : memref<1x32xf32, #tpu.memory_space<vmem>>, vector<1x32xf32>
    %9 = vector.shape_cast %8 : vector<1x32xf32> to vector<1x32xf32>
    %10 = vector.broadcast %9 : vector<1x32xf32> to vector<14x32xf32>
    %c0_16 = arith.constant 0 : index
    %c0_17 = arith.constant 0 : index
    %11 = vector.load %arg5[%c0_16, %c0_17] : memref<1x64xf32, #tpu.memory_space<vmem>>, vector<1x64xf32>
    %12 = vector.shape_cast %11 : vector<1x64xf32> to vector<1x64xf32>
    %13 = vector.broadcast %12 : vector<1x64xf32> to vector<10x64xf32>
    %c0_18 = arith.constant 0 : index
    %c0_19 = arith.constant 0 : index
    %14 = vector.load %arg7[%c0_18, %c0_19] : memref<1x32xf32, #tpu.memory_space<vmem>>, vector<1x32xf32>
    %15 = vector.shape_cast %14 : vector<1x32xf32> to vector<1x32xf32>
    %16 = vector.broadcast %15 : vector<1x32xf32> to vector<8x32xf32>
    %c0_20 = arith.constant 0 : index
    %c0_21 = arith.constant 0 : index
    %17 = vector.load %arg9[%c0_20, %c0_21] : memref<1x32xf32, #tpu.memory_space<vmem>>, vector<1x32xf32>
    %18 = vector.shape_cast %17 : vector<1x32xf32> to vector<1x32xf32>
    %19 = vector.broadcast %18 : vector<1x32xf32> to vector<2x32xf32>
    %20 = vector.extract_strided_slice %1 {offsets = [0, 0, 0], sizes = [1, 7, 68], strides = [1, 1, 1]} : vector<16x8x68xf32> to vector<1x7x68xf32>
    %21 = vector.shape_cast %20 : vector<1x7x68xf32> to vector<7x68xf32>
    %22 = vector.extract_strided_slice %3 {offsets = [0, 0, 0], sizes = [1, 7, 68], strides = [1, 1, 1]} : vector<16x8x68xf32> to vector<1x7x68xf32>
    %23 = vector.shape_cast %22 : vector<1x7x68xf32> to vector<7x68xf32>
    %24 = tpu.concatenate %21, %23 in 0 : vector<7x68xf32>, vector<7x68xf32> -> vector<14x68xf32>
    %25 = vector.extract_strided_slice %1 {offsets = [0, 1, 0], sizes = [1, 7, 68], strides = [1, 1, 1]} : vector<16x8x68xf32> to vector<1x7x68xf32>
    %26 = vector.shape_cast %25 : vector<1x7x68xf32> to vector<7x68xf32>
    %27 = vector.extract_strided_slice %3 {offsets = [0, 1, 0], sizes = [1, 7, 68], strides = [1, 1, 1]} : vector<16x8x68xf32> to vector<1x7x68xf32>
    %28 = vector.shape_cast %27 : vector<1x7x68xf32> to vector<7x68xf32>
    %29 = tpu.concatenate %26, %28 in 0 : vector<7x68xf32>, vector<7x68xf32> -> vector<14x68xf32>
    %30 = vector.extract_strided_slice %1 {offsets = [1, 0, 0], sizes = [1, 7, 68], strides = [1, 1, 1]} : vector<16x8x68xf32> to vector<1x7x68xf32>
    %31 = vector.shape_cast %30 : vector<1x7x68xf32> to vector<7x68xf32>
    %32 = vector.extract_strided_slice %3 {offsets = [1, 0, 0], sizes = [1, 7, 68], strides = [1, 1, 1]} : vector<16x8x68xf32> to vector<1x7x68xf32>
    %33 = vector.shape_cast %32 : vector<1x7x68xf32> to vector<7x68xf32>
    %34 = tpu.concatenate %31, %33 in 0 : vector<7x68xf32>, vector<7x68xf32> -> vector<14x68xf32>
    %35 = vector.extract_strided_slice %1 {offsets = [1, 1, 0], sizes = [1, 7, 68], strides = [1, 1, 1]} : vector<16x8x68xf32> to vector<1x7x68xf32>
    %36 = vector.shape_cast %35 : vector<1x7x68xf32> to vector<7x68xf32>
    %37 = vector.extract_strided_slice %3 {offsets = [1, 1, 0], sizes = [1, 7, 68], strides = [1, 1, 1]} : vector<16x8x68xf32> to vector<1x7x68xf32>
    %38 = vector.shape_cast %37 : vector<1x7x68xf32> to vector<7x68xf32>
    %39 = tpu.concatenate %36, %38 in 0 : vector<7x68xf32>, vector<7x68xf32> -> vector<14x68xf32>
    %40 = vector.extract_strided_slice %1 {offsets = [2, 0, 0], sizes = [1, 7, 68], strides = [1, 1, 1]} : vector<16x8x68xf32> to vector<1x7x68xf32>
    %41 = vector.shape_cast %40 : vector<1x7x68xf32> to vector<7x68xf32>
    %42 = vector.extract_strided_slice %3 {offsets = [2, 0, 0], sizes = [1, 7, 68], strides = [1, 1, 1]} : vector<16x8x68xf32> to vector<1x7x68xf32>
    %43 = vector.shape_cast %42 : vector<1x7x68xf32> to vector<7x68xf32>
    %44 = tpu.concatenate %41, %43 in 0 : vector<7x68xf32>, vector<7x68xf32> -> vector<14x68xf32>
    %45 = vector.extract_strided_slice %1 {offsets = [2, 1, 0], sizes = [1, 7, 68], strides = [1, 1, 1]} : vector<16x8x68xf32> to vector<1x7x68xf32>
    %46 = vector.shape_cast %45 : vector<1x7x68xf32> to vector<7x68xf32>
    %47 = vector.extract_strided_slice %3 {offsets = [2, 1, 0], sizes = [1, 7, 68], strides = [1, 1, 1]} : vector<16x8x68xf32> to vector<1x7x68xf32>
    %48 = vector.shape_cast %47 : vector<1x7x68xf32> to vector<7x68xf32>
    %49 = tpu.concatenate %46, %48 in 0 : vector<7x68xf32>, vector<7x68xf32> -> vector<14x68xf32>
    %50 = vector.extract_strided_slice %1 {offsets = [3, 0, 0], sizes = [1, 7, 68], strides = [1, 1, 1]} : vector<16x8x68xf32> to vector<1x7x68xf32>
    %51 = vector.shape_cast %50 : vector<1x7x68xf32> to vector<7x68xf32>
    %52 = vector.extract_strided_slice %3 {offsets = [3, 0, 0], sizes = [1, 7, 68], strides = [1, 1, 1]} : vector<16x8x68xf32> to vector<1x7x68xf32>
    %53 = vector.shape_cast %52 : vector<1x7x68xf32> to vector<7x68xf32>
    %54 = tpu.concatenate %51, %53 in 0 : vector<7x68xf32>, vector<7x68xf32> -> vector<14x68xf32>
    %55 = vector.extract_strided_slice %1 {offsets = [3, 1, 0], sizes = [1, 7, 68], strides = [1, 1, 1]} : vector<16x8x68xf32> to vector<1x7x68xf32>
    %56 = vector.shape_cast %55 : vector<1x7x68xf32> to vector<7x68xf32>
    %57 = vector.extract_strided_slice %3 {offsets = [3, 1, 0], sizes = [1, 7, 68], strides = [1, 1, 1]} : vector<16x8x68xf32> to vector<1x7x68xf32>
    %58 = vector.shape_cast %57 : vector<1x7x68xf32> to vector<7x68xf32>
    %59 = tpu.concatenate %56, %58 in 0 : vector<7x68xf32>, vector<7x68xf32> -> vector<14x68xf32>
    %60 = tpu.concatenate %24, %29, %34, %39, %44, %49, %54, %59 in 1 : vector<14x68xf32>, vector<14x68xf32>, vector<14x68xf32>, vector<14x68xf32>, vector<14x68xf32>, vector<14x68xf32>, vector<14x68xf32>, vector<14x68xf32> -> vector<14x544xf32>
    %cst = arith.constant dense<0.000000e+00> : vector<14x32xf32>
    %61 = tpu.matmul %60, %4, %cst {dimension_numbers = #tpu.dot_dimension_numbers<[1], [0], [0], [1], [0, 0, 1, 1], [], []>} : vector<14x544xf32>, vector<544x32xf32>, vector<14x32xf32> -> vector<14x32xf32>
    %62 = arith.addf %61, %10 : vector<14x32xf32>
    %cst_22 = arith.constant 0.000000e+00 : f32
    %63 = vector.broadcast %cst_22 : f32 to vector<14x32xf32>
    %64 = arith.maximumf %62, %63 : vector<14x32xf32>
    %65 = vector.extract_strided_slice %1 {offsets = [2, 0, 0], sizes = [1, 7, 68], strides = [1, 1, 1]} : vector<16x8x68xf32> to vector<1x7x68xf32>
    %66 = vector.shape_cast %65 : vector<1x7x68xf32> to vector<7x68xf32>
    %67 = vector.extract_strided_slice %3 {offsets = [2, 0, 0], sizes = [1, 7, 68], strides = [1, 1, 1]} : vector<16x8x68xf32> to vector<1x7x68xf32>
    %68 = vector.shape_cast %67 : vector<1x7x68xf32> to vector<7x68xf32>
    %69 = tpu.concatenate %66, %68 in 0 : vector<7x68xf32>, vector<7x68xf32> -> vector<14x68xf32>
    %70 = vector.extract_strided_slice %1 {offsets = [2, 1, 0], sizes = [1, 7, 68], strides = [1, 1, 1]} : vector<16x8x68xf32> to vector<1x7x68xf32>
    %71 = vector.shape_cast %70 : vector<1x7x68xf32> to vector<7x68xf32>
    %72 = vector.extract_strided_slice %3 {offsets = [2, 1, 0], sizes = [1, 7, 68], strides = [1, 1, 1]} : vector<16x8x68xf32> to vector<1x7x68xf32>
    %73 = vector.shape_cast %72 : vector<1x7x68xf32> to vector<7x68xf32>
    %74 = tpu.concatenate %71, %73 in 0 : vector<7x68xf32>, vector<7x68xf32> -> vector<14x68xf32>
    %75 = vector.extract_strided_slice %1 {offsets = [3, 0, 0], sizes = [1, 7, 68], strides = [1, 1, 1]} : vector<16x8x68xf32> to vector<1x7x68xf32>
    %76 = vector.shape_cast %75 : vector<1x7x68xf32> to vector<7x68xf32>
    %77 = vector.extract_strided_slice %3 {offsets = [3, 0, 0], sizes = [1, 7, 68], strides = [1, 1, 1]} : vector<16x8x68xf32> to vector<1x7x68xf32>
    %78 = vector.shape_cast %77 : vector<1x7x68xf32> to vector<7x68xf32>
    %79 = tpu.concatenate %76, %78 in 0 : vector<7x68xf32>, vector<7x68xf32> -> vector<14x68xf32>
    %80 = vector.extract_strided_slice %1 {offsets = [3, 1, 0], sizes = [1, 7, 68], strides = [1, 1, 1]} : vector<16x8x68xf32> to vector<1x7x68xf32>
    %81 = vector.shape_cast %80 : vector<1x7x68xf32> to vector<7x68xf32>
    %82 = vector.extract_strided_slice %3 {offsets = [3, 1, 0], sizes = [1, 7, 68], strides = [1, 1, 1]} : vector<16x8x68xf32> to vector<1x7x68xf32>
    %83 = vector.shape_cast %82 : vector<1x7x68xf32> to vector<7x68xf32>
    %84 = tpu.concatenate %81, %83 in 0 : vector<7x68xf32>, vector<7x68xf32> -> vector<14x68xf32>
    %85 = vector.extract_strided_slice %1 {offsets = [4, 0, 0], sizes = [1, 7, 68], strides = [1, 1, 1]} : vector<16x8x68xf32> to vector<1x7x68xf32>
    %86 = vector.shape_cast %85 : vector<1x7x68xf32> to vector<7x68xf32>
    %87 = vector.extract_strided_slice %3 {offsets = [4, 0, 0], sizes = [1, 7, 68], strides = [1, 1, 1]} : vector<16x8x68xf32> to vector<1x7x68xf32>
    %88 = vector.shape_cast %87 : vector<1x7x68xf32> to vector<7x68xf32>
    %89 = tpu.concatenate %86, %88 in 0 : vector<7x68xf32>, vector<7x68xf32> -> vector<14x68xf32>
    %90 = vector.extract_strided_slice %1 {offsets = [4, 1, 0], sizes = [1, 7, 68], strides = [1, 1, 1]} : vector<16x8x68xf32> to vector<1x7x68xf32>
    %91 = vector.shape_cast %90 : vector<1x7x68xf32> to vector<7x68xf32>
    %92 = vector.extract_strided_slice %3 {offsets = [4, 1, 0], sizes = [1, 7, 68], strides = [1, 1, 1]} : vector<16x8x68xf32> to vector<1x7x68xf32>
    %93 = vector.shape_cast %92 : vector<1x7x68xf32> to vector<7x68xf32>
    %94 = tpu.concatenate %91, %93 in 0 : vector<7x68xf32>, vector<7x68xf32> -> vector<14x68xf32>
    %95 = vector.extract_strided_slice %1 {offsets = [5, 0, 0], sizes = [1, 7, 68], strides = [1, 1, 1]} : vector<16x8x68xf32> to vector<1x7x68xf32>
    %96 = vector.shape_cast %95 : vector<1x7x68xf32> to vector<7x68xf32>
    %97 = vector.extract_strided_slice %3 {offsets = [5, 0, 0], sizes = [1, 7, 68], strides = [1, 1, 1]} : vector<16x8x68xf32> to vector<1x7x68xf32>
    %98 = vector.shape_cast %97 : vector<1x7x68xf32> to vector<7x68xf32>
    %99 = tpu.concatenate %96, %98 in 0 : vector<7x68xf32>, vector<7x68xf32> -> vector<14x68xf32>
    %100 = vector.extract_strided_slice %1 {offsets = [5, 1, 0], sizes = [1, 7, 68], strides = [1, 1, 1]} : vector<16x8x68xf32> to vector<1x7x68xf32>
    %101 = vector.shape_cast %100 : vector<1x7x68xf32> to vector<7x68xf32>
    %102 = vector.extract_strided_slice %3 {offsets = [5, 1, 0], sizes = [1, 7, 68], strides = [1, 1, 1]} : vector<16x8x68xf32> to vector<1x7x68xf32>
    %103 = vector.shape_cast %102 : vector<1x7x68xf32> to vector<7x68xf32>
    %104 = tpu.concatenate %101, %103 in 0 : vector<7x68xf32>, vector<7x68xf32> -> vector<14x68xf32>
    %105 = tpu.concatenate %69, %74, %79, %84, %89, %94, %99, %104 in 1 : vector<14x68xf32>, vector<14x68xf32>, vector<14x68xf32>, vector<14x68xf32>, vector<14x68xf32>, vector<14x68xf32>, vector<14x68xf32>, vector<14x68xf32> -> vector<14x544xf32>
    %cst_23 = arith.constant dense<0.000000e+00> : vector<14x32xf32>
    %106 = tpu.matmul %105, %4, %cst_23 {dimension_numbers = #tpu.dot_dimension_numbers<[1], [0], [0], [1], [0, 0, 1, 1], [], []>} : vector<14x544xf32>, vector<544x32xf32>, vector<14x32xf32> -> vector<14x32xf32>
    %107 = arith.addf %106, %10 : vector<14x32xf32>
    %cst_24 = arith.constant 0.000000e+00 : f32
    %108 = vector.broadcast %cst_24 : f32 to vector<14x32xf32>
    %109 = arith.maximumf %107, %108 : vector<14x32xf32>
    %110 = vector.extract_strided_slice %1 {offsets = [4, 0, 0], sizes = [1, 7, 68], strides = [1, 1, 1]} : vector<16x8x68xf32> to vector<1x7x68xf32>
    %111 = vector.shape_cast %110 : vector<1x7x68xf32> to vector<7x68xf32>
    %112 = vector.extract_strided_slice %3 {offsets = [4, 0, 0], sizes = [1, 7, 68], strides = [1, 1, 1]} : vector<16x8x68xf32> to vector<1x7x68xf32>
    %113 = vector.shape_cast %112 : vector<1x7x68xf32> to vector<7x68xf32>
    %114 = tpu.concatenate %111, %113 in 0 : vector<7x68xf32>, vector<7x68xf32> -> vector<14x68xf32>
    %115 = vector.extract_strided_slice %1 {offsets = [4, 1, 0], sizes = [1, 7, 68], strides = [1, 1, 1]} : vector<16x8x68xf32> to vector<1x7x68xf32>
    %116 = vector.shape_cast %115 : vector<1x7x68xf32> to vector<7x68xf32>
    %117 = vector.extract_strided_slice %3 {offsets = [4, 1, 0], sizes = [1, 7, 68], strides = [1, 1, 1]} : vector<16x8x68xf32> to vector<1x7x68xf32>
    %118 = vector.shape_cast %117 : vector<1x7x68xf32> to vector<7x68xf32>
    %119 = tpu.concatenate %116, %118 in 0 : vector<7x68xf32>, vector<7x68xf32> -> vector<14x68xf32>
    %120 = vector.extract_strided_slice %1 {offsets = [5, 0, 0], sizes = [1, 7, 68], strides = [1, 1, 1]} : vector<16x8x68xf32> to vector<1x7x68xf32>
    %121 = vector.shape_cast %120 : vector<1x7x68xf32> to vector<7x68xf32>
    %122 = vector.extract_strided_slice %3 {offsets = [5, 0, 0], sizes = [1, 7, 68], strides = [1, 1, 1]} : vector<16x8x68xf32> to vector<1x7x68xf32>
    %123 = vector.shape_cast %122 : vector<1x7x68xf32> to vector<7x68xf32>
    %124 = tpu.concatenate %121, %123 in 0 : vector<7x68xf32>, vector<7x68xf32> -> vector<14x68xf32>
    %125 = vector.extract_strided_slice %1 {offsets = [5, 1, 0], sizes = [1, 7, 68], strides = [1, 1, 1]} : vector<16x8x68xf32> to vector<1x7x68xf32>
    %126 = vector.shape_cast %125 : vector<1x7x68xf32> to vector<7x68xf32>
    %127 = vector.extract_strided_slice %3 {offsets = [5, 1, 0], sizes = [1, 7, 68], strides = [1, 1, 1]} : vector<16x8x68xf32> to vector<1x7x68xf32>
    %128 = vector.shape_cast %127 : vector<1x7x68xf32> to vector<7x68xf32>
    %129 = tpu.concatenate %126, %128 in 0 : vector<7x68xf32>, vector<7x68xf32> -> vector<14x68xf32>
    %130 = vector.extract_strided_slice %1 {offsets = [6, 0, 0], sizes = [1, 7, 68], strides = [1, 1, 1]} : vector<16x8x68xf32> to vector<1x7x68xf32>
    %131 = vector.shape_cast %130 : vector<1x7x68xf32> to vector<7x68xf32>
    %132 = vector.extract_strided_slice %3 {offsets = [6, 0, 0], sizes = [1, 7, 68], strides = [1, 1, 1]} : vector<16x8x68xf32> to vector<1x7x68xf32>
    %133 = vector.shape_cast %132 : vector<1x7x68xf32> to vector<7x68xf32>
    %134 = tpu.concatenate %131, %133 in 0 : vector<7x68xf32>, vector<7x68xf32> -> vector<14x68xf32>
    %135 = vector.extract_strided_slice %1 {offsets = [6, 1, 0], sizes = [1, 7, 68], strides = [1, 1, 1]} : vector<16x8x68xf32> to vector<1x7x68xf32>
    %136 = vector.shape_cast %135 : vector<1x7x68xf32> to vector<7x68xf32>
    %137 = vector.extract_strided_slice %3 {offsets = [6, 1, 0], sizes = [1, 7, 68], strides = [1, 1, 1]} : vector<16x8x68xf32> to vector<1x7x68xf32>
    %138 = vector.shape_cast %137 : vector<1x7x68xf32> to vector<7x68xf32>
    %139 = tpu.concatenate %136, %138 in 0 : vector<7x68xf32>, vector<7x68xf32> -> vector<14x68xf32>
    %140 = vector.extract_strided_slice %1 {offsets = [7, 0, 0], sizes = [1, 7, 68], strides = [1, 1, 1]} : vector<16x8x68xf32> to vector<1x7x68xf32>
    %141 = vector.shape_cast %140 : vector<1x7x68xf32> to vector<7x68xf32>
    %142 = vector.extract_strided_slice %3 {offsets = [7, 0, 0], sizes = [1, 7, 68], strides = [1, 1, 1]} : vector<16x8x68xf32> to vector<1x7x68xf32>
    %143 = vector.shape_cast %142 : vector<1x7x68xf32> to vector<7x68xf32>
    %144 = tpu.concatenate %141, %143 in 0 : vector<7x68xf32>, vector<7x68xf32> -> vector<14x68xf32>
    %145 = vector.extract_strided_slice %1 {offsets = [7, 1, 0], sizes = [1, 7, 68], strides = [1, 1, 1]} : vector<16x8x68xf32> to vector<1x7x68xf32>
    %146 = vector.shape_cast %145 : vector<1x7x68xf32> to vector<7x68xf32>
    %147 = vector.extract_strided_slice %3 {offsets = [7, 1, 0], sizes = [1, 7, 68], strides = [1, 1, 1]} : vector<16x8x68xf32> to vector<1x7x68xf32>
    %148 = vector.shape_cast %147 : vector<1x7x68xf32> to vector<7x68xf32>
    %149 = tpu.concatenate %146, %148 in 0 : vector<7x68xf32>, vector<7x68xf32> -> vector<14x68xf32>
    %150 = tpu.concatenate %114, %119, %124, %129, %134, %139, %144, %149 in 1 : vector<14x68xf32>, vector<14x68xf32>, vector<14x68xf32>, vector<14x68xf32>, vector<14x68xf32>, vector<14x68xf32>, vector<14x68xf32>, vector<14x68xf32> -> vector<14x544xf32>
    %cst_25 = arith.constant dense<0.000000e+00> : vector<14x32xf32>
    %151 = tpu.matmul %150, %4, %cst_25 {dimension_numbers = #tpu.dot_dimension_numbers<[1], [0], [0], [1], [0, 0, 1, 1], [], []>} : vector<14x544xf32>, vector<544x32xf32>, vector<14x32xf32> -> vector<14x32xf32>
    %152 = arith.addf %151, %10 : vector<14x32xf32>
    %cst_26 = arith.constant 0.000000e+00 : f32
    %153 = vector.broadcast %cst_26 : f32 to vector<14x32xf32>
    %154 = arith.maximumf %152, %153 : vector<14x32xf32>
    %155 = vector.extract_strided_slice %1 {offsets = [6, 0, 0], sizes = [1, 7, 68], strides = [1, 1, 1]} : vector<16x8x68xf32> to vector<1x7x68xf32>
    %156 = vector.shape_cast %155 : vector<1x7x68xf32> to vector<7x68xf32>
    %157 = vector.extract_strided_slice %3 {offsets = [6, 0, 0], sizes = [1, 7, 68], strides = [1, 1, 1]} : vector<16x8x68xf32> to vector<1x7x68xf32>
    %158 = vector.shape_cast %157 : vector<1x7x68xf32> to vector<7x68xf32>
    %159 = tpu.concatenate %156, %158 in 0 : vector<7x68xf32>, vector<7x68xf32> -> vector<14x68xf32>
    %160 = vector.extract_strided_slice %1 {offsets = [6, 1, 0], sizes = [1, 7, 68], strides = [1, 1, 1]} : vector<16x8x68xf32> to vector<1x7x68xf32>
    %161 = vector.shape_cast %160 : vector<1x7x68xf32> to vector<7x68xf32>
    %162 = vector.extract_strided_slice %3 {offsets = [6, 1, 0], sizes = [1, 7, 68], strides = [1, 1, 1]} : vector<16x8x68xf32> to vector<1x7x68xf32>
    %163 = vector.shape_cast %162 : vector<1x7x68xf32> to vector<7x68xf32>
    %164 = tpu.concatenate %161, %163 in 0 : vector<7x68xf32>, vector<7x68xf32> -> vector<14x68xf32>
    %165 = vector.extract_strided_slice %1 {offsets = [7, 0, 0], sizes = [1, 7, 68], strides = [1, 1, 1]} : vector<16x8x68xf32> to vector<1x7x68xf32>
    %166 = vector.shape_cast %165 : vector<1x7x68xf32> to vector<7x68xf32>
    %167 = vector.extract_strided_slice %3 {offsets = [7, 0, 0], sizes = [1, 7, 68], strides = [1, 1, 1]} : vector<16x8x68xf32> to vector<1x7x68xf32>
    %168 = vector.shape_cast %167 : vector<1x7x68xf32> to vector<7x68xf32>
    %169 = tpu.concatenate %166, %168 in 0 : vector<7x68xf32>, vector<7x68xf32> -> vector<14x68xf32>
    %170 = vector.extract_strided_slice %1 {offsets = [7, 1, 0], sizes = [1, 7, 68], strides = [1, 1, 1]} : vector<16x8x68xf32> to vector<1x7x68xf32>
    %171 = vector.shape_cast %170 : vector<1x7x68xf32> to vector<7x68xf32>
    %172 = vector.extract_strided_slice %3 {offsets = [7, 1, 0], sizes = [1, 7, 68], strides = [1, 1, 1]} : vector<16x8x68xf32> to vector<1x7x68xf32>
    %173 = vector.shape_cast %172 : vector<1x7x68xf32> to vector<7x68xf32>
    %174 = tpu.concatenate %171, %173 in 0 : vector<7x68xf32>, vector<7x68xf32> -> vector<14x68xf32>
    %175 = vector.extract_strided_slice %1 {offsets = [8, 0, 0], sizes = [1, 7, 68], strides = [1, 1, 1]} : vector<16x8x68xf32> to vector<1x7x68xf32>
    %176 = vector.shape_cast %175 : vector<1x7x68xf32> to vector<7x68xf32>
    %177 = vector.extract_strided_slice %3 {offsets = [8, 0, 0], sizes = [1, 7, 68], strides = [1, 1, 1]} : vector<16x8x68xf32> to vector<1x7x68xf32>
    %178 = vector.shape_cast %177 : vector<1x7x68xf32> to vector<7x68xf32>
    %179 = tpu.concatenate %176, %178 in 0 : vector<7x68xf32>, vector<7x68xf32> -> vector<14x68xf32>
    %180 = vector.extract_strided_slice %1 {offsets = [8, 1, 0], sizes = [1, 7, 68], strides = [1, 1, 1]} : vector<16x8x68xf32> to vector<1x7x68xf32>
    %181 = vector.shape_cast %180 : vector<1x7x68xf32> to vector<7x68xf32>
    %182 = vector.extract_strided_slice %3 {offsets = [8, 1, 0], sizes = [1, 7, 68], strides = [1, 1, 1]} : vector<16x8x68xf32> to vector<1x7x68xf32>
    %183 = vector.shape_cast %182 : vector<1x7x68xf32> to vector<7x68xf32>
    %184 = tpu.concatenate %181, %183 in 0 : vector<7x68xf32>, vector<7x68xf32> -> vector<14x68xf32>
    %185 = vector.extract_strided_slice %1 {offsets = [9, 0, 0], sizes = [1, 7, 68], strides = [1, 1, 1]} : vector<16x8x68xf32> to vector<1x7x68xf32>
    %186 = vector.shape_cast %185 : vector<1x7x68xf32> to vector<7x68xf32>
    %187 = vector.extract_strided_slice %3 {offsets = [9, 0, 0], sizes = [1, 7, 68], strides = [1, 1, 1]} : vector<16x8x68xf32> to vector<1x7x68xf32>
    %188 = vector.shape_cast %187 : vector<1x7x68xf32> to vector<7x68xf32>
    %189 = tpu.concatenate %186, %188 in 0 : vector<7x68xf32>, vector<7x68xf32> -> vector<14x68xf32>
    %190 = vector.extract_strided_slice %1 {offsets = [9, 1, 0], sizes = [1, 7, 68], strides = [1, 1, 1]} : vector<16x8x68xf32> to vector<1x7x68xf32>
    %191 = vector.shape_cast %190 : vector<1x7x68xf32> to vector<7x68xf32>
    %192 = vector.extract_strided_slice %3 {offsets = [9, 1, 0], sizes = [1, 7, 68], strides = [1, 1, 1]} : vector<16x8x68xf32> to vector<1x7x68xf32>
    %193 = vector.shape_cast %192 : vector<1x7x68xf32> to vector<7x68xf32>
    %194 = tpu.concatenate %191, %193 in 0 : vector<7x68xf32>, vector<7x68xf32> -> vector<14x68xf32>
    %195 = tpu.concatenate %159, %164, %169, %174, %179, %184, %189, %194 in 1 : vector<14x68xf32>, vector<14x68xf32>, vector<14x68xf32>, vector<14x68xf32>, vector<14x68xf32>, vector<14x68xf32>, vector<14x68xf32>, vector<14x68xf32> -> vector<14x544xf32>
    %cst_27 = arith.constant dense<0.000000e+00> : vector<14x32xf32>
    %196 = tpu.matmul %195, %4, %cst_27 {dimension_numbers = #tpu.dot_dimension_numbers<[1], [0], [0], [1], [0, 0, 1, 1], [], []>} : vector<14x544xf32>, vector<544x32xf32>, vector<14x32xf32> -> vector<14x32xf32>
    %197 = arith.addf %196, %10 : vector<14x32xf32>
    %cst_28 = arith.constant 0.000000e+00 : f32
    %198 = vector.broadcast %cst_28 : f32 to vector<14x32xf32>
    %199 = arith.maximumf %197, %198 : vector<14x32xf32>
    %200 = vector.extract_strided_slice %1 {offsets = [8, 0, 0], sizes = [1, 7, 68], strides = [1, 1, 1]} : vector<16x8x68xf32> to vector<1x7x68xf32>
    %201 = vector.shape_cast %200 : vector<1x7x68xf32> to vector<7x68xf32>
    %202 = vector.extract_strided_slice %3 {offsets = [8, 0, 0], sizes = [1, 7, 68], strides = [1, 1, 1]} : vector<16x8x68xf32> to vector<1x7x68xf32>
    %203 = vector.shape_cast %202 : vector<1x7x68xf32> to vector<7x68xf32>
    %204 = tpu.concatenate %201, %203 in 0 : vector<7x68xf32>, vector<7x68xf32> -> vector<14x68xf32>
    %205 = vector.extract_strided_slice %1 {offsets = [8, 1, 0], sizes = [1, 7, 68], strides = [1, 1, 1]} : vector<16x8x68xf32> to vector<1x7x68xf32>
    %206 = vector.shape_cast %205 : vector<1x7x68xf32> to vector<7x68xf32>
    %207 = vector.extract_strided_slice %3 {offsets = [8, 1, 0], sizes = [1, 7, 68], strides = [1, 1, 1]} : vector<16x8x68xf32> to vector<1x7x68xf32>
    %208 = vector.shape_cast %207 : vector<1x7x68xf32> to vector<7x68xf32>
    %209 = tpu.concatenate %206, %208 in 0 : vector<7x68xf32>, vector<7x68xf32> -> vector<14x68xf32>
    %210 = vector.extract_strided_slice %1 {offsets = [9, 0, 0], sizes = [1, 7, 68], strides = [1, 1, 1]} : vector<16x8x68xf32> to vector<1x7x68xf32>
    %211 = vector.shape_cast %210 : vector<1x7x68xf32> to vector<7x68xf32>
    %212 = vector.extract_strided_slice %3 {offsets = [9, 0, 0], sizes = [1, 7, 68], strides = [1, 1, 1]} : vector<16x8x68xf32> to vector<1x7x68xf32>
    %213 = vector.shape_cast %212 : vector<1x7x68xf32> to vector<7x68xf32>
    %214 = tpu.concatenate %211, %213 in 0 : vector<7x68xf32>, vector<7x68xf32> -> vector<14x68xf32>
    %215 = vector.extract_strided_slice %1 {offsets = [9, 1, 0], sizes = [1, 7, 68], strides = [1, 1, 1]} : vector<16x8x68xf32> to vector<1x7x68xf32>
    %216 = vector.shape_cast %215 : vector<1x7x68xf32> to vector<7x68xf32>
    %217 = vector.extract_strided_slice %3 {offsets = [9, 1, 0], sizes = [1, 7, 68], strides = [1, 1, 1]} : vector<16x8x68xf32> to vector<1x7x68xf32>
    %218 = vector.shape_cast %217 : vector<1x7x68xf32> to vector<7x68xf32>
    %219 = tpu.concatenate %216, %218 in 0 : vector<7x68xf32>, vector<7x68xf32> -> vector<14x68xf32>
    %220 = vector.extract_strided_slice %1 {offsets = [10, 0, 0], sizes = [1, 7, 68], strides = [1, 1, 1]} : vector<16x8x68xf32> to vector<1x7x68xf32>
    %221 = vector.shape_cast %220 : vector<1x7x68xf32> to vector<7x68xf32>
    %222 = vector.extract_strided_slice %3 {offsets = [10, 0, 0], sizes = [1, 7, 68], strides = [1, 1, 1]} : vector<16x8x68xf32> to vector<1x7x68xf32>
    %223 = vector.shape_cast %222 : vector<1x7x68xf32> to vector<7x68xf32>
    %224 = tpu.concatenate %221, %223 in 0 : vector<7x68xf32>, vector<7x68xf32> -> vector<14x68xf32>
    %225 = vector.extract_strided_slice %1 {offsets = [10, 1, 0], sizes = [1, 7, 68], strides = [1, 1, 1]} : vector<16x8x68xf32> to vector<1x7x68xf32>
    %226 = vector.shape_cast %225 : vector<1x7x68xf32> to vector<7x68xf32>
    %227 = vector.extract_strided_slice %3 {offsets = [10, 1, 0], sizes = [1, 7, 68], strides = [1, 1, 1]} : vector<16x8x68xf32> to vector<1x7x68xf32>
    %228 = vector.shape_cast %227 : vector<1x7x68xf32> to vector<7x68xf32>
    %229 = tpu.concatenate %226, %228 in 0 : vector<7x68xf32>, vector<7x68xf32> -> vector<14x68xf32>
    %230 = vector.extract_strided_slice %1 {offsets = [11, 0, 0], sizes = [1, 7, 68], strides = [1, 1, 1]} : vector<16x8x68xf32> to vector<1x7x68xf32>
    %231 = vector.shape_cast %230 : vector<1x7x68xf32> to vector<7x68xf32>
    %232 = vector.extract_strided_slice %3 {offsets = [11, 0, 0], sizes = [1, 7, 68], strides = [1, 1, 1]} : vector<16x8x68xf32> to vector<1x7x68xf32>
    %233 = vector.shape_cast %232 : vector<1x7x68xf32> to vector<7x68xf32>
    %234 = tpu.concatenate %231, %233 in 0 : vector<7x68xf32>, vector<7x68xf32> -> vector<14x68xf32>
    %235 = vector.extract_strided_slice %1 {offsets = [11, 1, 0], sizes = [1, 7, 68], strides = [1, 1, 1]} : vector<16x8x68xf32> to vector<1x7x68xf32>
    %236 = vector.shape_cast %235 : vector<1x7x68xf32> to vector<7x68xf32>
    %237 = vector.extract_strided_slice %3 {offsets = [11, 1, 0], sizes = [1, 7, 68], strides = [1, 1, 1]} : vector<16x8x68xf32> to vector<1x7x68xf32>
    %238 = vector.shape_cast %237 : vector<1x7x68xf32> to vector<7x68xf32>
    %239 = tpu.concatenate %236, %238 in 0 : vector<7x68xf32>, vector<7x68xf32> -> vector<14x68xf32>
    %240 = tpu.concatenate %204, %209, %214, %219, %224, %229, %234, %239 in 1 : vector<14x68xf32>, vector<14x68xf32>, vector<14x68xf32>, vector<14x68xf32>, vector<14x68xf32>, vector<14x68xf32>, vector<14x68xf32>, vector<14x68xf32> -> vector<14x544xf32>
    %cst_29 = arith.constant dense<0.000000e+00> : vector<14x32xf32>
    %241 = tpu.matmul %240, %4, %cst_29 {dimension_numbers = #tpu.dot_dimension_numbers<[1], [0], [0], [1], [0, 0, 1, 1], [], []>} : vector<14x544xf32>, vector<544x32xf32>, vector<14x32xf32> -> vector<14x32xf32>
    %242 = arith.addf %241, %10 : vector<14x32xf32>
    %cst_30 = arith.constant 0.000000e+00 : f32
    %243 = vector.broadcast %cst_30 : f32 to vector<14x32xf32>
    %244 = arith.maximumf %242, %243 : vector<14x32xf32>
    %245 = vector.extract_strided_slice %1 {offsets = [10, 0, 0], sizes = [1, 7, 68], strides = [1, 1, 1]} : vector<16x8x68xf32> to vector<1x7x68xf32>
    %246 = vector.shape_cast %245 : vector<1x7x68xf32> to vector<7x68xf32>
    %247 = vector.extract_strided_slice %3 {offsets = [10, 0, 0], sizes = [1, 7, 68], strides = [1, 1, 1]} : vector<16x8x68xf32> to vector<1x7x68xf32>
    %248 = vector.shape_cast %247 : vector<1x7x68xf32> to vector<7x68xf32>
    %249 = tpu.concatenate %246, %248 in 0 : vector<7x68xf32>, vector<7x68xf32> -> vector<14x68xf32>
    %250 = vector.extract_strided_slice %1 {offsets = [10, 1, 0], sizes = [1, 7, 68], strides = [1, 1, 1]} : vector<16x8x68xf32> to vector<1x7x68xf32>
    %251 = vector.shape_cast %250 : vector<1x7x68xf32> to vector<7x68xf32>
    %252 = vector.extract_strided_slice %3 {offsets = [10, 1, 0], sizes = [1, 7, 68], strides = [1, 1, 1]} : vector<16x8x68xf32> to vector<1x7x68xf32>
    %253 = vector.shape_cast %252 : vector<1x7x68xf32> to vector<7x68xf32>
    %254 = tpu.concatenate %251, %253 in 0 : vector<7x68xf32>, vector<7x68xf32> -> vector<14x68xf32>
    %255 = vector.extract_strided_slice %1 {offsets = [11, 0, 0], sizes = [1, 7, 68], strides = [1, 1, 1]} : vector<16x8x68xf32> to vector<1x7x68xf32>
    %256 = vector.shape_cast %255 : vector<1x7x68xf32> to vector<7x68xf32>
    %257 = vector.extract_strided_slice %3 {offsets = [11, 0, 0], sizes = [1, 7, 68], strides = [1, 1, 1]} : vector<16x8x68xf32> to vector<1x7x68xf32>
    %258 = vector.shape_cast %257 : vector<1x7x68xf32> to vector<7x68xf32>
    %259 = tpu.concatenate %256, %258 in 0 : vector<7x68xf32>, vector<7x68xf32> -> vector<14x68xf32>
    %260 = vector.extract_strided_slice %1 {offsets = [11, 1, 0], sizes = [1, 7, 68], strides = [1, 1, 1]} : vector<16x8x68xf32> to vector<1x7x68xf32>
    %261 = vector.shape_cast %260 : vector<1x7x68xf32> to vector<7x68xf32>
    %262 = vector.extract_strided_slice %3 {offsets = [11, 1, 0], sizes = [1, 7, 68], strides = [1, 1, 1]} : vector<16x8x68xf32> to vector<1x7x68xf32>
    %263 = vector.shape_cast %262 : vector<1x7x68xf32> to vector<7x68xf32>
    %264 = tpu.concatenate %261, %263 in 0 : vector<7x68xf32>, vector<7x68xf32> -> vector<14x68xf32>
    %265 = vector.extract_strided_slice %1 {offsets = [12, 0, 0], sizes = [1, 7, 68], strides = [1, 1, 1]} : vector<16x8x68xf32> to vector<1x7x68xf32>
    %266 = vector.shape_cast %265 : vector<1x7x68xf32> to vector<7x68xf32>
    %267 = vector.extract_strided_slice %3 {offsets = [12, 0, 0], sizes = [1, 7, 68], strides = [1, 1, 1]} : vector<16x8x68xf32> to vector<1x7x68xf32>
    %268 = vector.shape_cast %267 : vector<1x7x68xf32> to vector<7x68xf32>
    %269 = tpu.concatenate %266, %268 in 0 : vector<7x68xf32>, vector<7x68xf32> -> vector<14x68xf32>
    %270 = vector.extract_strided_slice %1 {offsets = [12, 1, 0], sizes = [1, 7, 68], strides = [1, 1, 1]} : vector<16x8x68xf32> to vector<1x7x68xf32>
    %271 = vector.shape_cast %270 : vector<1x7x68xf32> to vector<7x68xf32>
    %272 = vector.extract_strided_slice %3 {offsets = [12, 1, 0], sizes = [1, 7, 68], strides = [1, 1, 1]} : vector<16x8x68xf32> to vector<1x7x68xf32>
    %273 = vector.shape_cast %272 : vector<1x7x68xf32> to vector<7x68xf32>
    %274 = tpu.concatenate %271, %273 in 0 : vector<7x68xf32>, vector<7x68xf32> -> vector<14x68xf32>
    %275 = vector.extract_strided_slice %1 {offsets = [13, 0, 0], sizes = [1, 7, 68], strides = [1, 1, 1]} : vector<16x8x68xf32> to vector<1x7x68xf32>
    %276 = vector.shape_cast %275 : vector<1x7x68xf32> to vector<7x68xf32>
    %277 = vector.extract_strided_slice %3 {offsets = [13, 0, 0], sizes = [1, 7, 68], strides = [1, 1, 1]} : vector<16x8x68xf32> to vector<1x7x68xf32>
    %278 = vector.shape_cast %277 : vector<1x7x68xf32> to vector<7x68xf32>
    %279 = tpu.concatenate %276, %278 in 0 : vector<7x68xf32>, vector<7x68xf32> -> vector<14x68xf32>
    %280 = vector.extract_strided_slice %1 {offsets = [13, 1, 0], sizes = [1, 7, 68], strides = [1, 1, 1]} : vector<16x8x68xf32> to vector<1x7x68xf32>
    %281 = vector.shape_cast %280 : vector<1x7x68xf32> to vector<7x68xf32>
    %282 = vector.extract_strided_slice %3 {offsets = [13, 1, 0], sizes = [1, 7, 68], strides = [1, 1, 1]} : vector<16x8x68xf32> to vector<1x7x68xf32>
    %283 = vector.shape_cast %282 : vector<1x7x68xf32> to vector<7x68xf32>
    %284 = tpu.concatenate %281, %283 in 0 : vector<7x68xf32>, vector<7x68xf32> -> vector<14x68xf32>
    %285 = tpu.concatenate %249, %254, %259, %264, %269, %274, %279, %284 in 1 : vector<14x68xf32>, vector<14x68xf32>, vector<14x68xf32>, vector<14x68xf32>, vector<14x68xf32>, vector<14x68xf32>, vector<14x68xf32>, vector<14x68xf32> -> vector<14x544xf32>
    %cst_31 = arith.constant dense<0.000000e+00> : vector<14x32xf32>
    %286 = tpu.matmul %285, %4, %cst_31 {dimension_numbers = #tpu.dot_dimension_numbers<[1], [0], [0], [1], [0, 0, 1, 1], [], []>} : vector<14x544xf32>, vector<544x32xf32>, vector<14x32xf32> -> vector<14x32xf32>
    %287 = arith.addf %286, %10 : vector<14x32xf32>
    %cst_32 = arith.constant 0.000000e+00 : f32
    %288 = vector.broadcast %cst_32 : f32 to vector<14x32xf32>
    %289 = arith.maximumf %287, %288 : vector<14x32xf32>
    %290 = vector.extract_strided_slice %1 {offsets = [12, 0, 0], sizes = [1, 7, 68], strides = [1, 1, 1]} : vector<16x8x68xf32> to vector<1x7x68xf32>
    %291 = vector.shape_cast %290 : vector<1x7x68xf32> to vector<7x68xf32>
    %292 = vector.extract_strided_slice %3 {offsets = [12, 0, 0], sizes = [1, 7, 68], strides = [1, 1, 1]} : vector<16x8x68xf32> to vector<1x7x68xf32>
    %293 = vector.shape_cast %292 : vector<1x7x68xf32> to vector<7x68xf32>
    %294 = tpu.concatenate %291, %293 in 0 : vector<7x68xf32>, vector<7x68xf32> -> vector<14x68xf32>
    %295 = vector.extract_strided_slice %1 {offsets = [12, 1, 0], sizes = [1, 7, 68], strides = [1, 1, 1]} : vector<16x8x68xf32> to vector<1x7x68xf32>
    %296 = vector.shape_cast %295 : vector<1x7x68xf32> to vector<7x68xf32>
    %297 = vector.extract_strided_slice %3 {offsets = [12, 1, 0], sizes = [1, 7, 68], strides = [1, 1, 1]} : vector<16x8x68xf32> to vector<1x7x68xf32>
    %298 = vector.shape_cast %297 : vector<1x7x68xf32> to vector<7x68xf32>
    %299 = tpu.concatenate %296, %298 in 0 : vector<7x68xf32>, vector<7x68xf32> -> vector<14x68xf32>
    %300 = vector.extract_strided_slice %1 {offsets = [13, 0, 0], sizes = [1, 7, 68], strides = [1, 1, 1]} : vector<16x8x68xf32> to vector<1x7x68xf32>
    %301 = vector.shape_cast %300 : vector<1x7x68xf32> to vector<7x68xf32>
    %302 = vector.extract_strided_slice %3 {offsets = [13, 0, 0], sizes = [1, 7, 68], strides = [1, 1, 1]} : vector<16x8x68xf32> to vector<1x7x68xf32>
    %303 = vector.shape_cast %302 : vector<1x7x68xf32> to vector<7x68xf32>
    %304 = tpu.concatenate %301, %303 in 0 : vector<7x68xf32>, vector<7x68xf32> -> vector<14x68xf32>
    %305 = vector.extract_strided_slice %1 {offsets = [13, 1, 0], sizes = [1, 7, 68], strides = [1, 1, 1]} : vector<16x8x68xf32> to vector<1x7x68xf32>
    %306 = vector.shape_cast %305 : vector<1x7x68xf32> to vector<7x68xf32>
    %307 = vector.extract_strided_slice %3 {offsets = [13, 1, 0], sizes = [1, 7, 68], strides = [1, 1, 1]} : vector<16x8x68xf32> to vector<1x7x68xf32>
    %308 = vector.shape_cast %307 : vector<1x7x68xf32> to vector<7x68xf32>
    %309 = tpu.concatenate %306, %308 in 0 : vector<7x68xf32>, vector<7x68xf32> -> vector<14x68xf32>
    %310 = vector.extract_strided_slice %1 {offsets = [14, 0, 0], sizes = [1, 7, 68], strides = [1, 1, 1]} : vector<16x8x68xf32> to vector<1x7x68xf32>
    %311 = vector.shape_cast %310 : vector<1x7x68xf32> to vector<7x68xf32>
    %312 = vector.extract_strided_slice %3 {offsets = [14, 0, 0], sizes = [1, 7, 68], strides = [1, 1, 1]} : vector<16x8x68xf32> to vector<1x7x68xf32>
    %313 = vector.shape_cast %312 : vector<1x7x68xf32> to vector<7x68xf32>
    %314 = tpu.concatenate %311, %313 in 0 : vector<7x68xf32>, vector<7x68xf32> -> vector<14x68xf32>
    %315 = vector.extract_strided_slice %1 {offsets = [14, 1, 0], sizes = [1, 7, 68], strides = [1, 1, 1]} : vector<16x8x68xf32> to vector<1x7x68xf32>
    %316 = vector.shape_cast %315 : vector<1x7x68xf32> to vector<7x68xf32>
    %317 = vector.extract_strided_slice %3 {offsets = [14, 1, 0], sizes = [1, 7, 68], strides = [1, 1, 1]} : vector<16x8x68xf32> to vector<1x7x68xf32>
    %318 = vector.shape_cast %317 : vector<1x7x68xf32> to vector<7x68xf32>
    %319 = tpu.concatenate %316, %318 in 0 : vector<7x68xf32>, vector<7x68xf32> -> vector<14x68xf32>
    %320 = vector.extract_strided_slice %1 {offsets = [15, 0, 0], sizes = [1, 7, 68], strides = [1, 1, 1]} : vector<16x8x68xf32> to vector<1x7x68xf32>
    %321 = vector.shape_cast %320 : vector<1x7x68xf32> to vector<7x68xf32>
    %322 = vector.extract_strided_slice %3 {offsets = [15, 0, 0], sizes = [1, 7, 68], strides = [1, 1, 1]} : vector<16x8x68xf32> to vector<1x7x68xf32>
    %323 = vector.shape_cast %322 : vector<1x7x68xf32> to vector<7x68xf32>
    %324 = tpu.concatenate %321, %323 in 0 : vector<7x68xf32>, vector<7x68xf32> -> vector<14x68xf32>
    %325 = vector.extract_strided_slice %1 {offsets = [15, 1, 0], sizes = [1, 7, 68], strides = [1, 1, 1]} : vector<16x8x68xf32> to vector<1x7x68xf32>
    %326 = vector.shape_cast %325 : vector<1x7x68xf32> to vector<7x68xf32>
    %327 = vector.extract_strided_slice %3 {offsets = [15, 1, 0], sizes = [1, 7, 68], strides = [1, 1, 1]} : vector<16x8x68xf32> to vector<1x7x68xf32>
    %328 = vector.shape_cast %327 : vector<1x7x68xf32> to vector<7x68xf32>
    %329 = tpu.concatenate %326, %328 in 0 : vector<7x68xf32>, vector<7x68xf32> -> vector<14x68xf32>
    %330 = tpu.concatenate %294, %299, %304, %309, %314, %319, %324, %329 in 1 : vector<14x68xf32>, vector<14x68xf32>, vector<14x68xf32>, vector<14x68xf32>, vector<14x68xf32>, vector<14x68xf32>, vector<14x68xf32>, vector<14x68xf32> -> vector<14x544xf32>
    %cst_33 = arith.constant dense<0.000000e+00> : vector<14x32xf32>
    %331 = tpu.matmul %330, %4, %cst_33 {dimension_numbers = #tpu.dot_dimension_numbers<[1], [0], [0], [1], [0, 0, 1, 1], [], []>} : vector<14x544xf32>, vector<544x32xf32>, vector<14x32xf32> -> vector<14x32xf32>
    %332 = arith.addf %331, %10 : vector<14x32xf32>
    %cst_34 = arith.constant 0.000000e+00 : f32
    %333 = vector.broadcast %cst_34 : f32 to vector<14x32xf32>
    %334 = arith.maximumf %332, %333 : vector<14x32xf32>
    %335 = vector.extract_strided_slice %64 {offsets = [0, 0], sizes = [5, 32], strides = [1, 1]} : vector<14x32xf32> to vector<5x32xf32>
    %336 = vector.extract_strided_slice %64 {offsets = [7, 0], sizes = [5, 32], strides = [1, 1]} : vector<14x32xf32> to vector<5x32xf32>
    %337 = tpu.concatenate %335, %336 in 0 : vector<5x32xf32>, vector<5x32xf32> -> vector<10x32xf32>
    %338 = vector.extract_strided_slice %64 {offsets = [1, 0], sizes = [5, 32], strides = [1, 1]} : vector<14x32xf32> to vector<5x32xf32>
    %339 = vector.extract_strided_slice %64 {offsets = [8, 0], sizes = [5, 32], strides = [1, 1]} : vector<14x32xf32> to vector<5x32xf32>
    %340 = tpu.concatenate %338, %339 in 0 : vector<5x32xf32>, vector<5x32xf32> -> vector<10x32xf32>
    %341 = vector.extract_strided_slice %64 {offsets = [2, 0], sizes = [5, 32], strides = [1, 1]} : vector<14x32xf32> to vector<5x32xf32>
    %342 = vector.extract_strided_slice %64 {offsets = [9, 0], sizes = [5, 32], strides = [1, 1]} : vector<14x32xf32> to vector<5x32xf32>
    %343 = tpu.concatenate %341, %342 in 0 : vector<5x32xf32>, vector<5x32xf32> -> vector<10x32xf32>
    %344 = vector.extract_strided_slice %109 {offsets = [0, 0], sizes = [5, 32], strides = [1, 1]} : vector<14x32xf32> to vector<5x32xf32>
    %345 = vector.extract_strided_slice %109 {offsets = [7, 0], sizes = [5, 32], strides = [1, 1]} : vector<14x32xf32> to vector<5x32xf32>
    %346 = tpu.concatenate %344, %345 in 0 : vector<5x32xf32>, vector<5x32xf32> -> vector<10x32xf32>
    %347 = vector.extract_strided_slice %109 {offsets = [1, 0], sizes = [5, 32], strides = [1, 1]} : vector<14x32xf32> to vector<5x32xf32>
    %348 = vector.extract_strided_slice %109 {offsets = [8, 0], sizes = [5, 32], strides = [1, 1]} : vector<14x32xf32> to vector<5x32xf32>
    %349 = tpu.concatenate %347, %348 in 0 : vector<5x32xf32>, vector<5x32xf32> -> vector<10x32xf32>
    %350 = vector.extract_strided_slice %109 {offsets = [2, 0], sizes = [5, 32], strides = [1, 1]} : vector<14x32xf32> to vector<5x32xf32>
    %351 = vector.extract_strided_slice %109 {offsets = [9, 0], sizes = [5, 32], strides = [1, 1]} : vector<14x32xf32> to vector<5x32xf32>
    %352 = tpu.concatenate %350, %351 in 0 : vector<5x32xf32>, vector<5x32xf32> -> vector<10x32xf32>
    %353 = vector.extract_strided_slice %154 {offsets = [0, 0], sizes = [5, 32], strides = [1, 1]} : vector<14x32xf32> to vector<5x32xf32>
    %354 = vector.extract_strided_slice %154 {offsets = [7, 0], sizes = [5, 32], strides = [1, 1]} : vector<14x32xf32> to vector<5x32xf32>
    %355 = tpu.concatenate %353, %354 in 0 : vector<5x32xf32>, vector<5x32xf32> -> vector<10x32xf32>
    %356 = vector.extract_strided_slice %154 {offsets = [1, 0], sizes = [5, 32], strides = [1, 1]} : vector<14x32xf32> to vector<5x32xf32>
    %357 = vector.extract_strided_slice %154 {offsets = [8, 0], sizes = [5, 32], strides = [1, 1]} : vector<14x32xf32> to vector<5x32xf32>
    %358 = tpu.concatenate %356, %357 in 0 : vector<5x32xf32>, vector<5x32xf32> -> vector<10x32xf32>
    %359 = vector.extract_strided_slice %154 {offsets = [2, 0], sizes = [5, 32], strides = [1, 1]} : vector<14x32xf32> to vector<5x32xf32>
    %360 = vector.extract_strided_slice %154 {offsets = [9, 0], sizes = [5, 32], strides = [1, 1]} : vector<14x32xf32> to vector<5x32xf32>
    %361 = tpu.concatenate %359, %360 in 0 : vector<5x32xf32>, vector<5x32xf32> -> vector<10x32xf32>
    %362 = tpu.concatenate %337, %340, %343, %346, %349, %352, %355, %358, %361 in 1 : vector<10x32xf32>, vector<10x32xf32>, vector<10x32xf32>, vector<10x32xf32>, vector<10x32xf32>, vector<10x32xf32>, vector<10x32xf32>, vector<10x32xf32>, vector<10x32xf32> -> vector<10x288xf32>
    %cst_35 = arith.constant dense<0.000000e+00> : vector<10x64xf32>
    %363 = tpu.matmul %362, %5, %cst_35 {dimension_numbers = #tpu.dot_dimension_numbers<[1], [0], [0], [1], [0, 0, 1, 1], [], []>} : vector<10x288xf32>, vector<288x64xf32>, vector<10x64xf32> -> vector<10x64xf32>
    %364 = arith.addf %363, %13 : vector<10x64xf32>
    %cst_36 = arith.constant 0.000000e+00 : f32
    %365 = vector.broadcast %cst_36 : f32 to vector<10x64xf32>
    %366 = arith.maximumf %364, %365 : vector<10x64xf32>
    %367 = vector.extract_strided_slice %109 {offsets = [0, 0], sizes = [5, 32], strides = [1, 1]} : vector<14x32xf32> to vector<5x32xf32>
    %368 = vector.extract_strided_slice %109 {offsets = [7, 0], sizes = [5, 32], strides = [1, 1]} : vector<14x32xf32> to vector<5x32xf32>
    %369 = tpu.concatenate %367, %368 in 0 : vector<5x32xf32>, vector<5x32xf32> -> vector<10x32xf32>
    %370 = vector.extract_strided_slice %109 {offsets = [1, 0], sizes = [5, 32], strides = [1, 1]} : vector<14x32xf32> to vector<5x32xf32>
    %371 = vector.extract_strided_slice %109 {offsets = [8, 0], sizes = [5, 32], strides = [1, 1]} : vector<14x32xf32> to vector<5x32xf32>
    %372 = tpu.concatenate %370, %371 in 0 : vector<5x32xf32>, vector<5x32xf32> -> vector<10x32xf32>
    %373 = vector.extract_strided_slice %109 {offsets = [2, 0], sizes = [5, 32], strides = [1, 1]} : vector<14x32xf32> to vector<5x32xf32>
    %374 = vector.extract_strided_slice %109 {offsets = [9, 0], sizes = [5, 32], strides = [1, 1]} : vector<14x32xf32> to vector<5x32xf32>
    %375 = tpu.concatenate %373, %374 in 0 : vector<5x32xf32>, vector<5x32xf32> -> vector<10x32xf32>
    %376 = vector.extract_strided_slice %154 {offsets = [0, 0], sizes = [5, 32], strides = [1, 1]} : vector<14x32xf32> to vector<5x32xf32>
    %377 = vector.extract_strided_slice %154 {offsets = [7, 0], sizes = [5, 32], strides = [1, 1]} : vector<14x32xf32> to vector<5x32xf32>
    %378 = tpu.concatenate %376, %377 in 0 : vector<5x32xf32>, vector<5x32xf32> -> vector<10x32xf32>
    %379 = vector.extract_strided_slice %154 {offsets = [1, 0], sizes = [5, 32], strides = [1, 1]} : vector<14x32xf32> to vector<5x32xf32>
    %380 = vector.extract_strided_slice %154 {offsets = [8, 0], sizes = [5, 32], strides = [1, 1]} : vector<14x32xf32> to vector<5x32xf32>
    %381 = tpu.concatenate %379, %380 in 0 : vector<5x32xf32>, vector<5x32xf32> -> vector<10x32xf32>
    %382 = vector.extract_strided_slice %154 {offsets = [2, 0], sizes = [5, 32], strides = [1, 1]} : vector<14x32xf32> to vector<5x32xf32>
    %383 = vector.extract_strided_slice %154 {offsets = [9, 0], sizes = [5, 32], strides = [1, 1]} : vector<14x32xf32> to vector<5x32xf32>
    %384 = tpu.concatenate %382, %383 in 0 : vector<5x32xf32>, vector<5x32xf32> -> vector<10x32xf32>
    %385 = vector.extract_strided_slice %199 {offsets = [0, 0], sizes = [5, 32], strides = [1, 1]} : vector<14x32xf32> to vector<5x32xf32>
    %386 = vector.extract_strided_slice %199 {offsets = [7, 0], sizes = [5, 32], strides = [1, 1]} : vector<14x32xf32> to vector<5x32xf32>
    %387 = tpu.concatenate %385, %386 in 0 : vector<5x32xf32>, vector<5x32xf32> -> vector<10x32xf32>
    %388 = vector.extract_strided_slice %199 {offsets = [1, 0], sizes = [5, 32], strides = [1, 1]} : vector<14x32xf32> to vector<5x32xf32>
    %389 = vector.extract_strided_slice %199 {offsets = [8, 0], sizes = [5, 32], strides = [1, 1]} : vector<14x32xf32> to vector<5x32xf32>
    %390 = tpu.concatenate %388, %389 in 0 : vector<5x32xf32>, vector<5x32xf32> -> vector<10x32xf32>
    %391 = vector.extract_strided_slice %199 {offsets = [2, 0], sizes = [5, 32], strides = [1, 1]} : vector<14x32xf32> to vector<5x32xf32>
    %392 = vector.extract_strided_slice %199 {offsets = [9, 0], sizes = [5, 32], strides = [1, 1]} : vector<14x32xf32> to vector<5x32xf32>
    %393 = tpu.concatenate %391, %392 in 0 : vector<5x32xf32>, vector<5x32xf32> -> vector<10x32xf32>
    %394 = tpu.concatenate %369, %372, %375, %378, %381, %384, %387, %390, %393 in 1 : vector<10x32xf32>, vector<10x32xf32>, vector<10x32xf32>, vector<10x32xf32>, vector<10x32xf32>, vector<10x32xf32>, vector<10x32xf32>, vector<10x32xf32>, vector<10x32xf32> -> vector<10x288xf32>
    %cst_37 = arith.constant dense<0.000000e+00> : vector<10x64xf32>
    %395 = tpu.matmul %394, %5, %cst_37 {dimension_numbers = #tpu.dot_dimension_numbers<[1], [0], [0], [1], [0, 0, 1, 1], [], []>} : vector<10x288xf32>, vector<288x64xf32>, vector<10x64xf32> -> vector<10x64xf32>
    %396 = arith.addf %395, %13 : vector<10x64xf32>
    %cst_38 = arith.constant 0.000000e+00 : f32
    %397 = vector.broadcast %cst_38 : f32 to vector<10x64xf32>
    %398 = arith.maximumf %396, %397 : vector<10x64xf32>
    %399 = vector.extract_strided_slice %154 {offsets = [0, 0], sizes = [5, 32], strides = [1, 1]} : vector<14x32xf32> to vector<5x32xf32>
    %400 = vector.extract_strided_slice %154 {offsets = [7, 0], sizes = [5, 32], strides = [1, 1]} : vector<14x32xf32> to vector<5x32xf32>
    %401 = tpu.concatenate %399, %400 in 0 : vector<5x32xf32>, vector<5x32xf32> -> vector<10x32xf32>
    %402 = vector.extract_strided_slice %154 {offsets = [1, 0], sizes = [5, 32], strides = [1, 1]} : vector<14x32xf32> to vector<5x32xf32>
    %403 = vector.extract_strided_slice %154 {offsets = [8, 0], sizes = [5, 32], strides = [1, 1]} : vector<14x32xf32> to vector<5x32xf32>
    %404 = tpu.concatenate %402, %403 in 0 : vector<5x32xf32>, vector<5x32xf32> -> vector<10x32xf32>
    %405 = vector.extract_strided_slice %154 {offsets = [2, 0], sizes = [5, 32], strides = [1, 1]} : vector<14x32xf32> to vector<5x32xf32>
    %406 = vector.extract_strided_slice %154 {offsets = [9, 0], sizes = [5, 32], strides = [1, 1]} : vector<14x32xf32> to vector<5x32xf32>
    %407 = tpu.concatenate %405, %406 in 0 : vector<5x32xf32>, vector<5x32xf32> -> vector<10x32xf32>
    %408 = vector.extract_strided_slice %199 {offsets = [0, 0], sizes = [5, 32], strides = [1, 1]} : vector<14x32xf32> to vector<5x32xf32>
    %409 = vector.extract_strided_slice %199 {offsets = [7, 0], sizes = [5, 32], strides = [1, 1]} : vector<14x32xf32> to vector<5x32xf32>
    %410 = tpu.concatenate %408, %409 in 0 : vector<5x32xf32>, vector<5x32xf32> -> vector<10x32xf32>
    %411 = vector.extract_strided_slice %199 {offsets = [1, 0], sizes = [5, 32], strides = [1, 1]} : vector<14x32xf32> to vector<5x32xf32>
    %412 = vector.extract_strided_slice %199 {offsets = [8, 0], sizes = [5, 32], strides = [1, 1]} : vector<14x32xf32> to vector<5x32xf32>
    %413 = tpu.concatenate %411, %412 in 0 : vector<5x32xf32>, vector<5x32xf32> -> vector<10x32xf32>
    %414 = vector.extract_strided_slice %199 {offsets = [2, 0], sizes = [5, 32], strides = [1, 1]} : vector<14x32xf32> to vector<5x32xf32>
    %415 = vector.extract_strided_slice %199 {offsets = [9, 0], sizes = [5, 32], strides = [1, 1]} : vector<14x32xf32> to vector<5x32xf32>
    %416 = tpu.concatenate %414, %415 in 0 : vector<5x32xf32>, vector<5x32xf32> -> vector<10x32xf32>
    %417 = vector.extract_strided_slice %244 {offsets = [0, 0], sizes = [5, 32], strides = [1, 1]} : vector<14x32xf32> to vector<5x32xf32>
    %418 = vector.extract_strided_slice %244 {offsets = [7, 0], sizes = [5, 32], strides = [1, 1]} : vector<14x32xf32> to vector<5x32xf32>
    %419 = tpu.concatenate %417, %418 in 0 : vector<5x32xf32>, vector<5x32xf32> -> vector<10x32xf32>
    %420 = vector.extract_strided_slice %244 {offsets = [1, 0], sizes = [5, 32], strides = [1, 1]} : vector<14x32xf32> to vector<5x32xf32>
    %421 = vector.extract_strided_slice %244 {offsets = [8, 0], sizes = [5, 32], strides = [1, 1]} : vector<14x32xf32> to vector<5x32xf32>
    %422 = tpu.concatenate %420, %421 in 0 : vector<5x32xf32>, vector<5x32xf32> -> vector<10x32xf32>
    %423 = vector.extract_strided_slice %244 {offsets = [2, 0], sizes = [5, 32], strides = [1, 1]} : vector<14x32xf32> to vector<5x32xf32>
    %424 = vector.extract_strided_slice %244 {offsets = [9, 0], sizes = [5, 32], strides = [1, 1]} : vector<14x32xf32> to vector<5x32xf32>
    %425 = tpu.concatenate %423, %424 in 0 : vector<5x32xf32>, vector<5x32xf32> -> vector<10x32xf32>
    %426 = tpu.concatenate %401, %404, %407, %410, %413, %416, %419, %422, %425 in 1 : vector<10x32xf32>, vector<10x32xf32>, vector<10x32xf32>, vector<10x32xf32>, vector<10x32xf32>, vector<10x32xf32>, vector<10x32xf32>, vector<10x32xf32>, vector<10x32xf32> -> vector<10x288xf32>
    %cst_39 = arith.constant dense<0.000000e+00> : vector<10x64xf32>
    %427 = tpu.matmul %426, %5, %cst_39 {dimension_numbers = #tpu.dot_dimension_numbers<[1], [0], [0], [1], [0, 0, 1, 1], [], []>} : vector<10x288xf32>, vector<288x64xf32>, vector<10x64xf32> -> vector<10x64xf32>
    %428 = arith.addf %427, %13 : vector<10x64xf32>
    %cst_40 = arith.constant 0.000000e+00 : f32
    %429 = vector.broadcast %cst_40 : f32 to vector<10x64xf32>
    %430 = arith.maximumf %428, %429 : vector<10x64xf32>
    %431 = vector.extract_strided_slice %199 {offsets = [0, 0], sizes = [5, 32], strides = [1, 1]} : vector<14x32xf32> to vector<5x32xf32>
    %432 = vector.extract_strided_slice %199 {offsets = [7, 0], sizes = [5, 32], strides = [1, 1]} : vector<14x32xf32> to vector<5x32xf32>
    %433 = tpu.concatenate %431, %432 in 0 : vector<5x32xf32>, vector<5x32xf32> -> vector<10x32xf32>
    %434 = vector.extract_strided_slice %199 {offsets = [1, 0], sizes = [5, 32], strides = [1, 1]} : vector<14x32xf32> to vector<5x32xf32>
    %435 = vector.extract_strided_slice %199 {offsets = [8, 0], sizes = [5, 32], strides = [1, 1]} : vector<14x32xf32> to vector<5x32xf32>
    %436 = tpu.concatenate %434, %435 in 0 : vector<5x32xf32>, vector<5x32xf32> -> vector<10x32xf32>
    %437 = vector.extract_strided_slice %199 {offsets = [2, 0], sizes = [5, 32], strides = [1, 1]} : vector<14x32xf32> to vector<5x32xf32>
    %438 = vector.extract_strided_slice %199 {offsets = [9, 0], sizes = [5, 32], strides = [1, 1]} : vector<14x32xf32> to vector<5x32xf32>
    %439 = tpu.concatenate %437, %438 in 0 : vector<5x32xf32>, vector<5x32xf32> -> vector<10x32xf32>
    %440 = vector.extract_strided_slice %244 {offsets = [0, 0], sizes = [5, 32], strides = [1, 1]} : vector<14x32xf32> to vector<5x32xf32>
    %441 = vector.extract_strided_slice %244 {offsets = [7, 0], sizes = [5, 32], strides = [1, 1]} : vector<14x32xf32> to vector<5x32xf32>
    %442 = tpu.concatenate %440, %441 in 0 : vector<5x32xf32>, vector<5x32xf32> -> vector<10x32xf32>
    %443 = vector.extract_strided_slice %244 {offsets = [1, 0], sizes = [5, 32], strides = [1, 1]} : vector<14x32xf32> to vector<5x32xf32>
    %444 = vector.extract_strided_slice %244 {offsets = [8, 0], sizes = [5, 32], strides = [1, 1]} : vector<14x32xf32> to vector<5x32xf32>
    %445 = tpu.concatenate %443, %444 in 0 : vector<5x32xf32>, vector<5x32xf32> -> vector<10x32xf32>
    %446 = vector.extract_strided_slice %244 {offsets = [2, 0], sizes = [5, 32], strides = [1, 1]} : vector<14x32xf32> to vector<5x32xf32>
    %447 = vector.extract_strided_slice %244 {offsets = [9, 0], sizes = [5, 32], strides = [1, 1]} : vector<14x32xf32> to vector<5x32xf32>
    %448 = tpu.concatenate %446, %447 in 0 : vector<5x32xf32>, vector<5x32xf32> -> vector<10x32xf32>
    %449 = vector.extract_strided_slice %289 {offsets = [0, 0], sizes = [5, 32], strides = [1, 1]} : vector<14x32xf32> to vector<5x32xf32>
    %450 = vector.extract_strided_slice %289 {offsets = [7, 0], sizes = [5, 32], strides = [1, 1]} : vector<14x32xf32> to vector<5x32xf32>
    %451 = tpu.concatenate %449, %450 in 0 : vector<5x32xf32>, vector<5x32xf32> -> vector<10x32xf32>
    %452 = vector.extract_strided_slice %289 {offsets = [1, 0], sizes = [5, 32], strides = [1, 1]} : vector<14x32xf32> to vector<5x32xf32>
    %453 = vector.extract_strided_slice %289 {offsets = [8, 0], sizes = [5, 32], strides = [1, 1]} : vector<14x32xf32> to vector<5x32xf32>
    %454 = tpu.concatenate %452, %453 in 0 : vector<5x32xf32>, vector<5x32xf32> -> vector<10x32xf32>
    %455 = vector.extract_strided_slice %289 {offsets = [2, 0], sizes = [5, 32], strides = [1, 1]} : vector<14x32xf32> to vector<5x32xf32>
    %456 = vector.extract_strided_slice %289 {offsets = [9, 0], sizes = [5, 32], strides = [1, 1]} : vector<14x32xf32> to vector<5x32xf32>
    %457 = tpu.concatenate %455, %456 in 0 : vector<5x32xf32>, vector<5x32xf32> -> vector<10x32xf32>
    %458 = tpu.concatenate %433, %436, %439, %442, %445, %448, %451, %454, %457 in 1 : vector<10x32xf32>, vector<10x32xf32>, vector<10x32xf32>, vector<10x32xf32>, vector<10x32xf32>, vector<10x32xf32>, vector<10x32xf32>, vector<10x32xf32>, vector<10x32xf32> -> vector<10x288xf32>
    %cst_41 = arith.constant dense<0.000000e+00> : vector<10x64xf32>
    %459 = tpu.matmul %458, %5, %cst_41 {dimension_numbers = #tpu.dot_dimension_numbers<[1], [0], [0], [1], [0, 0, 1, 1], [], []>} : vector<10x288xf32>, vector<288x64xf32>, vector<10x64xf32> -> vector<10x64xf32>
    %460 = arith.addf %459, %13 : vector<10x64xf32>
    %cst_42 = arith.constant 0.000000e+00 : f32
    %461 = vector.broadcast %cst_42 : f32 to vector<10x64xf32>
    %462 = arith.maximumf %460, %461 : vector<10x64xf32>
    %463 = vector.extract_strided_slice %244 {offsets = [0, 0], sizes = [5, 32], strides = [1, 1]} : vector<14x32xf32> to vector<5x32xf32>
    %464 = vector.extract_strided_slice %244 {offsets = [7, 0], sizes = [5, 32], strides = [1, 1]} : vector<14x32xf32> to vector<5x32xf32>
    %465 = tpu.concatenate %463, %464 in 0 : vector<5x32xf32>, vector<5x32xf32> -> vector<10x32xf32>
    %466 = vector.extract_strided_slice %244 {offsets = [1, 0], sizes = [5, 32], strides = [1, 1]} : vector<14x32xf32> to vector<5x32xf32>
    %467 = vector.extract_strided_slice %244 {offsets = [8, 0], sizes = [5, 32], strides = [1, 1]} : vector<14x32xf32> to vector<5x32xf32>
    %468 = tpu.concatenate %466, %467 in 0 : vector<5x32xf32>, vector<5x32xf32> -> vector<10x32xf32>
    %469 = vector.extract_strided_slice %244 {offsets = [2, 0], sizes = [5, 32], strides = [1, 1]} : vector<14x32xf32> to vector<5x32xf32>
    %470 = vector.extract_strided_slice %244 {offsets = [9, 0], sizes = [5, 32], strides = [1, 1]} : vector<14x32xf32> to vector<5x32xf32>
    %471 = tpu.concatenate %469, %470 in 0 : vector<5x32xf32>, vector<5x32xf32> -> vector<10x32xf32>
    %472 = vector.extract_strided_slice %289 {offsets = [0, 0], sizes = [5, 32], strides = [1, 1]} : vector<14x32xf32> to vector<5x32xf32>
    %473 = vector.extract_strided_slice %289 {offsets = [7, 0], sizes = [5, 32], strides = [1, 1]} : vector<14x32xf32> to vector<5x32xf32>
    %474 = tpu.concatenate %472, %473 in 0 : vector<5x32xf32>, vector<5x32xf32> -> vector<10x32xf32>
    %475 = vector.extract_strided_slice %289 {offsets = [1, 0], sizes = [5, 32], strides = [1, 1]} : vector<14x32xf32> to vector<5x32xf32>
    %476 = vector.extract_strided_slice %289 {offsets = [8, 0], sizes = [5, 32], strides = [1, 1]} : vector<14x32xf32> to vector<5x32xf32>
    %477 = tpu.concatenate %475, %476 in 0 : vector<5x32xf32>, vector<5x32xf32> -> vector<10x32xf32>
    %478 = vector.extract_strided_slice %289 {offsets = [2, 0], sizes = [5, 32], strides = [1, 1]} : vector<14x32xf32> to vector<5x32xf32>
    %479 = vector.extract_strided_slice %289 {offsets = [9, 0], sizes = [5, 32], strides = [1, 1]} : vector<14x32xf32> to vector<5x32xf32>
    %480 = tpu.concatenate %478, %479 in 0 : vector<5x32xf32>, vector<5x32xf32> -> vector<10x32xf32>
    %481 = vector.extract_strided_slice %334 {offsets = [0, 0], sizes = [5, 32], strides = [1, 1]} : vector<14x32xf32> to vector<5x32xf32>
    %482 = vector.extract_strided_slice %334 {offsets = [7, 0], sizes = [5, 32], strides = [1, 1]} : vector<14x32xf32> to vector<5x32xf32>
    %483 = tpu.concatenate %481, %482 in 0 : vector<5x32xf32>, vector<5x32xf32> -> vector<10x32xf32>
    %484 = vector.extract_strided_slice %334 {offsets = [1, 0], sizes = [5, 32], strides = [1, 1]} : vector<14x32xf32> to vector<5x32xf32>
    %485 = vector.extract_strided_slice %334 {offsets = [8, 0], sizes = [5, 32], strides = [1, 1]} : vector<14x32xf32> to vector<5x32xf32>
    %486 = tpu.concatenate %484, %485 in 0 : vector<5x32xf32>, vector<5x32xf32> -> vector<10x32xf32>
    %487 = vector.extract_strided_slice %334 {offsets = [2, 0], sizes = [5, 32], strides = [1, 1]} : vector<14x32xf32> to vector<5x32xf32>
    %488 = vector.extract_strided_slice %334 {offsets = [9, 0], sizes = [5, 32], strides = [1, 1]} : vector<14x32xf32> to vector<5x32xf32>
    %489 = tpu.concatenate %487, %488 in 0 : vector<5x32xf32>, vector<5x32xf32> -> vector<10x32xf32>
    %490 = tpu.concatenate %465, %468, %471, %474, %477, %480, %483, %486, %489 in 1 : vector<10x32xf32>, vector<10x32xf32>, vector<10x32xf32>, vector<10x32xf32>, vector<10x32xf32>, vector<10x32xf32>, vector<10x32xf32>, vector<10x32xf32>, vector<10x32xf32> -> vector<10x288xf32>
    %cst_43 = arith.constant dense<0.000000e+00> : vector<10x64xf32>
    %491 = tpu.matmul %490, %5, %cst_43 {dimension_numbers = #tpu.dot_dimension_numbers<[1], [0], [0], [1], [0, 0, 1, 1], [], []>} : vector<10x288xf32>, vector<288x64xf32>, vector<10x64xf32> -> vector<10x64xf32>
    %492 = arith.addf %491, %13 : vector<10x64xf32>
    %cst_44 = arith.constant 0.000000e+00 : f32
    %493 = vector.broadcast %cst_44 : f32 to vector<10x64xf32>
    %494 = arith.maximumf %492, %493 : vector<10x64xf32>
    %495 = vector.extract_strided_slice %366 {offsets = [0, 0], sizes = [4, 64], strides = [1, 1]} : vector<10x64xf32> to vector<4x64xf32>
    %496 = vector.extract_strided_slice %366 {offsets = [5, 0], sizes = [4, 64], strides = [1, 1]} : vector<10x64xf32> to vector<4x64xf32>
    %497 = tpu.concatenate %495, %496 in 0 : vector<4x64xf32>, vector<4x64xf32> -> vector<8x64xf32>
    %498 = vector.extract_strided_slice %366 {offsets = [1, 0], sizes = [4, 64], strides = [1, 1]} : vector<10x64xf32> to vector<4x64xf32>
    %499 = vector.extract_strided_slice %366 {offsets = [6, 0], sizes = [4, 64], strides = [1, 1]} : vector<10x64xf32> to vector<4x64xf32>
    %500 = tpu.concatenate %498, %499 in 0 : vector<4x64xf32>, vector<4x64xf32> -> vector<8x64xf32>
    %501 = vector.extract_strided_slice %398 {offsets = [0, 0], sizes = [4, 64], strides = [1, 1]} : vector<10x64xf32> to vector<4x64xf32>
    %502 = vector.extract_strided_slice %398 {offsets = [5, 0], sizes = [4, 64], strides = [1, 1]} : vector<10x64xf32> to vector<4x64xf32>
    %503 = tpu.concatenate %501, %502 in 0 : vector<4x64xf32>, vector<4x64xf32> -> vector<8x64xf32>
    %504 = vector.extract_strided_slice %398 {offsets = [1, 0], sizes = [4, 64], strides = [1, 1]} : vector<10x64xf32> to vector<4x64xf32>
    %505 = vector.extract_strided_slice %398 {offsets = [6, 0], sizes = [4, 64], strides = [1, 1]} : vector<10x64xf32> to vector<4x64xf32>
    %506 = tpu.concatenate %504, %505 in 0 : vector<4x64xf32>, vector<4x64xf32> -> vector<8x64xf32>
    %507 = tpu.concatenate %497, %500, %503, %506 in 1 : vector<8x64xf32>, vector<8x64xf32>, vector<8x64xf32>, vector<8x64xf32> -> vector<8x256xf32>
    %cst_45 = arith.constant dense<0.000000e+00> : vector<8x32xf32>
    %508 = tpu.matmul %507, %6, %cst_45 {dimension_numbers = #tpu.dot_dimension_numbers<[1], [0], [0], [1], [0, 0, 1, 1], [], []>} : vector<8x256xf32>, vector<256x32xf32>, vector<8x32xf32> -> vector<8x32xf32>
    %509 = arith.addf %508, %16 : vector<8x32xf32>
    %510 = vector.extract_strided_slice %398 {offsets = [0, 0], sizes = [4, 64], strides = [1, 1]} : vector<10x64xf32> to vector<4x64xf32>
    %511 = vector.extract_strided_slice %398 {offsets = [5, 0], sizes = [4, 64], strides = [1, 1]} : vector<10x64xf32> to vector<4x64xf32>
    %512 = tpu.concatenate %510, %511 in 0 : vector<4x64xf32>, vector<4x64xf32> -> vector<8x64xf32>
    %513 = vector.extract_strided_slice %398 {offsets = [1, 0], sizes = [4, 64], strides = [1, 1]} : vector<10x64xf32> to vector<4x64xf32>
    %514 = vector.extract_strided_slice %398 {offsets = [6, 0], sizes = [4, 64], strides = [1, 1]} : vector<10x64xf32> to vector<4x64xf32>
    %515 = tpu.concatenate %513, %514 in 0 : vector<4x64xf32>, vector<4x64xf32> -> vector<8x64xf32>
    %516 = vector.extract_strided_slice %430 {offsets = [0, 0], sizes = [4, 64], strides = [1, 1]} : vector<10x64xf32> to vector<4x64xf32>
    %517 = vector.extract_strided_slice %430 {offsets = [5, 0], sizes = [4, 64], strides = [1, 1]} : vector<10x64xf32> to vector<4x64xf32>
    %518 = tpu.concatenate %516, %517 in 0 : vector<4x64xf32>, vector<4x64xf32> -> vector<8x64xf32>
    %519 = vector.extract_strided_slice %430 {offsets = [1, 0], sizes = [4, 64], strides = [1, 1]} : vector<10x64xf32> to vector<4x64xf32>
    %520 = vector.extract_strided_slice %430 {offsets = [6, 0], sizes = [4, 64], strides = [1, 1]} : vector<10x64xf32> to vector<4x64xf32>
    %521 = tpu.concatenate %519, %520 in 0 : vector<4x64xf32>, vector<4x64xf32> -> vector<8x64xf32>
    %522 = tpu.concatenate %512, %515, %518, %521 in 1 : vector<8x64xf32>, vector<8x64xf32>, vector<8x64xf32>, vector<8x64xf32> -> vector<8x256xf32>
    %cst_46 = arith.constant dense<0.000000e+00> : vector<8x32xf32>
    %523 = tpu.matmul %522, %6, %cst_46 {dimension_numbers = #tpu.dot_dimension_numbers<[1], [0], [0], [1], [0, 0, 1, 1], [], []>} : vector<8x256xf32>, vector<256x32xf32>, vector<8x32xf32> -> vector<8x32xf32>
    %524 = arith.addf %523, %16 : vector<8x32xf32>
    %525 = vector.extract_strided_slice %430 {offsets = [0, 0], sizes = [4, 64], strides = [1, 1]} : vector<10x64xf32> to vector<4x64xf32>
    %526 = vector.extract_strided_slice %430 {offsets = [5, 0], sizes = [4, 64], strides = [1, 1]} : vector<10x64xf32> to vector<4x64xf32>
    %527 = tpu.concatenate %525, %526 in 0 : vector<4x64xf32>, vector<4x64xf32> -> vector<8x64xf32>
    %528 = vector.extract_strided_slice %430 {offsets = [1, 0], sizes = [4, 64], strides = [1, 1]} : vector<10x64xf32> to vector<4x64xf32>
    %529 = vector.extract_strided_slice %430 {offsets = [6, 0], sizes = [4, 64], strides = [1, 1]} : vector<10x64xf32> to vector<4x64xf32>
    %530 = tpu.concatenate %528, %529 in 0 : vector<4x64xf32>, vector<4x64xf32> -> vector<8x64xf32>
    %531 = vector.extract_strided_slice %462 {offsets = [0, 0], sizes = [4, 64], strides = [1, 1]} : vector<10x64xf32> to vector<4x64xf32>
    %532 = vector.extract_strided_slice %462 {offsets = [5, 0], sizes = [4, 64], strides = [1, 1]} : vector<10x64xf32> to vector<4x64xf32>
    %533 = tpu.concatenate %531, %532 in 0 : vector<4x64xf32>, vector<4x64xf32> -> vector<8x64xf32>
    %534 = vector.extract_strided_slice %462 {offsets = [1, 0], sizes = [4, 64], strides = [1, 1]} : vector<10x64xf32> to vector<4x64xf32>
    %535 = vector.extract_strided_slice %462 {offsets = [6, 0], sizes = [4, 64], strides = [1, 1]} : vector<10x64xf32> to vector<4x64xf32>
    %536 = tpu.concatenate %534, %535 in 0 : vector<4x64xf32>, vector<4x64xf32> -> vector<8x64xf32>
    %537 = tpu.concatenate %527, %530, %533, %536 in 1 : vector<8x64xf32>, vector<8x64xf32>, vector<8x64xf32>, vector<8x64xf32> -> vector<8x256xf32>
    %cst_47 = arith.constant dense<0.000000e+00> : vector<8x32xf32>
    %538 = tpu.matmul %537, %6, %cst_47 {dimension_numbers = #tpu.dot_dimension_numbers<[1], [0], [0], [1], [0, 0, 1, 1], [], []>} : vector<8x256xf32>, vector<256x32xf32>, vector<8x32xf32> -> vector<8x32xf32>
    %539 = arith.addf %538, %16 : vector<8x32xf32>
    %540 = vector.extract_strided_slice %462 {offsets = [0, 0], sizes = [4, 64], strides = [1, 1]} : vector<10x64xf32> to vector<4x64xf32>
    %541 = vector.extract_strided_slice %462 {offsets = [5, 0], sizes = [4, 64], strides = [1, 1]} : vector<10x64xf32> to vector<4x64xf32>
    %542 = tpu.concatenate %540, %541 in 0 : vector<4x64xf32>, vector<4x64xf32> -> vector<8x64xf32>
    %543 = vector.extract_strided_slice %462 {offsets = [1, 0], sizes = [4, 64], strides = [1, 1]} : vector<10x64xf32> to vector<4x64xf32>
    %544 = vector.extract_strided_slice %462 {offsets = [6, 0], sizes = [4, 64], strides = [1, 1]} : vector<10x64xf32> to vector<4x64xf32>
    %545 = tpu.concatenate %543, %544 in 0 : vector<4x64xf32>, vector<4x64xf32> -> vector<8x64xf32>
    %546 = vector.extract_strided_slice %494 {offsets = [0, 0], sizes = [4, 64], strides = [1, 1]} : vector<10x64xf32> to vector<4x64xf32>
    %547 = vector.extract_strided_slice %494 {offsets = [5, 0], sizes = [4, 64], strides = [1, 1]} : vector<10x64xf32> to vector<4x64xf32>
    %548 = tpu.concatenate %546, %547 in 0 : vector<4x64xf32>, vector<4x64xf32> -> vector<8x64xf32>
    %549 = vector.extract_strided_slice %494 {offsets = [1, 0], sizes = [4, 64], strides = [1, 1]} : vector<10x64xf32> to vector<4x64xf32>
    %550 = vector.extract_strided_slice %494 {offsets = [6, 0], sizes = [4, 64], strides = [1, 1]} : vector<10x64xf32> to vector<4x64xf32>
    %551 = tpu.concatenate %549, %550 in 0 : vector<4x64xf32>, vector<4x64xf32> -> vector<8x64xf32>
    %552 = tpu.concatenate %542, %545, %548, %551 in 1 : vector<8x64xf32>, vector<8x64xf32>, vector<8x64xf32>, vector<8x64xf32> -> vector<8x256xf32>
    %cst_48 = arith.constant dense<0.000000e+00> : vector<8x32xf32>
    %553 = tpu.matmul %552, %6, %cst_48 {dimension_numbers = #tpu.dot_dimension_numbers<[1], [0], [0], [1], [0, 0, 1, 1], [], []>} : vector<8x256xf32>, vector<256x32xf32>, vector<8x32xf32> -> vector<8x32xf32>
    %554 = arith.addf %553, %16 : vector<8x32xf32>
    %555 = vector.extract_strided_slice %509 {offsets = [0, 0], sizes = [1, 32], strides = [1, 1]} : vector<8x32xf32> to vector<1x32xf32>
    %556 = vector.extract_strided_slice %509 {offsets = [1, 0], sizes = [1, 32], strides = [1, 1]} : vector<8x32xf32> to vector<1x32xf32>
    %557 = vector.extract_strided_slice %509 {offsets = [2, 0], sizes = [1, 32], strides = [1, 1]} : vector<8x32xf32> to vector<1x32xf32>
    %558 = vector.extract_strided_slice %509 {offsets = [3, 0], sizes = [1, 32], strides = [1, 1]} : vector<8x32xf32> to vector<1x32xf32>
    %559 = vector.extract_strided_slice %524 {offsets = [0, 0], sizes = [1, 32], strides = [1, 1]} : vector<8x32xf32> to vector<1x32xf32>
    %560 = vector.extract_strided_slice %524 {offsets = [1, 0], sizes = [1, 32], strides = [1, 1]} : vector<8x32xf32> to vector<1x32xf32>
    %561 = vector.extract_strided_slice %524 {offsets = [2, 0], sizes = [1, 32], strides = [1, 1]} : vector<8x32xf32> to vector<1x32xf32>
    %562 = vector.extract_strided_slice %524 {offsets = [3, 0], sizes = [1, 32], strides = [1, 1]} : vector<8x32xf32> to vector<1x32xf32>
    %563 = vector.extract_strided_slice %539 {offsets = [0, 0], sizes = [1, 32], strides = [1, 1]} : vector<8x32xf32> to vector<1x32xf32>
    %564 = vector.extract_strided_slice %539 {offsets = [1, 0], sizes = [1, 32], strides = [1, 1]} : vector<8x32xf32> to vector<1x32xf32>
    %565 = vector.extract_strided_slice %539 {offsets = [2, 0], sizes = [1, 32], strides = [1, 1]} : vector<8x32xf32> to vector<1x32xf32>
    %566 = vector.extract_strided_slice %539 {offsets = [3, 0], sizes = [1, 32], strides = [1, 1]} : vector<8x32xf32> to vector<1x32xf32>
    %567 = vector.extract_strided_slice %554 {offsets = [0, 0], sizes = [1, 32], strides = [1, 1]} : vector<8x32xf32> to vector<1x32xf32>
    %568 = vector.extract_strided_slice %554 {offsets = [1, 0], sizes = [1, 32], strides = [1, 1]} : vector<8x32xf32> to vector<1x32xf32>
    %569 = vector.extract_strided_slice %554 {offsets = [2, 0], sizes = [1, 32], strides = [1, 1]} : vector<8x32xf32> to vector<1x32xf32>
    %570 = vector.extract_strided_slice %554 {offsets = [3, 0], sizes = [1, 32], strides = [1, 1]} : vector<8x32xf32> to vector<1x32xf32>
    %571 = tpu.concatenate %555, %556, %557, %558, %559, %560, %561, %562, %563, %564, %565, %566, %567, %568, %569, %570 in 1 : vector<1x32xf32>, vector<1x32xf32>, vector<1x32xf32>, vector<1x32xf32>, vector<1x32xf32>, vector<1x32xf32>, vector<1x32xf32>, vector<1x32xf32>, vector<1x32xf32>, vector<1x32xf32>, vector<1x32xf32>, vector<1x32xf32>, vector<1x32xf32>, vector<1x32xf32>, vector<1x32xf32>, vector<1x32xf32> -> vector<1x512xf32>
    %572 = vector.extract_strided_slice %509 {offsets = [4, 0], sizes = [1, 32], strides = [1, 1]} : vector<8x32xf32> to vector<1x32xf32>
    %573 = vector.extract_strided_slice %509 {offsets = [5, 0], sizes = [1, 32], strides = [1, 1]} : vector<8x32xf32> to vector<1x32xf32>
    %574 = vector.extract_strided_slice %509 {offsets = [6, 0], sizes = [1, 32], strides = [1, 1]} : vector<8x32xf32> to vector<1x32xf32>
    %575 = vector.extract_strided_slice %509 {offsets = [7, 0], sizes = [1, 32], strides = [1, 1]} : vector<8x32xf32> to vector<1x32xf32>
    %576 = vector.extract_strided_slice %524 {offsets = [4, 0], sizes = [1, 32], strides = [1, 1]} : vector<8x32xf32> to vector<1x32xf32>
    %577 = vector.extract_strided_slice %524 {offsets = [5, 0], sizes = [1, 32], strides = [1, 1]} : vector<8x32xf32> to vector<1x32xf32>
    %578 = vector.extract_strided_slice %524 {offsets = [6, 0], sizes = [1, 32], strides = [1, 1]} : vector<8x32xf32> to vector<1x32xf32>
    %579 = vector.extract_strided_slice %524 {offsets = [7, 0], sizes = [1, 32], strides = [1, 1]} : vector<8x32xf32> to vector<1x32xf32>
    %580 = vector.extract_strided_slice %539 {offsets = [4, 0], sizes = [1, 32], strides = [1, 1]} : vector<8x32xf32> to vector<1x32xf32>
    %581 = vector.extract_strided_slice %539 {offsets = [5, 0], sizes = [1, 32], strides = [1, 1]} : vector<8x32xf32> to vector<1x32xf32>
    %582 = vector.extract_strided_slice %539 {offsets = [6, 0], sizes = [1, 32], strides = [1, 1]} : vector<8x32xf32> to vector<1x32xf32>
    %583 = vector.extract_strided_slice %539 {offsets = [7, 0], sizes = [1, 32], strides = [1, 1]} : vector<8x32xf32> to vector<1x32xf32>
    %584 = vector.extract_strided_slice %554 {offsets = [4, 0], sizes = [1, 32], strides = [1, 1]} : vector<8x32xf32> to vector<1x32xf32>
    %585 = vector.extract_strided_slice %554 {offsets = [5, 0], sizes = [1, 32], strides = [1, 1]} : vector<8x32xf32> to vector<1x32xf32>
    %586 = vector.extract_strided_slice %554 {offsets = [6, 0], sizes = [1, 32], strides = [1, 1]} : vector<8x32xf32> to vector<1x32xf32>
    %587 = vector.extract_strided_slice %554 {offsets = [7, 0], sizes = [1, 32], strides = [1, 1]} : vector<8x32xf32> to vector<1x32xf32>
    %588 = tpu.concatenate %572, %573, %574, %575, %576, %577, %578, %579, %580, %581, %582, %583, %584, %585, %586, %587 in 1 : vector<1x32xf32>, vector<1x32xf32>, vector<1x32xf32>, vector<1x32xf32>, vector<1x32xf32>, vector<1x32xf32>, vector<1x32xf32>, vector<1x32xf32>, vector<1x32xf32>, vector<1x32xf32>, vector<1x32xf32>, vector<1x32xf32>, vector<1x32xf32>, vector<1x32xf32>, vector<1x32xf32>, vector<1x32xf32> -> vector<1x512xf32>
    %589 = tpu.concatenate %571, %588 in 0 : vector<1x512xf32>, vector<1x512xf32> -> vector<2x512xf32>
    %cst_49 = arith.constant dense<0.000000e+00> : vector<2x32xf32>
    %590 = tpu.matmul %589, %7, %cst_49 {dimension_numbers = #tpu.dot_dimension_numbers<[1], [0], [0], [1], [0, 0, 1, 1], [], []>} : vector<2x512xf32>, vector<512x32xf32>, vector<2x32xf32> -> vector<2x32xf32>
    %591 = arith.addf %590, %19 : vector<2x32xf32>
    %cst_50 = arith.constant 0.000000e+00 : f32
    %592 = vector.broadcast %cst_50 : f32 to vector<2x32xf32>
    %593 = arith.maximumf %591, %592 : vector<2x32xf32>
    %c0_51 = arith.constant 0 : index
    %c0_52 = arith.constant 0 : index
    %c0_53 = arith.constant 0 : index
    %594 = vector.load %arg10[%c0_51, %c0_52, %c0_53] : memref<1x2x32xf32, #tpu.memory_space<vmem>>, vector<1x2x32xf32>
    %595 = vector.shape_cast %594 : vector<1x2x32xf32> to vector<2x32xf32>
    %596 = vector.shape_cast %593 : vector<2x32xf32> to vector<1x2x32xf32>
    tpu.vector_store %arg10[%c0_51, %c0_52, %c0_53], %596 {strides = array<i32>} : memref<1x2x32xf32, #tpu.memory_space<vmem>>, vector<1x2x32xf32>,
    return
  }
  func.func @transform_0(%arg0: i32) -> (i32, i32, i32, i32) {
    %c0_i32 = arith.constant 0 : i32
    %c0_i32_0 = arith.constant 0 : i32
    %c0_i32_1 = arith.constant 0 : i32
    %c0_i32_2 = arith.constant 0 : i32
    return %arg0, %c0_i32, %c0_i32_0, %c0_i32_1 : i32, i32, i32, i32
  }
  func.func @transform_1(%arg0: i32) -> (i32, i32) {
    %c0_i32 = arith.constant 0 : i32
    %c0_i32_0 = arith.constant 0 : i32
    %c0_i32_1 = arith.constant 0 : i32
    return %c0_i32, %c0_i32_0 : i32, i32
  }
  func.func @transform_2(%arg0: i32) -> (i32, i32) {
    %c0_i32 = arith.constant 0 : i32
    %c0_i32_0 = arith.constant 0 : i32
    %c0_i32_1 = arith.constant 0 : i32
    return %c0_i32, %c0_i32_0 : i32, i32
  }
  func.func @transform_3(%arg0: i32) -> (i32, i32) {
    %c0_i32 = arith.constant 0 : i32
    %c0_i32_0 = arith.constant 0 : i32
    %c0_i32_1 = arith.constant 0 : i32
    return %c0_i32, %c0_i32_0 : i32, i32
  }
  func.func @transform_4(%arg0: i32) -> (i32, i32) {
    %c0_i32 = arith.constant 0 : i32
    %c0_i32_0 = arith.constant 0 : i32
    %c0_i32_1 = arith.constant 0 : i32
    return %c0_i32, %c0_i32_0 : i32, i32
  }
  func.func @transform_5(%arg0: i32) -> (i32, i32) {
    %c0_i32 = arith.constant 0 : i32
    %c0_i32_0 = arith.constant 0 : i32
    %c0_i32_1 = arith.constant 0 : i32
    return %c0_i32, %c0_i32_0 : i32, i32
  }
  func.func @transform_6(%arg0: i32) -> (i32, i32) {
    %c0_i32 = arith.constant 0 : i32
    %c0_i32_0 = arith.constant 0 : i32
    %c0_i32_1 = arith.constant 0 : i32
    return %c0_i32, %c0_i32_0 : i32, i32
  }
  func.func @transform_7(%arg0: i32) -> (i32, i32) {
    %c0_i32 = arith.constant 0 : i32
    %c0_i32_0 = arith.constant 0 : i32
    %c0_i32_1 = arith.constant 0 : i32
    return %c0_i32, %c0_i32_0 : i32, i32
  }
  func.func @transform_8(%arg0: i32) -> (i32, i32) {
    %c0_i32 = arith.constant 0 : i32
    %c0_i32_0 = arith.constant 0 : i32
    %c0_i32_1 = arith.constant 0 : i32
    return %c0_i32, %c0_i32_0 : i32, i32
  }
  func.func @transform_9(%arg0: i32) -> (i32, i32, i32) {
    %c0_i32 = arith.constant 0 : i32
    %c0_i32_0 = arith.constant 0 : i32
    %c0_i32_1 = arith.constant 0 : i32
    return %arg0, %c0_i32, %c0_i32_0 : i32, i32, i32
  }
}

</mosaic_0001>

<bundles_post_ra>
// kernel: trajmap_cnn_forward.1
= control target key start
LH: loop header
LB: loop body
LE: loop exit
PB: predicated region body
PF: predicated region fallthrough
CT: control target
= control target key end

     0   :  { %vm297_vm0 = vcmask 1046528   ;;  %s6689_s21 = smov 76   ;;  %s6690_s26 = smov 68   ;;  %s9039_s0 = inlined_call_operand.vmem [shape: f32[2,16,8,68], index: 0, kind: input, shape index: {}]   ;;  %s9040_s1 = inlined_call_operand.vmem [shape: f32[544,32], index: 1, kind: input, shape index: {}]   ;;  %s9041_s2 = inlined_call_operand.vmem [shape: f32[1,32], index: 2, kind: input, shape index: {}]   ;;  %s9042_s3 = inlined_call_operand.vmem [shape: f32[288,64], index: 3, kind: input, shape index: {}]   ;;  %s9043_s4 = inlined_call_operand.vmem [shape: f32[1,64], index: 4, kind: input, shape index: {}]   ;;  %s9044_s5 = inlined_call_operand.vmem [shape: f32[256,32], index: 5, kind: input, shape index: {}]   ;;  %s9045_s6 = inlined_call_operand.vmem [shape: f32[1,32], index: 6, kind: input, shape index: {}]   ;;  %s9046_s7 = inlined_call_operand.vmem [shape: f32[512,32], index: 7, kind: input, shape index: {}]   ;;  %s9047_s8 = inlined_call_operand.vmem [shape: f32[1,32], index: 8, kind: input, shape index: {}]   ;;  %s9048_s9 = inlined_call_operand.hbm [shape: f32[1,2,32], index: 9, kind: output, shape index: {}]  }
   0x1   :  { %v34_v0 = vld [vmem:[%s9039_s0 + $0x8] sm:$0xff]  ;;  %v6759_v2 = vld [vmem:[%s9039_s0] sm:$0xff]  ;;  %v6771_v8 = vld [vmem:[%s9039_s0 + $0x18] sm:$0xff]  ;;  %s6691_s27 = smov 8   ;;  %s6692_s11 = smov 92  }
   0x2   :  { %v4274_v1 = vld [vmem:[%s9039_s0 + $0x88] sm:$0xff]  ;;  %v310_v3 = vrot.slane %v34_v0, 1  ;;  %v6764_v5 = vld [vmem:[%s9039_s0 + $0x80] sm:$0xff]  ;;  %v300_v6 = vrot.slane %v6759_v2, 1  ;;  %v4276_v9 = vld [vmem:[%s9039_s0 + $0x98] sm:$0xff]  ;;  %v330_v14 = vrot.slane %v6771_v8, 1 }
   0x3   :  { %v312_v4 = vrot.slane %v4274_v1, 2  ;;  %v302_v7 = vrot.slane %v6764_v5, 2  ;;  %v306_v12 = vrot.slane %v4274_v1, 1  ;;  %v6780_v15 = vrot.slane %v4276_v9, 2  ;;  %v35_v16 = vld [vmem:[%s9039_s0 + $0x10] sm:$0xff]  ;;  %v82_v19 = vld [vmem:[%s9040_s1 + $0x80] sm:$0xff] }
   0x4   :  { %v4275_v17 = vld [vmem:[%s9039_s0 + $0x90] sm:$0xff]  ;;  %v320_v21 = vrot.slane %v35_v16, 1  ;;  %v83_v23 = vld [vmem:[%s9040_s1 + $0x88] sm:$0xff]  ;;  %v66_v24 = vld [vmem:[%s9040_s1] sm:$0xff]  ;;  %v9049_v48 = vrot.slane %v6764_v5, 1  ;;  %v6884_v49 = vrot.slane %v4276_v9, 1 }
   0x5   :  { %v314_v10 = vsel %vm297_vm0, %v310_v3, %v312_v4  ;;  %v304_v11 = vsel %vm297_vm0, %v300_v6, %v302_v7  ;;  %v308_v18 = vsel %vm297_vm0, %v34_v0, %v306_v12  ;;  %v6796_v20 = vsel %vm297_vm0, %v330_v14, %v6780_v15  ;;  %v67_v25 = vld [vmem:[%s9040_s1 + $0x8] sm:$0xff]  ;;  %v84_v27 = vld [vmem:[%s9040_s1 + $0x90] sm:$0xff]  ;;  %v85_v28 = vld [vmem:[%s9040_s1 + $0x98] sm:$0xff]  ;;  %s6693_s15 = smov 84   ;;  %s6694_s18 = smov 16  }
   0x6   :  { %350 = vrot.lane.b32.xlu1 %v314_v10, %s6689_s21  ;;  %v6360_v13 = vpack.i.bf16 %v302_v7, %v304_v11  ;;  %v6798_v22 = vrot.slane %v4275_v17, 2  ;;  %v6812_v26 = vld [vmem:[%s9039_s0 + $0xa8] sm:$0xff]  ;;  %v6824_v29 = vld [vmem:[%s9039_s0 + $0x20] sm:$0xff]  ;;  %v68_v31 = vld [vmem:[%s9040_s1 + $0x10] sm:$0xff]  ;;  %v6837_v33 = vpack.c.bf16 %v83_v23, %v82_v19  ;;  %v6839_v34 = vpack.c.bf16 %v67_v25, %v66_v24  ;;  %s6695_s14 = smov 24  }
   0x7   :  { %v4277_v30 = vld [vmem:[%s9039_s0 + $0xa0] sm:$0xff]  ;;  %v69_v32 = vld [vmem:[%s9040_s1 + $0x18] sm:$0xff]  ;;  %v115_v37 = vld [vmem:[%s9040_s1 + $0x188] sm:$0xff]  ;;  %v6854_v39 = vrot.slane %v4275_v17, 1  ;;  %v6857_v40 = vrot.slane %v6812_v26, 1  ;;  %v6859_v41 = vpack.c.bf16 %v85_v28, %v84_v27  ;;  %v642_v53 = vrot.slane %v6824_v29, 1 }
   0x8   :  { %6361 = vrot.lane.b32.xlu0 %v6360_v13, %s6690_s26  ;;  %9063 = vst [vmem:[#allocation5_spill] sm:$0xff] %v6837_v33  ;;  %v86_v35 = vld [vmem:[%s9040_s1 + $0xa0] sm:$0xff]  ;;  %v6852_v38 = vsel %vm297_vm0, %v320_v21, %v6798_v22  ;;  %v87_v42 = vld [vmem:[%s9040_s1 + $0xa8] sm:$0xff]  ;;  %5454 = vmatprep.subr.bf16.mxu0 %v6837_v33  ;;  %v116_v46 = vld [vmem:[%s9040_s1 + $0x190] sm:$0xff]  ;;  %v6887_v50 = vpack.c.bf16 %v69_v32, %v68_v31  ;;  %v6897_v54 = vrot.slane %v4277_v30, 2  ;;  %v6922_v62 = vrot.slane %v4277_v30, 1 }
   0x9   :  { %v114_v36 = vld [vmem:[%s9040_s1 + $0x180] sm:$0xff]  ;;  %v99_v44 = vld [vmem:[%s9040_s1 + $0x108] sm:$0xff]  ;;  %v117_v47 = vld [vmem:[%s9040_s1 + $0x198] sm:$0xff]  ;;  %5456 = vmatpush3.bf16.msra.mxu0 %v6839_v34  ;;  %v6900_v55 = vpack.c.bf16 %v87_v42, %v86_v35  ;;  %v6915_v60 = vsel %vm297_vm0, %v35_v16, %v6854_v39  ;;  %v6947_v7 = vsel %vm297_vm0, %v6771_v8, %v6884_v49 }
   0xa   :  { %345 = vrot.lane.b32.xlu1 %v306_v12, %s6691_s27  ;;  %v98_v43 = vld [vmem:[%s9040_s1 + $0x100] sm:$0xff]  ;;  %v6873_v45 = vld [vmem:[%s9039_s0 + $0x28] sm:$0xff]  ;;  %v6892_v52 = vpack.c.bf16 %v115_v37, %v114_v36  ;;  %5458 = vmatprep.subr.bf16.mxu0 %v6859_v41  ;;  %v100_v58 = vld [vmem:[%s9040_s1 + $0x110] sm:$0xff]  ;;  %9064 = vst [vmem:[#allocation6_spill] sm:$0xff] %v6922_v62  ;;  %v6931_v1 = vpack.c.bf16 %v117_v47, %v116_v46 }
   0xb   :  { %v70_v51 = vld [vmem:[%s9040_s1 + $0x20] sm:$0xff]  ;;  %v71_v56 = vld [vmem:[%s9040_s1 + $0x28] sm:$0xff]  ;;  %v6905_v57 = vpack.c.bf16 %v99_v44, %v98_v43  ;;  %v101_v59 = vld [vmem:[%s9040_s1 + $0x118] sm:$0xff]  ;;  %v6920_v61 = vsel %vm297_vm0, %v6873_v45, %v6857_v40  ;;  %v6962_v12 = vsel %vm297_vm0, %v6759_v2, %v9049_v48  ;;  %v6970_v13 = vsel %vm297_vm0, %v642_v53, %v6897_v54 }
   0xc   :  { %343 = vrot.lane.b32.xlu0 %v308_v18, %s6691_s27  ;;  %v88_v63 = vld [vmem:[%s9040_s1 + $0xb0] sm:$0xff]  ;;  %v89_v0 = vld [vmem:[%s9040_s1 + $0xb8] sm:$0xff]  ;;  %5486 = vmatprep.subr.bf16.mxu1 %v6892_v52  ;;  %v6934_v3 = vpack.c.bf16 %v101_v59, %v100_v58  ;;  %v119_v6 = vld [vmem:[%s9040_s1 + $0x1a8] sm:$0xff]  ;;  %v6950_v9 = vpack.c.bf16 %v71_v56, %v70_v51  ;;  %v6370_v8 = vpack.i.bf16 %v6857_v40, %v6920_v61  ;;  %v7061_v59 = vrot.slane %v6812_v26, 2 }
   0xd   :  { %5488 = vmatpush3.bf16.msra.mxu1 %v6905_v57  ;;  %5460 = vmatpush3.bf16.msra.mxu0 %v6887_v50  ;;  %v102_v10 = vld [vmem:[%s9040_s1 + $0x120] sm:$0xff]  ;;  %v103_v11 = vld [vmem:[%s9040_s1 + $0x128] sm:$0xff]  ;;  %v6973_v14 = vpack.c.bf16 %v89_v0, %v88_v63  ;;  %v72_v2 = vld [vmem:[%s9040_s1 + $0x30] sm:$0xff]  ;;  %v6984_v17 = vsel %vm297_vm0, %v6824_v29, %v6922_v62  ;;  %v6365_v27 = vpack.i.bf16 %v6897_v54, %v6970_v13 }
   0xe   :  { %378 = vrot.lane.b32.xlu1 %v6796_v20, %s6692_s11  ;;  %5462 = vmatprep.subr.bf16.mxu0 %v6900_v55  ;;  %v73_v16 = vld [vmem:[%s9040_s1 + $0x38] sm:$0xff]  ;;  %9065 = vst [vmem:[#allocation7_spill] sm:$0xff] %v6984_v17  ;;  %v90_v18 = vld [vmem:[%s9040_s1 + $0xc0] sm:$0xff]  ;;  %v91_v19 = vld [vmem:[%s9040_s1 + $0xc8] sm:$0xff]  ;;  %v6996_v23 = vpack.c.bf16 %v103_v11, %v102_v10  ;;  %v6380_v31 = vpack.i.bf16 %v6922_v62, %v6984_v17 }
   0xf   :  { %5490 = vmatprep.subr.bf16.mxu1 %v6931_v1  ;;  %v120_v24 = vld [vmem:[%s9040_s1 + $0x1b0] sm:$0xff]  ;;  %v121_v25 = vld [vmem:[%s9040_s1 + $0x1b8] sm:$0xff]  ;;  %v7009_v28 = vpack.c.bf16 %v73_v16, %v72_v2  ;;  %v7021_v32 = vpack.c.bf16 %v91_v19, %v90_v18  ;;  %v74_v35 = vld [vmem:[%s9040_s1 + $0x40] sm:$0xff]  ;;  %v6375_v51 = vpack.i.bf16 %v6780_v15, %v6796_v20 }
  0x10   :  { %352 = vrot.lane.b32.xlu0 %v312_v4, %s6689_s21  ;;  %v118_v4 = vld [vmem:[%s9040_s1 + $0x1a0] sm:$0xff]  ;;  %v104_v29 = vld [vmem:[%s9040_s1 + $0x130] sm:$0xff]  ;;  %v105_v30 = vld [vmem:[%s9040_s1 + $0x138] sm:$0xff]  ;;  %v7036_v43 = vpack.c.bf16 %v121_v25, %v120_v24 }
  0x11   :  { %v6993_v21 = vpack.c.bf16 %v119_v6, %v118_v4  ;;  %5492 = vmatpush3.bf16.msra.mxu1 %v6934_v3  ;;  %5464 = vmatpush3.bf16.msra.mxu0 %v6950_v9  ;;  %v75_v36 = vld [vmem:[%s9040_s1 + $0x48] sm:$0xff]  ;;  %v92_v37 = vld [vmem:[%s9040_s1 + $0xd0] sm:$0xff]  ;;  %v93_v42 = vld [vmem:[%s9040_s1 + $0xd8] sm:$0xff]  ;;  %v7039_v44 = vpack.c.bf16 %v105_v30, %v104_v29 }
  0x12   :  { %364 = vrot.lane.b32.xlu1 %v6852_v38, %s6693_s15  ;;  %5466 = vmatprep.subr.bf16.mxu0 %v6973_v14  ;;  %v122_v46 = vld [vmem:[%s9040_s1 + $0x1c0] sm:$0xff]  ;;  %v123_v47 = vld [vmem:[%s9040_s1 + $0x1c8] sm:$0xff]  ;;  %v7051_v53 = vpack.c.bf16 %v75_v36, %v74_v35  ;;  %v7065_v20 = vpack.c.bf16 %v93_v42, %v92_v37  ;;  %v76_v63 = vld [vmem:[%s9040_s1 + $0x50] sm:$0xff] }
  0x13   :  { %5494 = vmatprep.subr.bf16.mxu1 %v6993_v21  ;;  %v106_v56 = vld [vmem:[%s9040_s1 + $0x140] sm:$0xff]  ;;  %v107_v58 = vld [vmem:[%s9040_s1 + $0x148] sm:$0xff]  ;;  %v77_v0 = vld [vmem:[%s9040_s1 + $0x58] sm:$0xff] }
  0x14   :  { %380 = vrot.lane.b32.xlu0 %v6780_v15, %s6692_s11  ;;  %v652_v15 = vrot.slane %v6873_v45, 1  ;;  %v94_v4 = vld [vmem:[%s9040_s1 + $0xe0] sm:$0xff]  ;;  %v95_v26 = vld [vmem:[%s9040_s1 + $0xe8] sm:$0xff]  ;;  %v7080_v45 = vpack.c.bf16 %v123_v47, %v122_v46  ;;  %v7083_v6 = vpack.c.bf16 %v107_v58, %v106_v56  ;;  %v124_v10 = vld [vmem:[%s9040_s1 + $0x1d0] sm:$0xff] }
  0x15   :  { %5496 = vmatpush3.bf16.msra.mxu1 %v6996_v23  ;;  %5468 = vmatpush3.bf16.msra.mxu0 %v7009_v28  ;;  %v125_v11 = vld [vmem:[%s9040_s1 + $0x1d8] sm:$0xff]  ;;  %v108_v2 = vld [vmem:[%s9040_s1 + $0x150] sm:$0xff]  ;;  %v7106_v19 = vpack.c.bf16 %v95_v26, %v94_v4  ;;  %v78_v24 = vld [vmem:[%s9040_s1 + $0x60] sm:$0xff] }
  0x16   :  { %357 = vrot.lane.b32.xlu1 %v6915_v60, %s6694_s18  ;;  %5470 = vmatprep.subr.bf16.mxu0 %v7021_v32  ;;  %v109_v16 = vld [vmem:[%s9040_s1 + $0x158] sm:$0xff]  ;;  %v656_v18 = vsel %vm297_vm0, %v652_v15, %v7061_v59  ;;  %v79_v25 = vld [vmem:[%s9040_s1 + $0x68] sm:$0xff] }
  0x17   :  { %5498 = vmatprep.subr.bf16.mxu1 %v7036_v43 }
  0x18   :  { %371 = vrot.lane.b32.xlu0 %v6947_v7, %s6695_s14 }
  0x19   :  { %5500 = vmatpush3.bf16.msra.mxu1 %v7039_v44  ;;  %5472 = vmatpush3.bf16.msra.mxu0 %v7051_v53 }
  0x1a   :  { %6371 = vrot.lane.b32.xlu1 %v6370_v8, %s6695_s14  ;;  %v7093_v8 = vpack.c.bf16 %v77_v0, %v76_v63  ;;  %5474 = vmatprep.subr.bf16.mxu0 %v7065_v20 }
  0x1c   :  { %6366 = vrot.lane.b32.xlu0 %v6365_v27, %s6693_s15 }
  0x1e   :  { %6381 = vrot.lane.b32.xlu1 %v6380_v31, %s6694_s18 }
  0x20   :  { %6376 = vrot.lane.b32.xlu0 %v6375_v51, %s6689_s21 }
  0x22   :  { %699 = vrot.lane.b32.xlu1 %v7061_v59, %s6692_s11 }
  0x23   :  { %14 = vsyncpa [#allocation3], 0  ;;  %v96_v27 = vld [vmem:[%s9040_s1 + $0xf0] sm:$0xff]  ;;  %v97_v29 = vld [vmem:[%s9040_s1 + $0xf8] sm:$0xff]  ;;  %5502 = vmatprep.subr.bf16.mxu1 %v7080_v45  ;;  %v7121_v30 = vpack.c.bf16 %v125_v11, %v124_v10  ;;  %v7124_v31 = vpack.c.bf16 %v109_v16, %v108_v2  ;;  %5476 = vmatpush3.bf16.msra.mxu0 %v7093_v8  ;;  %v7134_v37 = vpack.c.bf16 %v79_v25, %v78_v24  ;;  %vm387_vm1 = vcmask 64512   ;;  %s6696_s28 = smov 32  }
  0x24   :  { %5504 = vmatpush3.bf16.msra.mxu1 %v7083_v6  ;;  %v126_v35 = vld [vmem:[%s9040_s1 + $0x1e0] sm:$0xff]  ;;  %v127_v36 = vld [vmem:[%s9040_s1 + $0x1e8] sm:$0xff]  ;;  %697 = vrot.lane.b32.xlu0 %v656_v18, %s6692_s11  ;;  %v7145_v47 = vpack.c.bf16 %v97_v29, %v96_v27  ;;  %v80_v51 = vld [vmem:[%s9040_s1 + $0x70] sm:$0xff]  ;;  %v6385_v16 = vpack.i.bf16 %v6970_v13, %v6798_v22  ;;  %vm390_vm2 = vcmask 621568   ;;  %vm384_vm3 = vcmask 556032  }
  0x25   :  { %v110_v42 = vld [vmem:[%s9040_s1 + $0x160] sm:$0xff]  ;;  %v111_v46 = vld [vmem:[%s9040_s1 + $0x168] sm:$0xff]  ;;  %5478 = vmatprep.subr.bf16.mxu0 %v7106_v19  ;;  %v81_v56 = vld [vmem:[%s9040_s1 + $0x78] sm:$0xff]  ;;  %5506 = vmatprep.subr.bf16.mxu1 %v7121_v30  ;;  %v7160_v63 = vpack.c.bf16 %v127_v36, %v126_v35  ;;  %v6390_v36 = vpack.i.bf16 %v6920_v61, %v6884_v49  ;;  %vm405_vm4 = vcmask 261120   ;;  %vm393_vm5 = vcmask 130048  }
  0x26   :  { %373 = vrot.lane.b32.xlu1 %v6884_v49, %s6695_s14  ;;  %v130_v58 = vld [vmem:[%s9040_s1 + $0x200] sm:$0xff]  ;;  %v131_v15 = vld [vmem:[%s9040_s1 + $0x208] sm:$0xff]  ;;  %v7163_v0 = vpack.c.bf16 %v111_v46, %v110_v42  ;;  %v128_v4 = vld [vmem:[%s9040_s1 + $0x1f0] sm:$0xff]  ;;  %v7174_v10 = vpack.c.bf16 %v81_v56, %v80_v51  ;;  %vm399_vm6 = vcmask 195584   ;;  %vm402_vm7 = vcmask 752640  }
  0x27   :  { %v129_v26 = vld [vmem:[%s9040_s1 + $0x1f8] sm:$0xff]  ;;  %5480 = vmatpush3.bf16.msra.mxu0 %v7134_v37  ;;  %v112_v11 = vld [vmem:[%s9040_s1 + $0x170] sm:$0xff]  ;;  %v7187_v24 = vpack.c.bf16 %v131_v15, %v130_v58  ;;  %vm396_vm8 = vcmask 687104   ;;  %vm2511_vm9 = vcmask 1044480   ;;  %vm2505_vm10 = vcmask 1045504  }
  0x28   :  { %5508 = vmatpush3.bf16.msra.mxu1 %v7124_v31  ;;  %366 = vrot.lane.b32.xlu0 %v6798_v22, %s6693_s15  ;;  %v113_v2 = vld [vmem:[%s9040_s1 + $0x178] sm:$0xff]  ;;  %v7190_v25 = vpack.c.bf16 %v129_v26, %v128_v4  ;;  %v39_v22 = vld [vmem:[%s9039_s0 + $0x30] sm:$0xff]  ;;  %v4282_v4 = vld [vmem:[%s9039_s0 + $0xc8] sm:$0xff]  ;;  %vm2600_vm11 = vcmask 523264   ;;  %vm2603_vm12 = vcmask 785408   ;;  %vm3670_vm13 = vcmask 1043456  }
  0x29   :  { %5482 = vmatprep.subr.bf16.mxu0 %v7145_v47  ;;  %5510 = vmatprep.subr.bf16.mxu1 %v7160_v63  ;;  %v4280_v27 = vld [vmem:[%s9039_s0 + $0xb8] sm:$0xff]  ;;  %v7196_v29 = vpack.c.bf16 %v113_v2, %v112_v11  ;;  %v953_v42 = vrot.slane %v39_v22, 1  ;;  %v42_v11 = vld [vmem:[%s9039_s0 + $0x48] sm:$0xff]  ;;  %v43_v2 = vld [vmem:[%s9039_s0 + $0x50] sm:$0xff]  ;;  %vm4111_vm14 = vcmask 1040384   ;;  %vm4257_vm15 = vcmask 254976  }
  0x2a   :  { %657 = vrot.lane.b32.xlu1 %v6852_v38, %s6690_s26  ;;  %v4279_v38 = vld [vmem:[%s9039_s0 + $0xb0] sm:$0xff]  ;;  %v959_v13 = vrot.slane %v4280_v27, 1  ;;  %v40_v35 = vld [vmem:[%s9039_s0 + $0x38] sm:$0xff]  ;;  %v965_v58 = vrot.slane %v4280_v27, 2 }
  0x2b   :  { %5484 = vmatpush3.bf16.msra.mxu0 %v7174_v10  ;;  %v955_v46 = vrot.slane %v4279_v38, 2  ;;  %v963_v56 = vrot.slane %v40_v35, 1 }
  0x2c   :  { %5512 = vmatpush3.bf16.msra.mxu1 %v7163_v0  ;;  %359 = vrot.lane.b32.xlu0 %v6854_v39, %s6694_s18  ;;  %v961_v51 = vsel %vm297_vm0, %v40_v35, %v959_v13 }
  0x2d   :  { %5518 = vmatprep.subr.bf16.mxu0 %v7187_v24  ;;  %5514 = vmatprep.subr.bf16.mxu1 %v7190_v25  ;;  %v957_v15 = vsel %vm297_vm0, %v953_v42, %v955_v46  ;;  %v967_v49 = vsel %vm297_vm0, %v963_v56, %v965_v58  ;;  %v6400_v27 = vpack.i.bf16 %v959_v13, %v961_v51  ;;  %v1276_v42 = vrot.slane %v4282_v4, 2 }
  0x2e   :  { %6386 = vrot.lane.b32.xlu1 %v6385_v16, %s6690_s26  ;;  %v6405_v26 = vpack.i.bf16 %v965_v58, %v967_v49  ;;  %v4283_v16 = vld [vmem:[%s9039_s0 + $0xd0] sm:$0xff] }
  0x2f   :  { %v1577_v56 = vrot.slane %v4283_v16, 2 }
  0x30   :  { %5516 = vmatpush3.bf16.msra.mxu1 %v7196_v29  ;;  %663 = vrot.lane.b32.xlu0 %v6947_v7, %s6691_s27  ;;  %v7224_v7 = vrot.slane %v4279_v38, 1 }
  0x31   :  { %5526 = vmatprep.subr.bf16.mxu1 %v6837_v33 }
  0x32   :  { %980 = vrot.lane.b32.xlu1 %v656_v18, %s6689_s21  ;;  %9066 = vst [vmem:[#allocation8_spill] sm:$0xff] %v7224_v7  ;;  %v7230_v61 = vsel %vm297_vm0, %v39_v22, %v7224_v7  ;;  %v6395_v18 = vpack.i.bf16 %v955_v46, %v957_v15  ;;  %v1274_v22 = vrot.slane %v42_v11, 1 }
  0x33   :  { %9067 = vst [vmem:[#allocation9_spill] sm:$0xff] %v7230_v61 }
  0x34   :  { %6391 = vrot.lane.b32.xlu0 %v6390_v36, %s6691_s27 }
  0x36   :  { %1001 = vrot.lane.b32.xlu1 %v961_v51, %s6695_s14  ;;  %v1278_v51 = vsel %vm297_vm0, %v1274_v22, %v1276_v42 }
  0x38   :  { %994 = vrot.lane.b32.xlu0 %v957_v15, %s6693_s15 }
  0x3a   :  { %1008 = vrot.lane.b32.xlu1 %v967_v49, %s6692_s11  ;;  %v7274_v49 = vrot.slane %v4283_v16, 1  ;;  %v44_v16 = vld [vmem:[%s9039_s0 + $0x58] sm:$0xff] }
  0x3c   :  { %987 = vrot.lane.b32.xlu0 %v7230_v61, %s6694_s18  ;;  %9069 = vst [vmem:[#allocation11_spill] sm:$0xff] %v7274_v49 }
  0x3e   :  { %976 = vrot.lane.b32.xlu1 %v6857_v40, %s6691_s27  ;;  %v1270_v40 = vrot.slane %v4282_v4, 1 }
  0x40   :  { %970 = vrot.lane.b32.xlu0 %v6897_v54, %s6690_s26  ;;  %v4281_v54 = vld [vmem:[%s9039_s0 + $0xc0] sm:$0xff]  ;;  %v1272_v36 = vsel %vm297_vm0, %v42_v11, %v1270_v40  ;;  %v7287_v11 = vsel %vm297_vm0, %v43_v2, %v7274_v49 }
  0x41   :  { %v1266_v38 = vrot.slane %v4281_v54, 2  ;;  %9071 = vst [vmem:[#allocation13_spill] sm:$0xff] %v7287_v11 }
  0x42   :  { %1010 = vrot.lane.b32.xlu1 %v965_v58, %s6692_s11 }
  0x44   :  { %982 = vrot.lane.b32.xlu0 %v7061_v59, %s6689_s21  ;;  %v41_v59 = vld [vmem:[%s9039_s0 + $0x40] sm:$0xff] }
  0x45   :  { %v1264_v35 = vrot.slane %v41_v59, 1 }
  0x46   :  { %1003 = vrot.lane.b32.xlu1 %v959_v13, %s6695_s14  ;;  %v7270_v13 = vrot.slane %v4281_v54, 1 }
  0x47   :  { %v1268_v58 = vsel %vm297_vm0, %v1264_v35, %v1266_v38 }
  0x48   :  { %996 = vrot.lane.b32.xlu0 %v955_v46, %s6693_s15  ;;  %v1575_v46 = vrot.slane %v43_v2, 1  ;;  %9068 = vst [vmem:[#allocation10_spill] sm:$0xff] %v7270_v13  ;;  %v1585_v2 = vrot.slane %v44_v16, 1 }
  0x4a   :  { %6396 = vrot.lane.b32.xlu1 %v6395_v18, %s6690_s26  ;;  %v1579_v15 = vsel %vm297_vm0, %v1575_v46, %v1577_v56  ;;  %v4284_v18 = vld [vmem:[%s9039_s0 + $0xd8] sm:$0xff]  ;;  %v6425_v46 = vpack.i.bf16 %v1266_v38, %v1268_v58 }
  0x4b   :  { %v6410_v4 = vpack.i.bf16 %v1579_v15, %v1266_v38  ;;  %v1581_v54 = vrot.slane %v4284_v18, 1  ;;  %v1587_v35 = vrot.slane %v4284_v18, 2  ;;  %v45_v38 = vld [vmem:[%s9039_s0 + $0x60] sm:$0xff]  ;;  %v4286_v18 = vld [vmem:[%s9039_s0 + $0xe8] sm:$0xff] }
  0x4c   :  { %989 = vrot.lane.b32.xlu0 %v7224_v7, %s6694_s18 }
  0x4d   :  { %v1589_v48 = vsel %vm297_vm0, %v1585_v2, %v1587_v35 }
  0x4e   :  { %6406 = vrot.lane.b32.xlu1 %v6405_v26, %s6689_s21  ;;  %v7283_v26 = vsel %vm297_vm0, %v41_v59, %v7270_v13  ;;  %v1583_v59 = vsel %vm297_vm0, %v44_v16, %v1581_v54 }
  0x4f   :  { %9070 = vst [vmem:[#allocation12_spill] sm:$0xff] %v7283_v26  ;;  %v6415_v22 = vpack.i.bf16 %v1583_v59, %v1270_v40 }
  0x50   :  { %6401 = vrot.lane.b32.xlu0 %v6400_v27, %s6691_s27  ;;  %v6420_v27 = vpack.i.bf16 %v7287_v11, %v7270_v13  ;;  %v1898_v11 = vrot.slane %v4286_v18, 2 }
  0x52   :  { %1312 = vrot.lane.b32.xlu1 %v1272_v36, %s6695_s14 }
  0x54   :  { %1305 = vrot.lane.b32.xlu0 %v1268_v58, %s6693_s15  ;;  %v6435_v58 = vpack.i.bf16 %v1581_v54, %v1583_v59  ;;  %v7336_v59 = vld [vmem:[%s9039_s0 + $0xf8] sm:$0xff] }
  0x55   :  { %v9072_v61 = vrot.slane %v7336_v59, 1 }
  0x56   :  { %1319 = vrot.lane.b32.xlu1 %v1278_v51, %s6692_s11 }
  0x58   :  { %1298 = vrot.lane.b32.xlu0 %v7283_v26, %s6694_s18 }
  0x5a   :  { %6411 = vrot.lane.b32.xlu1 %v6410_v4, %s6693_s15 }
  0x5c   :  { %1321 = vrot.lane.b32.xlu0 %v1276_v42, %s6692_s11 }
  0x5e   :  { %6421 = vrot.lane.b32.xlu1 %v6420_v27, %s6694_s18 }
  0x60   :  { %6416 = vrot.lane.b32.xlu0 %v6415_v22, %s6695_s14  ;;  %v46_v22 = vld [vmem:[%s9039_s0 + $0x68] sm:$0xff] }
  0x62   :  { %1596 = vrot.lane.b32.xlu1 %v1272_v36, %s6691_s27  ;;  %v4285_v36 = vld [vmem:[%s9039_s0 + $0xe0] sm:$0xff] }
  0x63   :  { %v7329_v16 = vrot.slane %v4285_v36, 1 }
  0x64   :  { %6426 = vrot.lane.b32.xlu0 %v6425_v46, %s6690_s26 }
  0x65   :  { %v7348_v2 = vsel %vm297_vm0, %v45_v38, %v7329_v16 }
  0x66   :  { %1630 = vrot.lane.b32.xlu1 %v1589_v48, %s6692_s11 }
  0x68   :  { %1602 = vrot.lane.b32.xlu0 %v1278_v51, %s6689_s21  ;;  %v1886_v51 = vrot.slane %v45_v38, 1 }
  0x6a   :  { %1604 = vrot.lane.b32.xlu1 %v1276_v42, %s6689_s21  ;;  %v7318_v42 = vrot.slane %v4285_v36, 2 }
  0x6c   :  { %1598 = vrot.lane.b32.xlu0 %v1270_v40, %s6691_s27  ;;  %v6430_v40 = vpack.i.bf16 %v1577_v56, %v1579_v15  ;;  %v7327_v4 = vsel %vm297_vm0, %v1886_v51, %v7318_v42  ;;  %v7339_v15 = vrot.slane %v4286_v18, 1  ;;  %v132_v51 = vld [vmem:[%s9040_s1 + $0x210] sm:$0xff] }
  0x6e   :  { %1618 = vrot.lane.b32.xlu1 %v1577_v56, %s6693_s15  ;;  %v6440_v56 = vpack.i.bf16 %v1587_v35, %v1589_v48  ;;  %v47_v48 = vld [vmem:[%s9039_s0 + $0x70] sm:$0xff]  ;;  %v7373_v46 = vsel %vm297_vm0, %v46_v22, %v7339_v15 }
  0x6f   :  { %v2197_v26 = vrot.slane %v47_v48, 1 }
  0x70   :  { %1632 = vrot.lane.b32.xlu0 %v1587_v35, %s6692_s11  ;;  %v7357_v35 = vld [vmem:[%s9039_s0 + $0xf0] sm:$0xff] }
  0x72   :  { %1611 = vrot.lane.b32.xlu1 %v7274_v49, %s6694_s18  ;;  %v1896_v49 = vrot.slane %v46_v22, 1 }
  0x74   :  { %1625 = vrot.lane.b32.xlu0 %v1581_v54, %s6695_s14 }
  0x76   :  { %6436 = vrot.lane.b32.xlu1 %v6435_v58, %s6691_s27  ;;  %v7362_v58 = vld [vmem:[%s9039_s0 + $0x78] sm:$0xff] }
  0x77   :  { %v2205_v62 = vsel %vm297_vm0, %v7362_v58, %v9072_v61 }
  0x78   :  { %v7331_v27 = vpop.permute.xlu1 %350  ;;  %6431 = vrot.lane.b32.xlu0 %v6430_v40, %s6690_s26  ;;  %v133_v40 = vld [vmem:[%s9040_s1 + $0x218] sm:$0xff]  ;;  %v6450_v7 = vpack.i.bf16 %v2205_v62, %v7339_v15  ;;  %v9074_v62 = vrot.slane %v6764_v5, 1 }
  0x79   :  { %v7385_v18 = vpack.c.bf16 %v133_v40, %v132_v51  ;;  %v9073_v51 = vrot.slane %v7357_v35, 2 }
  0x7a   :  { %1927 = vrot.lane.b32.xlu1 %v7327_v4, %s6693_s15  ;;  %v6362_v54 = vpop.permute.xlu0 %6361 }
  0x7b   :  { %v6363_v38 = vunpack.i.l.bf16 %v6362_v54  ;;  %v6364_v13 = vunpack.i.h.bf16 %v6362_v54  ;;  %v2201_v40 = vsel %vm297_vm0, %v2197_v26, %v9073_v51  ;;  %v6460_v26 = vpack.i.bf16 %v7318_v42, %v7327_v4 }
  0x7c   :  { %v346_v36 = vpop.permute.xlu1 %345  ;;  %6441 = vrot.lane.b32.xlu0 %v6440_v56, %s6689_s21 }
  0x7d   :  { %v385_v54 = vsel %vm384_vm3, %v6962_v12, %v6363_v38  ;;  %v389_v61 = vsel %vm387_vm1, %v6364_v13, %v346_v36  ;;  %v6445_v36 = vpack.i.bf16 %v2201_v40, %v7318_v42 }
  0x7e   :  { %1920 = vrot.lane.b32.xlu1 %v7348_v2, %s6694_s18  ;;  %v344_v56 = vpop.permute.xlu0 %343 }
  0x7f   :  { %v388_v17 = vsel %vm387_vm1, %v6363_v38, %v344_v56 }
  0x80   :  { %v379_v33 = vpop.permute.xlu1 %378  ;;  %v391_v22 = vsel %vm390_vm2, %v388_v17, %v7331_v27  ;;  %1934 = vrot.lane.b32.xlu0 %v7373_v46, %s6695_s14  ;;  %v1900_v17 = vsel %vm297_vm0, %v1896_v49, %v1898_v11  ;;  %v386_v49 = vsel %vm384_vm3, %v9074_v62, %v6364_v13  ;;  %v2209_v62 = vrot.slane %v7336_v59, 2 }
  0x81   :  { %474 = vmatprep.mubr.f32.mxu0 %v391_v22  ;;  %v2193_v22 = vrot.slane %v7357_v35, 1  ;;  %v6470_v4 = vpack.i.bf16 %v1898_v11, %v1900_v17 }
  0x82   :  { %1943 = vrot.lane.b32.xlu1 %v1898_v11, %s6692_s11  ;;  %v7394_v56 = vpop.permute.xlu0 %352  ;;  %475 = vmatmul.mubr.f32.vlgmr.msra.gmra.mrb[0].mxu0 %v385_v54 }
  0x83   :  { %5520 = vmatpush3.bf16.msra.mxu0 %v7187_v24  ;;  %v392_v38 = vsel %vm390_vm2, %v389_v61, %v7394_v56  ;;  %v2195_v61 = vsel %vm297_vm0, %v47_v48, %v2193_v22 }
  0x84   :  { %v365_v12 = vpop.permute.xlu1 %364  ;;  %479 = vmatprep.mubr.f32.mxu0 %v392_v38  ;;  %5522 = vmatprep.subr.bf16.mxu0 %v7385_v18  ;;  %v6455_v13 = vpack.i.bf16 %v2195_v61, %v7329_v16 }
  0x85   :  { %1941 = vrot.lane.b32.xlu0 %v1900_v17, %s6692_s11  ;;  %v2207_v17 = vrot.slane %v7362_v58, 1 }
  0x86   :  { %6451 = vrot.lane.b32.xlu1 %v6450_v7, %s6695_s14  ;;  %v7413_v54 = vpop.permute.xlu0 %380  ;;  %480 = vmatmul.mubr.f32.gmra.mrb[2].mxu0 %v386_v49  ;;  %v9075_v49 = vrot.slane %v7357_v35, 2 }
  0x87   :  { %5524 = vmatpush3.bf16.msra.mxu0 %v7385_v18  ;;  %5329 = vmatprep.mubr.msk.f32.mxu0 %vm405_vm4, %v379_v33  ;;  %v2211_v58 = vsel %vm297_vm0, %v2207_v17, %v2209_v62 }
  0x88   :  { %v358_v5 = vpop.permute.xlu1 %357  ;;  %5558 = vmatprep.subr.bf16.mxu0 %v6892_v52 }
  0x89   :  { %6446 = vrot.lane.b32.xlu0 %v6445_v36, %s6693_s15  ;;  %v394_v7 = vsel %vm393_vm5, %v7331_v27, %v358_v5  ;;  %v6465_v27 = vpack.i.bf16 %v7339_v15, %v7373_v46 }
  0x8a   :  { %6461 = vrot.lane.b32.xlu1 %v6460_v26, %s6690_s26  ;;  %v372_v42 = vpop.permute.xlu0 %371  ;;  %5330 = vmatmul.mubr.msk.f32.vlgmr.msra.gmra.mrb[4].mxu0 %vm405_vm4, %v7413_v54  ;;  %v397_v38 = vsel %vm396_vm8, %v394_v7, %v365_v12 }
  0x8b   :  { %v400_v48 = vsel %vm399_vm6, %v365_v12, %v372_v42  ;;  %5560 = vmatpush3.bf16.msra.mxu0 %v6905_v57 }
  0x8c   :  { %v7428_v51 = vpop.permute.xlu1 %6371  ;;  %v403_v40 = vsel %vm402_vm7, %v400_v48, %v379_v33  ;;  %5562 = vmatprep.subr.bf16.mxu0 %v6931_v1 }
  0x8d   :  { %549 = vmatprep.mubr.f32.mxu1 %v403_v40  ;;  %6456 = vrot.lane.b32.xlu0 %v6455_v13, %s6694_s18  ;;  %v6373_v12 = vunpack.i.l.bf16 %v7428_v51  ;;  %v9076_v13 = vrot.slane %v7336_v59, 1 }
  0x8e   :  { %550 = vmatmul.mubr.f32.vlgmr.msra.gmra.mrb[0].mxu1 %v397_v38  ;;  %v7436_v11 = vpop.permute.xlu0 %6366  ;;  %6471 = vrot.lane.b32.xlu1 %v6470_v4, %s6689_s21 }
  0x8f   :  { %5528 = vmatpush3.bf16.msra.mxu1 %v6839_v34  ;;  %5564 = vmatpush3.bf16.msra.mxu0 %v6934_v3  ;;  %v6368_v15 = vunpack.i.l.bf16 %v7436_v11 }
  0x90   :  { %v7443_v33 = vpop.permute.xlu1 %6381  ;;  %5530 = vmatprep.subr.bf16.mxu1 %v6859_v41  ;;  %5566 = vmatprep.subr.bf16.mxu0 %v6993_v21 }
  0x91   :  { %6466 = vrot.lane.b32.xlu0 %v6465_v27, %s6691_s27  ;;  %v713_v36 = vsel %vm399_vm6, %v6368_v15, %v6373_v12  ;;  %s6698_s27 = smov 64  }
  0x92   :  { %v7450_v46 = vpop.permute.xlu0 %6376  ;;  %2240 = vrot.lane.b32.xlu1 %v9075_v49, %s6693_s15 }
  0x93   :  { %5532 = vmatpush3.bf16.msra.mxu1 %v6887_v50  ;;  %5568 = vmatpush3.bf16.msra.mxu0 %v6996_v23  ;;  %v6378_v27 = vunpack.i.l.bf16 %v7450_v46 }
  0x94   :  { %v7458_v26 = vpop.permute.xlu1 %699  ;;  %5534 = vmatprep.subr.bf16.mxu1 %v6900_v55  ;;  %5570 = vmatprep.subr.bf16.mxu0 %v7036_v43 }
  0x95   :  { %2252 = vrot.lane.b32.xlu0 %v2211_v58, %s6692_s11 }
  0x96   :  { %v7466_v61 = vpop.permute.xlu0 %697  ;;  %2233 = vrot.lane.b32.xlu1 %v2193_v22, %s6694_s18 }
  0x97   :  { %5536 = vmatpush3.bf16.msra.mxu1 %v6950_v9  ;;  %5572 = vmatpush3.bf16.msra.mxu0 %v7039_v44  ;;  %v715_v5 = vsel %vm402_vm7, %v713_v36, %v7466_v61  ;;  %v6384_v36 = vunpack.i.h.bf16 %v7443_v33 }
  0x98   :  { %v374_v35 = vpop.permute.xlu1 %373  ;;  %5538 = vmatprep.subr.bf16.mxu1 %v6973_v14  ;;  %5574 = vmatprep.subr.bf16.mxu0 %v7080_v45 }
  0x99   :  { %860 = vmatprep.mubr.f32.mxu0 %v715_v5  ;;  %2247 = vrot.lane.b32.xlu0 %v9076_v13, %s6695_s14 }
  0x9a   :  { %v367_v7 = vpop.permute.xlu0 %366 }
  0x9b   :  { %5540 = vmatpush3.bf16.msra.mxu1 %v7009_v28  ;;  %v401_v22 = vsel %vm399_vm6, %v367_v7, %v374_v35  ;;  %5576 = vmatpush3.bf16.msra.mxu0 %v7083_v6 }
  0x9c   :  { %v658_v42 = vpop.permute.xlu1 %657  ;;  %v404_v4 = vsel %vm402_vm7, %v401_v22, %v7413_v54  ;;  %5542 = vmatprep.subr.bf16.mxu1 %v7021_v32  ;;  %5578 = vmatprep.subr.bf16.mxu0 %v7121_v30  ;;  %v6383_v54 = vunpack.i.l.bf16 %v7443_v33 }
  0x9d   :  { %554 = vmatprep.mubr.f32.mxu1 %v404_v4  ;;  %2254 = vrot.lane.b32.xlu0 %v2209_v62, %s6692_s11  ;;  %v6374_v62 = vunpack.i.h.bf16 %v7428_v51  ;;  %v6379_v51 = vunpack.i.h.bf16 %v7450_v46 }
  0x9e   :  { %v360_v59 = vpop.permute.xlu0 %359  ;;  %v709_v5 = vsel %vm393_vm5, %v6378_v27, %v6383_v54 }
  0x9f   :  { %5544 = vmatpush3.bf16.msra.mxu1 %v7051_v53  ;;  %v395_v48 = vsel %vm393_vm5, %v7394_v56, %v360_v59  ;;  %5580 = vmatpush3.bf16.msra.mxu0 %v7124_v31  ;;  %v6369_v56 = vunpack.i.h.bf16 %v7436_v11  ;;  %v711_v33 = vsel %vm396_vm8, %v709_v5, %v6368_v15  ;;  %v710_v59 = vsel %vm393_vm5, %v6379_v51, %v6384_v36  ;;  %v9077_v36 = vld [vmem:[#allocation5_spill] sm:$0xff] }
  0xa0   :  { %v7490_v40 = vpop.permute.xlu1 %6386  ;;  %v398_v38 = vsel %vm396_vm8, %v395_v48, %v367_v7  ;;  %5546 = vmatprep.subr.bf16.mxu1 %v7065_v20  ;;  %5582 = vmatprep.subr.bf16.mxu0 %v7160_v63 }
  0xa1   :  { %555 = vmatmul.mubr.f32.gmra.mrb[2].mxu1 %v398_v38  ;;  %v6388_v13 = vunpack.i.l.bf16 %v7490_v40  ;;  %v714_v22 = vsel %vm399_vm6, %v6369_v56, %v6374_v62  ;;  %v703_v38 = vsel %vm384_vm3, %v6915_v60, %v658_v42  ;;  %v6389_v11 = vunpack.i.h.bf16 %v7490_v40  ;;  %v9079_v40 = vld [vmem:[#allocation6_spill] sm:$0xff] }
  0xa2   :  { %v664_v17 = vpop.permute.xlu0 %663  ;;  %v716_v4 = vsel %vm402_vm7, %v714_v22, %v7458_v26 }
  0xa3   :  { %5548 = vmatpush3.bf16.msra.mxu1 %v7093_v8  ;;  %v705_v12 = vsel %vm387_vm1, %v658_v42, %v664_v17  ;;  %5584 = vmatpush3.bf16.msra.mxu0 %v7163_v0  ;;  %v704_v62 = vsel %vm384_vm3, %v6854_v39, %v6388_v13 }
  0xa4   :  { %v7502_v58 = vpop.permute.xlu1 %980  ;;  %5550 = vmatprep.subr.bf16.mxu1 %v7106_v19  ;;  %v707_v49 = vsel %vm390_vm2, %v705_v12, %v6378_v27  ;;  %5586 = vmatprep.subr.bf16.mxu0 %v7190_v25  ;;  %v712_v27 = vsel %vm396_vm8, %v710_v59, %v6369_v56 }
  0xa5   :  { %785 = vmatprep.mubr.f32.mxu1 %v707_v49 }
  0xa6   :  { %v6392_v35 = vpop.permute.xlu0 %6391 }
  0xa7   :  { %5552 = vmatpush3.bf16.msra.mxu1 %v7134_v37  ;;  %v6393_v7 = vunpack.i.l.bf16 %v6392_v35  ;;  %5588 = vmatpush3.bf16.msra.mxu0 %v7196_v29  ;;  %v6394_v15 = vunpack.i.h.bf16 %v6392_v35 }
  0xa8   :  { %5554 = vmatprep.subr.bf16.mxu1 %v7145_v47  ;;  %5590 = vmatprep.subr.bf16.mxu0 %v7187_v24  ;;  %v1002_v46 = vpop.permute.xlu1 %1001 }
  0xa9   :  { %v706_v54 = vsel %vm387_vm1, %v6388_v13, %v6393_v7  ;;  %v1016_v56 = vsel %vm387_vm1, %v6389_v11, %v6394_v15 }
  0xaa   :  { %861 = vmatmul.mubr.f32.vlgmr.msra.gmra.mrb[6].mxu0 %v711_v33  ;;  %v7522_v48 = vpop.permute.xlu0 %994  ;;  %v708_v60 = vsel %vm390_vm2, %v706_v54, %v6379_v51 }
  0xab   :  { %5556 = vmatpush3.bf16.msra.mxu1 %v7174_v10  ;;  %865 = vmatprep.mubr.f32.mxu0 %v716_v4  ;;  %v1024_v17 = vsel %vm399_vm6, %v7522_v48, %v1002_v46 }
  0xac   :  { %5592 = vmatpush3.bf16.msra.mxu0 %v7187_v24  ;;  %5630 = vmatprep.subr.bf16.mxu1 %v6892_v52  ;;  %v7540_v12 = vpop.permute.xlu1 %1008 }
  0xad   :  { %5594 = vmatprep.subr.bf16.mxu0 %v7385_v18  ;;  %v1026_v49 = vsel %vm402_vm7, %v1024_v17, %v7540_v12 }
  0xae   :  { %786 = vmatmul.mubr.f32.vlgmr.msra.gmra.mrb[4].mxu1 %v703_v38  ;;  %866 = vmatmul.mubr.f32.gmra.mrb[8].mxu0 %v712_v27  ;;  %v988_v42 = vpop.permute.xlu0 %987 }
  0xaf   :  { %790 = vmatprep.mubr.f32.mxu1 %v708_v60  ;;  %5340 = vmatprep.mubr.msk.f32.mxu0 %vm405_vm4, %v7466_v61  ;;  %v1018_v61 = vsel %vm390_vm2, %v1016_v56, %v7502_v58  ;;  %v1020_v46 = vsel %vm393_vm5, %v7502_v58, %v988_v42  ;;  %v9078_v56 = vld [vmem:[#allocation7_spill] sm:$0xff] }
  0xb0   :  { %5596 = vmatpush3.bf16.msra.mxu0 %v7385_v18  ;;  %5632 = vmatpush3.bf16.msra.mxu1 %v6905_v57  ;;  %v977_v51 = vpop.permute.xlu1 %976  ;;  %v1022_v58 = vsel %vm396_vm8, %v1020_v46, %v7522_v48 }
  0xb1   :  { %5598 = vmatprep.subr.bf16.mxu0 %v9077_v36  ;;  %5634 = vmatprep.subr.bf16.mxu1 %v6931_v1 }
  0xb2   :  { %791 = vmatmul.mubr.f32.gmra.mrb[6].mxu1 %v704_v62  ;;  %v7553_v39 = vpop.permute.xlu0 %970 }
  0xb3   :  { %5341 = vmatmul.mubr.msk.f32.vlgmr.msra.gmra.mrb[10].mxu0 %vm405_vm4, %v7458_v26  ;;  %1171 = vmatprep.mubr.f32.mxu1 %v1026_v49  ;;  %v1017_v27 = vsel %vm387_vm1, %v7553_v39, %v977_v51  ;;  %v1014_v49 = vsel %vm384_vm3, %v9078_v56, %v6389_v11  ;;  %v1015_v11 = vsel %vm384_vm3, %v9079_v40, %v7553_v39 }
  0xb4   :  { %5600 = vmatpush3.bf16.msra.mxu0 %v6839_v34  ;;  %5636 = vmatpush3.bf16.msra.mxu1 %v6934_v3  ;;  %v7567_v35 = vpop.permute.xlu1 %1010 }
  0xb5   :  { %5602 = vmatprep.subr.bf16.mxu0 %v6859_v41  ;;  %5638 = vmatprep.subr.bf16.mxu1 %v6993_v21 }
  0xb6   :  { %1096 = vmatprep.mubr.f32.mxu0 %v1018_v61  ;;  %v983_v26 = vpop.permute.xlu0 %982 }
  0xb7   :  { %v1019_v48 = vsel %vm390_vm2, %v1017_v27, %v983_v26 }
  0xb8   :  { %5604 = vmatpush3.bf16.msra.mxu0 %v6887_v50  ;;  %5640 = vmatpush3.bf16.msra.mxu1 %v6996_v23  ;;  %v1004_v13 = vpop.permute.xlu1 %1003 }
  0xb9   :  { %5606 = vmatprep.subr.bf16.mxu0 %v6900_v55  ;;  %5642 = vmatprep.subr.bf16.mxu1 %v7036_v43 }
  0xba   :  { %v997_v5 = vpop.permute.xlu0 %996 }
  0xbb   :  { %v1025_v4 = vsel %vm399_vm6, %v997_v5, %v1004_v13 }
  0xbc   :  { %5608 = vmatpush3.bf16.msra.mxu0 %v6950_v9  ;;  %5644 = vmatpush3.bf16.msra.mxu1 %v7039_v44  ;;  %v7579_v22 = vpop.permute.xlu1 %6396  ;;  %v1027_v17 = vsel %vm402_vm7, %v1025_v4, %v7567_v35 }
  0xbd   :  { %5610 = vmatprep.subr.bf16.mxu0 %v6973_v14  ;;  %5646 = vmatprep.subr.bf16.mxu1 %v7080_v45  ;;  %v6398_v59 = vunpack.i.l.bf16 %v7579_v22 }
  0xbe   :  { %v990_v7 = vpop.permute.xlu0 %989 }
  0xbf   :  { %v1021_v15 = vsel %vm393_vm5, %v983_v26, %v990_v7 }
  0xc0   :  { %5612 = vmatpush3.bf16.msra.mxu0 %v7009_v28  ;;  %5648 = vmatpush3.bf16.msra.mxu1 %v7083_v6  ;;  %v7593_v38 = vpop.permute.xlu1 %6406  ;;  %v1023_v42 = vsel %vm396_vm8, %v1021_v15, %v997_v5 }
  0xc1   :  { %5614 = vmatprep.subr.bf16.mxu0 %v7021_v32  ;;  %5650 = vmatprep.subr.bf16.mxu1 %v7121_v30  ;;  %v6408_v60 = vunpack.i.l.bf16 %v7593_v38 }
  0xc2   :  { %v7585_v33 = vpop.permute.xlu0 %6401 }
  0xc3   :  { %v6403_v54 = vunpack.i.l.bf16 %v7585_v33  ;;  %v6404_v46 = vunpack.i.h.bf16 %v7585_v33  ;;  %v9080_v33 = vld [vmem:[#allocation9_spill] sm:$0xff] }
  0xc4   :  { %5616 = vmatpush3.bf16.msra.mxu0 %v7051_v53  ;;  %5652 = vmatpush3.bf16.msra.mxu1 %v7124_v31  ;;  %v1313_v61 = vpop.permute.xlu1 %1312  ;;  %v1325_v27 = vsel %vm384_vm3, %v9080_v33, %v6398_v59 }
  0xc5   :  { %5618 = vmatprep.subr.bf16.mxu0 %v7065_v20  ;;  %5654 = vmatprep.subr.bf16.mxu1 %v7160_v63  ;;  %v1327_v62 = vsel %vm387_vm1, %v6398_v59, %v6403_v54  ;;  %v6409_v54 = vunpack.i.h.bf16 %v7593_v38 }
  0xc6   :  { %v1329_v51 = vsel %vm390_vm2, %v1327_v62, %v6408_v60  ;;  %v7625_v26 = vpop.permute.xlu0 %1305 }
  0xc7   :  { %v1335_v5 = vsel %vm399_vm6, %v7625_v26, %v1313_v61 }
  0xc8   :  { %5620 = vmatpush3.bf16.msra.mxu0 %v7093_v8  ;;  %5656 = vmatpush3.bf16.msra.mxu1 %v7163_v0  ;;  %v1320_v13 = vpop.permute.xlu1 %1319 }
  0xc9   :  { %5622 = vmatprep.subr.bf16.mxu0 %v7106_v19  ;;  %5658 = vmatprep.subr.bf16.mxu1 %v7190_v25  ;;  %v1337_v7 = vsel %vm402_vm7, %v1335_v5, %v1320_v13 }
  0xcc   :  { %5624 = vmatpush3.bf16.msra.mxu0 %v7134_v37  ;;  %5660 = vmatpush3.bf16.msra.mxu1 %v7196_v29  ;;  %v7651_v39 = vpop.permute.xlu1 %6411 }
  0xcd   :  { %5626 = vmatprep.subr.bf16.mxu0 %v7145_v47  ;;  %5670 = vmatprep.subr.bf16.mxu1 %v9077_v36 }
  0xcf   :  { %1172 = vmatmul.mubr.f32.vlgmr.msra.gmra.mrb[8].mxu1 %v1022_v58 }
  0xd0   :  { %5628 = vmatpush3.bf16.msra.mxu0 %v7174_v10  ;;  %5672 = vmatpush3.bf16.msra.mxu1 %v6839_v34  ;;  %v7663_v15 = vpop.permute.xlu1 %6421 }
  0xd1   :  { %5662 = vmatprep.subr.bf16.mxu0 %v7187_v24  ;;  %5674 = vmatprep.subr.bf16.mxu1 %v6859_v41 }
  0xd2   :  { %1176 = vmatprep.mubr.f32.mxu1 %v1027_v17 }
  0xd3   :  { %1097 = vmatmul.mubr.f32.vlgmr.msra.gmra.mrb[12].mxu0 %v1014_v49  ;;  %1177 = vmatmul.mubr.f32.gmra.mrb[10].mxu1 %v1023_v42  ;;  %v9081_v49 = vld [vmem:[#allocation8_spill] sm:$0xff] }
  0xd4   :  { %1101 = vmatprep.mubr.f32.mxu0 %v1019_v48  ;;  %5664 = vmatpush3.bf16.msra.mxu0 %v7187_v24  ;;  %v1597_v62 = vpop.permute.xlu1 %1596  ;;  %v6414_v48 = vunpack.i.h.bf16 %v7651_v39 }
  0xd5   :  { %5676 = vmatpush3.bf16.msra.mxu1 %v6887_v50  ;;  %5666 = vmatprep.subr.bf16.mxu0 %v7385_v18 }
  0xd6   :  { %5678 = vmatprep.subr.bf16.mxu1 %v6900_v55  ;;  %1407 = vmatprep.mubr.f32.mxu1 %v1329_v51  ;;  %v6413_v51 = vunpack.i.l.bf16 %v7651_v39 }
  0xd7   :  { %1102 = vmatmul.mubr.f32.gmra.mrb[14].mxu0 %v1015_v11 }
  0xd8   :  { %5668 = vmatpush3.bf16.msra.mxu0 %v7385_v18  ;;  %5351 = vmatprep.mubr.msk.f32.mxu0 %vm405_vm4, %v7540_v12  ;;  %v1299_v12 = vpop.permute.xlu0 %1298  ;;  %v7686_v40 = vpop.permute.xlu1 %1630 }
  0xd9   :  { %5680 = vmatpush3.bf16.msra.mxu1 %v6950_v9  ;;  %5702 = vmatprep.subr.bf16.mxu0 %v6892_v52 }
  0xda   :  { %5682 = vmatprep.subr.bf16.mxu1 %v6973_v14 }
  0xdb   :  { %5352 = vmatmul.mubr.msk.f32.vlgmr.msra.gmra.mrb[16].mxu0 %vm405_vm4, %v7567_v35  ;;  %v6399_v35 = vunpack.i.h.bf16 %v7579_v22 }
  0xdc   :  { %5704 = vmatpush3.bf16.msra.mxu0 %v6905_v57  ;;  %1482 = vmatprep.mubr.f32.mxu0 %v1337_v7  ;;  %v1322_v4 = vpop.permute.xlu0 %1321 }
  0xdd   :  { %5684 = vmatpush3.bf16.msra.mxu1 %v7009_v28  ;;  %5706 = vmatprep.subr.bf16.mxu0 %v6931_v1  ;;  %v1328_v58 = vsel %vm387_vm1, %v6399_v35, %v6404_v46  ;;  %v1326_v61 = vsel %vm384_vm3, %v9081_v49, %v6399_v35  ;;  %v6423_v35 = vunpack.i.l.bf16 %v7663_v15  ;;  %v1331_v46 = vsel %vm393_vm5, %v6408_v60, %v1299_v12 }
  0xde   :  { %5686 = vmatprep.subr.bf16.mxu1 %v7021_v32  ;;  %v1330_v17 = vsel %vm390_vm2, %v1328_v58, %v6409_v54  ;;  %v6424_v49 = vunpack.i.h.bf16 %v7663_v15 }
  0xdf   :  { %v1332_v60 = vsel %vm393_vm5, %v6409_v54, %v6423_v35  ;;  %v1605_v54 = vpop.permute.xlu1 %1604 }
  0xe0   :  { %5708 = vmatpush3.bf16.msra.mxu0 %v6934_v3  ;;  %v6417_v42 = vpop.permute.xlu0 %6416 }
  0xe1   :  { %5688 = vmatpush3.bf16.msra.mxu1 %v7051_v53  ;;  %5710 = vmatprep.subr.bf16.mxu0 %v6993_v21  ;;  %v6419_v56 = vunpack.i.h.bf16 %v6417_v42  ;;  %v6418_v22 = vunpack.i.l.bf16 %v6417_v42 }
  0xe2   :  { %5690 = vmatprep.subr.bf16.mxu1 %v7065_v20 }
  0xe3   :  { %v1646_v11 = vsel %vm399_vm6, %v6414_v48, %v6419_v56  ;;  %v1336_v5 = vsel %vm399_vm6, %v6413_v51, %v6418_v22  ;;  %v1619_v42 = vpop.permute.xlu1 %1618 }
  0xe4   :  { %5712 = vmatpush3.bf16.msra.mxu0 %v6996_v23  ;;  %v7680_v59 = vpop.permute.xlu0 %6426  ;;  %v1648_v58 = vsel %vm402_vm7, %v1646_v11, %v7686_v40  ;;  %v1338_v33 = vsel %vm402_vm7, %v1336_v5, %v1322_v4 }
  0xe5   :  { %5692 = vmatpush3.bf16.msra.mxu1 %v7093_v8  ;;  %5714 = vmatprep.subr.bf16.mxu0 %v7036_v43  ;;  %v6428_v7 = vunpack.i.l.bf16 %v7680_v59 }
  0xe6   :  { %5694 = vmatprep.subr.bf16.mxu1 %v7106_v19 }
  0xe7   :  { %v1638_v38 = vsel %vm387_vm1, %v6428_v7, %v1597_v62  ;;  %v1612_v56 = vpop.permute.xlu1 %1611 }
  0xe8   :  { %5716 = vmatpush3.bf16.msra.mxu0 %v7039_v44 }
  0xe9   :  { %5696 = vmatpush3.bf16.msra.mxu1 %v7134_v37  ;;  %5718 = vmatprep.subr.bf16.mxu0 %v7080_v45 }
  0xea   :  { %5698 = vmatprep.subr.bf16.mxu1 %v7145_v47 }
  0xec   :  { %5720 = vmatpush3.bf16.msra.mxu0 %v7083_v6 }
  0xed   :  { %5700 = vmatpush3.bf16.msra.mxu1 %v7174_v10  ;;  %5722 = vmatprep.subr.bf16.mxu0 %v7121_v30 }
  0xee   :  { %5734 = vmatprep.subr.bf16.mxu1 %v7187_v24 }
  0xf0   :  { %1408 = vmatmul.mubr.f32.vlgmr.msra.gmra.mrb[12].mxu1 %v1325_v27  ;;  %5724 = vmatpush3.bf16.msra.mxu0 %v7124_v31  ;;  %v1333_v27 = vsel %vm396_vm8, %v1331_v46, %v7625_v26  ;;  %v1334_v26 = vsel %vm396_vm8, %v1332_v60, %v6413_v51  ;;  %v6429_v51 = vunpack.i.h.bf16 %v7680_v59 }
  0xf1   :  { %5736 = vmatpush3.bf16.msra.mxu1 %v7187_v24  ;;  %1412 = vmatprep.mubr.f32.mxu1 %v1330_v17 }
  0xf2   :  { %5726 = vmatprep.subr.bf16.mxu0 %v7160_v63  ;;  %5738 = vmatprep.subr.bf16.mxu1 %v7385_v18 }
  0xf4   :  { %1413 = vmatmul.mubr.f32.gmra.mrb[14].mxu1 %v1326_v61  ;;  %5728 = vmatpush3.bf16.msra.mxu0 %v7163_v0  ;;  %v7746_v61 = vpop.permute.xlu1 %6436 }
  0xf5   :  { %5740 = vmatpush3.bf16.msra.mxu1 %v7385_v18  ;;  %5730 = vmatprep.subr.bf16.mxu0 %v7190_v25  ;;  %v6438_v46 = vunpack.i.l.bf16 %v7746_v61 }
  0xf6   :  { %5362 = vmatprep.mubr.msk.f32.mxu1 %vm405_vm4, %v1320_v13  ;;  %5774 = vmatprep.subr.bf16.mxu1 %v6892_v52  ;;  %v1603_v13 = vpop.permute.xlu0 %1602 }
  0xf7   :  { %v1640_v12 = vsel %vm390_vm2, %v1638_v38, %v1603_v13  ;;  %v1642_v11 = vsel %vm393_vm5, %v1603_v13, %v6424_v49 }
  0xf8   :  { %5732 = vmatpush3.bf16.msra.mxu0 %v7196_v29  ;;  %5363 = vmatmul.mubr.msk.f32.vlgmr.msra.gmra.mrb[16].mxu1 %vm405_vm4, %v1322_v4  ;;  %v7786_v59 = vpop.permute.xlu1 %1927 }
  0xf9   :  { %5776 = vmatpush3.bf16.msra.mxu1 %v6905_v57  ;;  %5742 = vmatprep.subr.bf16.mxu0 %v9077_v36 }
  0xfa   :  { %5778 = vmatprep.subr.bf16.mxu1 %v6931_v1  ;;  %1793 = vmatprep.mubr.f32.mxu1 %v1648_v58  ;;  %v1599_v4 = vpop.permute.xlu0 %1598  ;;  %v1644_v58 = vsel %vm396_vm8, %v1642_v11, %v6414_v48  ;;  %v9082_v48 = vld [vmem:[#allocation12_spill] sm:$0xff]  ;;  %v6439_v11 = vunpack.i.h.bf16 %v7746_v61  ;;  %v9084_v61 = vld [vmem:[#allocation13_spill] sm:$0xff] }
  0xfb   :  { %1483 = vmatmul.mubr.f32.vlgmr.msra.gmra.mrb[18].mxu0 %v1333_v27  ;;  %v1643_v27 = vsel %vm393_vm5, %v1605_v54, %v1612_v56  ;;  %v1636_v60 = vsel %vm384_vm3, %v9082_v48, %v6428_v7  ;;  %v9083_v7 = vld [vmem:[#allocation10_spill] sm:$0xff] }
  0xfc   :  { %5744 = vmatpush3.bf16.msra.mxu0 %v6839_v34  ;;  %1487 = vmatprep.mubr.f32.mxu0 %v1338_v33  ;;  %v1639_v33 = vsel %vm387_vm1, %v6429_v51, %v1599_v4  ;;  %v1645_v4 = vsel %vm396_vm8, %v1643_v27, %v1619_v42  ;;  %v1637_v56 = vsel %vm384_vm3, %v9083_v7, %v6429_v51 }
  0xfd   :  { %5780 = vmatpush3.bf16.msra.mxu1 %v6934_v3  ;;  %5746 = vmatprep.subr.bf16.mxu0 %v6859_v41 }
  0xfe   :  { %5782 = vmatprep.subr.bf16.mxu1 %v6993_v21  ;;  %v7726_v17 = vpop.permute.xlu0 %1632 }
  0xff   :  { %1488 = vmatmul.mubr.f32.gmra.mrb[20].mxu0 %v1334_v26  ;;  %v1641_v26 = vsel %vm390_vm2, %v1639_v33, %v1605_v54 }
 0x100   :  { %5748 = vmatpush3.bf16.msra.mxu0 %v6887_v50  ;;  %1718 = vmatprep.mubr.f32.mxu0 %v1640_v12 }
 0x101   :  { %5784 = vmatpush3.bf16.msra.mxu1 %v6996_v23  ;;  %5750 = vmatprep.subr.bf16.mxu0 %v6900_v55 }
 0x102   :  { %5786 = vmatprep.subr.bf16.mxu1 %v7036_v43  ;;  %v1626_v62 = vpop.permute.xlu0 %1625 }
 0x103   :  { %v1647_v5 = vsel %vm399_vm6, %v1619_v42, %v1626_v62 }
 0x104   :  { %5752 = vmatpush3.bf16.msra.mxu0 %v6950_v9  ;;  %v1649_v13 = vsel %vm402_vm7, %v1647_v5, %v7726_v17 }
 0x105   :  { %5788 = vmatpush3.bf16.msra.mxu1 %v7039_v44  ;;  %5754 = vmatprep.subr.bf16.mxu0 %v6973_v14 }
 0x106   :  { %5790 = vmatprep.subr.bf16.mxu1 %v7080_v45  ;;  %v7739_v22 = vpop.permute.xlu0 %6431 }
 0x107   :  { %v6433_v15 = vunpack.i.l.bf16 %v7739_v22  ;;  %v6434_v51 = vunpack.i.h.bf16 %v7739_v22 }
 0x108   :  { %5756 = vmatpush3.bf16.msra.mxu0 %v7009_v28 }
 0x109   :  { %5792 = vmatpush3.bf16.msra.mxu1 %v7083_v6  ;;  %5758 = vmatprep.subr.bf16.mxu0 %v7021_v32  ;;  %v1949_v39 = vsel %vm387_vm1, %v6433_v15, %v6438_v46  ;;  %v1947_v33 = vsel %vm384_vm3, %v9084_v61, %v6433_v15 }
 0x10a   :  { %5794 = vmatprep.subr.bf16.mxu1 %v7121_v30  ;;  %v7752_v35 = vpop.permute.xlu0 %6441 }
 0x10b   :  { %v6443_v38 = vunpack.i.l.bf16 %v7752_v35  ;;  %v6444_v46 = vunpack.i.h.bf16 %v7752_v35 }
 0x10c   :  { %5760 = vmatpush3.bf16.msra.mxu0 %v7051_v53 }
 0x10d   :  { %5796 = vmatpush3.bf16.msra.mxu1 %v7124_v31  ;;  %5762 = vmatprep.subr.bf16.mxu0 %v7065_v20  ;;  %v1951_v62 = vsel %vm390_vm2, %v1949_v39, %v6443_v38 }
 0x10e   :  { %5798 = vmatprep.subr.bf16.mxu1 %v7160_v63  ;;  %v1935_v12 = vpop.permute.xlu0 %1934 }
 0x10f   :  { %v1957_v54 = vsel %vm399_vm6, %v7786_v59, %v1935_v12 }
 0x110   :  { %5764 = vmatpush3.bf16.msra.mxu0 %v7093_v8 }
 0x111   :  { %5800 = vmatpush3.bf16.msra.mxu1 %v7163_v0  ;;  %5766 = vmatprep.subr.bf16.mxu0 %v7106_v19 }
 0x112   :  { %5802 = vmatprep.subr.bf16.mxu1 %v7190_v25  ;;  %v1942_v42 = vpop.permute.xlu0 %1941 }
 0x113   :  { %v1959_v49 = vsel %vm402_vm7, %v1957_v54, %v1942_v42 }
 0x114   :  { %5768 = vmatpush3.bf16.msra.mxu0 %v7134_v37 }
 0x115   :  { %5804 = vmatpush3.bf16.msra.mxu1 %v7196_v29  ;;  %5770 = vmatprep.subr.bf16.mxu0 %v7145_v47 }
 0x116   :  { %5814 = vmatprep.subr.bf16.mxu1 %v9077_v36 }
 0x118   :  { %1794 = vmatmul.mubr.f32.vlgmr.msra.gmra.mrb[18].mxu1 %v1644_v58  ;;  %5772 = vmatpush3.bf16.msra.mxu0 %v7174_v10 }
 0x119   :  { %5816 = vmatpush3.bf16.msra.mxu1 %v6839_v34  ;;  %5806 = vmatprep.subr.bf16.mxu0 %v7187_v24 }
 0x11a   :  { %5818 = vmatprep.subr.bf16.mxu1 %v6859_v41  ;;  %1798 = vmatprep.mubr.f32.mxu1 %v1649_v13  ;;  %v1950_v13 = vsel %vm387_vm1, %v6434_v51, %v6439_v11 }
 0x11b   :  { %1719 = vmatmul.mubr.f32.vlgmr.msra.gmra.mrb[22].mxu0 %v1636_v60  ;;  %v1952_v27 = vsel %vm390_vm2, %v1950_v13, %v6444_v46 }
 0x11c   :  { %1723 = vmatprep.mubr.f32.mxu0 %v1641_v26  ;;  %5808 = vmatpush3.bf16.msra.mxu0 %v7187_v24  ;;  %v9085_v26 = vld [vmem:[#allocation11_spill] sm:$0xff] }
 0x11d   :  { %5820 = vmatpush3.bf16.msra.mxu1 %v6887_v50  ;;  %5810 = vmatprep.subr.bf16.mxu0 %v7385_v18 }
 0x11e   :  { %1799 = vmatmul.mubr.f32.gmra.mrb[20].mxu1 %v1645_v4  ;;  %5822 = vmatprep.subr.bf16.mxu1 %v6900_v55  ;;  %v1948_v4 = vsel %vm384_vm3, %v9085_v26, %v6434_v51 }
 0x11f   :  { %1724 = vmatmul.mubr.f32.gmra.mrb[24].mxu0 %v1637_v56  ;;  %2029 = vmatprep.mubr.f32.mxu1 %v1951_v62 }
 0x120   :  { %5812 = vmatpush3.bf16.msra.mxu0 %v7385_v18  ;;  %5373 = vmatprep.mubr.msk.f32.mxu0 %vm405_vm4, %v7686_v40  ;;  %v1921_v40 = vpop.permute.xlu1 %1920 }
 0x121   :  { %5824 = vmatpush3.bf16.msra.mxu1 %v6950_v9  ;;  %5846 = vmatprep.subr.bf16.mxu0 %v6892_v52  ;;  %v1953_v11 = vsel %vm393_vm5, %v6443_v38, %v1921_v40 }
 0x122   :  { %5826 = vmatprep.subr.bf16.mxu1 %v6973_v14  ;;  %v1955_v35 = vsel %vm396_vm8, %v1953_v11, %v7786_v59 }
 0x123   :  { %5374 = vmatmul.mubr.msk.f32.vlgmr.msra.gmra.mrb[26].mxu0 %vm405_vm4, %v7726_v17  ;;  %v7811_v17 = vpop.permute.xlu0 %6446 }
 0x124   :  { %5848 = vmatpush3.bf16.msra.mxu0 %v6905_v57  ;;  %2104 = vmatprep.mubr.f32.mxu0 %v1959_v49  ;;  %v1944_v5 = vpop.permute.xlu1 %1943  ;;  %v6449_v60 = vunpack.i.h.bf16 %v7811_v17  ;;  %v6448_v62 = vunpack.i.l.bf16 %v7811_v17  ;;  %v166_v17 = vld [vmem:[%s9042_s3 + $0x100] sm:$0xff] }
 0x125   :  { %5828 = vmatpush3.bf16.msra.mxu1 %v7009_v28  ;;  %5850 = vmatprep.subr.bf16.mxu0 %v6931_v1 }
 0x126   :  { %5830 = vmatprep.subr.bf16.mxu1 %v7021_v32 }
 0x127   :  { %v7823_v58 = vpop.permute.xlu0 %6456 }
 0x128   :  { %5852 = vmatpush3.bf16.msra.mxu0 %v6934_v3  ;;  %v6452_v39 = vpop.permute.xlu1 %6451  ;;  %v6458_v13 = vunpack.i.l.bf16 %v7823_v58 }
 0x129   :  { %5832 = vmatpush3.bf16.msra.mxu1 %v7051_v53  ;;  %5854 = vmatprep.subr.bf16.mxu0 %v6993_v21  ;;  %v6454_v12 = vunpack.i.h.bf16 %v6452_v39  ;;  %v6453_v22 = vunpack.i.l.bf16 %v6452_v39  ;;  %v168_v39 = vld [vmem:[%s9042_s3 + $0x110] sm:$0xff] }
 0x12a   :  { %5834 = vmatprep.subr.bf16.mxu1 %v7065_v20  ;;  %v1954_v40 = vsel %vm393_vm5, %v6444_v46, %v6458_v13 }
 0x12b   :  { %v7835_v48 = vpop.permute.xlu0 %6466  ;;  %v2268_v56 = vsel %vm399_vm6, %v6449_v60, %v6454_v12  ;;  %v1958_v54 = vsel %vm399_vm6, %v6448_v62, %v6453_v22 }
 0x12c   :  { %5856 = vmatpush3.bf16.msra.mxu0 %v6996_v23  ;;  %v7842_v15 = vpop.permute.xlu1 %6461  ;;  %v6468_v51 = vunpack.i.l.bf16 %v7835_v48 }
 0x12d   :  { %5836 = vmatpush3.bf16.msra.mxu1 %v7093_v8  ;;  %5858 = vmatprep.subr.bf16.mxu0 %v7036_v43  ;;  %v6463_v49 = vunpack.i.l.bf16 %v7842_v15 }
 0x12e   :  { %5838 = vmatprep.subr.bf16.mxu1 %v7106_v19 }
 0x12f   :  { %v7848_v7 = vpop.permute.xlu0 %2252  ;;  %v2260_v38 = vsel %vm387_vm1, %v6463_v49, %v6468_v51 }
 0x130   :  { %5860 = vmatpush3.bf16.msra.mxu0 %v7039_v44  ;;  %v2270_v61 = vsel %vm402_vm7, %v2268_v56, %v7848_v7 }
 0x131   :  { %5840 = vmatpush3.bf16.msra.mxu1 %v7134_v37  ;;  %5862 = vmatprep.subr.bf16.mxu0 %v7080_v45 }
 0x132   :  { %5842 = vmatprep.subr.bf16.mxu1 %v7145_v47 }
 0x134   :  { %5864 = vmatpush3.bf16.msra.mxu0 %v7083_v6 }
 0x135   :  { %5844 = vmatpush3.bf16.msra.mxu1 %v7174_v10  ;;  %5866 = vmatprep.subr.bf16.mxu0 %v7121_v30 }
 0x136   :  { %5878 = vmatprep.subr.bf16.mxu1 %v7187_v24 }
 0x138   :  { %2030 = vmatmul.mubr.f32.vlgmr.msra.gmra.mrb[22].mxu1 %v1947_v33  ;;  %5868 = vmatpush3.bf16.msra.mxu0 %v7124_v31 }
 0x139   :  { %5880 = vmatpush3.bf16.msra.mxu1 %v7187_v24  ;;  %2034 = vmatprep.mubr.f32.mxu1 %v1952_v27 }
 0x13a   :  { %5870 = vmatprep.subr.bf16.mxu0 %v7160_v63  ;;  %5882 = vmatprep.subr.bf16.mxu1 %v7385_v18 }
 0x13c   :  { %2035 = vmatmul.mubr.f32.gmra.mrb[24].mxu1 %v1948_v4  ;;  %5872 = vmatpush3.bf16.msra.mxu0 %v7163_v0 }
 0x13d   :  { %5884 = vmatpush3.bf16.msra.mxu1 %v7385_v18  ;;  %5874 = vmatprep.subr.bf16.mxu0 %v7190_v25 }
 0x13e   :  { %5384 = vmatprep.mubr.msk.f32.mxu1 %vm405_vm4, %v1942_v42  ;;  %5918 = vmatprep.subr.bf16.mxu1 %v6892_v52  ;;  %v7868_v52 = vpop.permute.xlu1 %6471  ;;  %v1960_v42 = vsel %vm402_vm7, %v1958_v54, %v1944_v5 }
 0x13f   :  { %v6473_v33 = vunpack.i.l.bf16 %v7868_v52 }
 0x140   :  { %5876 = vmatpush3.bf16.msra.mxu0 %v7196_v29  ;;  %5385 = vmatmul.mubr.msk.f32.vlgmr.msra.gmra.mrb[26].mxu1 %vm405_vm4, %v1944_v5  ;;  %v167_v5 = vld [vmem:[%s9042_s3 + $0x108] sm:$0xff] }
 0x141   :  { %5920 = vmatpush3.bf16.msra.mxu1 %v6905_v57  ;;  %5886 = vmatprep.subr.bf16.mxu0 %v9077_v36  ;;  %v2262_v57 = vsel %vm390_vm2, %v2260_v38, %v6473_v33 }
 0x142   :  { %5922 = vmatprep.subr.bf16.mxu1 %v6931_v1  ;;  %2415 = vmatprep.mubr.f32.mxu1 %v2270_v61  ;;  %v1956_v1 = vsel %vm396_vm8, %v1954_v40, %v6448_v62 }
 0x143   :  { %2105 = vmatmul.mubr.f32.vlgmr.msra.gmra.mrb[28].mxu0 %v1955_v35 }
 0x144   :  { %5888 = vmatpush3.bf16.msra.mxu0 %v6839_v34  ;;  %2109 = vmatprep.mubr.f32.mxu0 %v1960_v42  ;;  %v2241_v34 = vpop.permute.xlu1 %2240 }
 0x145   :  { %5924 = vmatpush3.bf16.msra.mxu1 %v6934_v3  ;;  %5890 = vmatprep.subr.bf16.mxu0 %v6859_v41 }
 0x146   :  { %5926 = vmatprep.subr.bf16.mxu1 %v6993_v21 }
 0x147   :  { %2110 = vmatmul.mubr.f32.gmra.mrb[30].mxu0 %v1956_v1 }
 0x148   :  { %5892 = vmatpush3.bf16.msra.mxu0 %v6887_v50  ;;  %2340 = vmatprep.mubr.f32.mxu0 %v2262_v57  ;;  %v2248_v50 = vpop.permute.xlu0 %2247 }
 0x149   :  { %5928 = vmatpush3.bf16.msra.mxu1 %v6996_v23  ;;  %5894 = vmatprep.subr.bf16.mxu0 %v6900_v55  ;;  %v2269_v23 = vsel %vm399_vm6, %v2241_v34, %v2248_v50 }
 0x14a   :  { %5930 = vmatprep.subr.bf16.mxu1 %v7036_v43 }
 0x14c   :  { %5896 = vmatpush3.bf16.msra.mxu0 %v6950_v9  ;;  %v6459_v9 = vunpack.i.h.bf16 %v7823_v58  ;;  %v2255_v43 = vpop.permute.xlu0 %2254  ;;  %v7946_v58 = vpack.c.bf16 %v167_v5, %v166_v17  ;;  %v137_v17 = vld [vmem:[%s9042_s3 + $0x18] sm:$0xff] }
 0x14d   :  { %5932 = vmatpush3.bf16.msra.mxu1 %v7039_v44  ;;  %5898 = vmatprep.subr.bf16.mxu0 %v6973_v14  ;;  %v6464_v44 = vunpack.i.h.bf16 %v7842_v15 }
 0x14e   :  { %5934 = vmatprep.subr.bf16.mxu1 %v7080_v45  ;;  %v2264_v45 = vsel %vm393_vm5, %v6473_v33, %v6459_v9 }
 0x150   :  { %5900 = vmatpush3.bf16.msra.mxu0 %v7009_v28 }
 0x151   :  { %5936 = vmatpush3.bf16.msra.mxu1 %v7083_v6  ;;  %5902 = vmatprep.subr.bf16.mxu0 %v7021_v32  ;;  %v2234_v32 = vpop.permute.xlu1 %2233 }
 0x152   :  { %5938 = vmatprep.subr.bf16.mxu1 %v7121_v30  ;;  %v2271_v30 = vsel %vm402_vm7, %v2269_v23, %v2255_v43 }
 0x154   :  { %5904 = vmatpush3.bf16.msra.mxu0 %v7051_v53  ;;  %v6474_v53 = vunpack.i.h.bf16 %v7868_v52 }
 0x155   :  { %5940 = vmatpush3.bf16.msra.mxu1 %v7124_v31  ;;  %v4349_v41 = vpop.f32.mrb[0].mxu0  ;;  %5906 = vmatprep.subr.bf16.mxu0 %v7065_v20  ;;  %v6469_v20 = vunpack.i.h.bf16 %v7835_v48  ;;  %v2266_v31 = vsel %vm396_vm8, %v2264_v45, %v6449_v60  ;;  %v169_v48 = vld [vmem:[%s9042_s3 + $0x118] sm:$0xff] }
 0x156   :  { %5942 = vmatprep.subr.bf16.mxu1 %v7160_v63  ;;  %v4350_v55 = vpop.f32.mrb[1].mxu0 }
 0x157   :  { %v4351_v3 = vadd.f32 %v4350_v55, %v4349_v41  ;;  %v2261_v63 = vsel %vm387_vm1, %v6464_v44, %v6469_v20 }
 0x158   :  { %5908 = vmatpush3.bf16.msra.mxu0 %v7093_v8  ;;  %v2265_v8 = vsel %vm393_vm5, %v6474_v53, %v2234_v32 }
 0x159   :  { %5944 = vmatpush3.bf16.msra.mxu1 %v7163_v0  ;;  %v4352_v14 = vpop.f32.mrb[2].mxu0  ;;  %5910 = vmatprep.subr.bf16.mxu0 %v7106_v19  ;;  %v2267_v0 = vsel %vm396_vm8, %v2265_v8, %v2241_v34 }
 0x15a   :  { %5946 = vmatprep.subr.bf16.mxu1 %v7190_v25  ;;  %v4353_v21 = vpop.f32.mrb[3].mxu0  ;;  %v2258_v25 = vsel %vm384_vm3, %v7348_v2, %v6463_v49  ;;  %v2259_v2 = vsel %vm384_vm3, %v7329_v16, %v6464_v44 }
 0x15b   :  { %v4354_v28 = vadd.f32 %v4353_v21, %v4352_v14 }
 0x15c   :  { %5912 = vmatpush3.bf16.msra.mxu0 %v7134_v37  ;;  %v7924_v37 = vld [vmem:[%s9041_s2] ss:$0 sm:$0xff] }
 0x15d   :  { %5948 = vmatpush3.bf16.msra.mxu1 %v7196_v29  ;;  %v5331_v6 = vpop.f32.mrb[4].mxu0  ;;  %5914 = vmatprep.subr.bf16.mxu0 %v7145_v47  ;;  %v477_v36 = vadd.f32 %v4351_v3, %v7924_v37  ;;  %v482_v12 = vadd.f32 %v4354_v28, %v7924_v37 }
 0x15e   :  { %v626_v19 = vpop.f32.mrb[5].mxu0 }
 0x160   :  { %2416 = vmatmul.mubr.f32.vlgmr.msra.gmra.mrb[28].mxu1 %v2266_v31  ;;  %5916 = vmatpush3.bf16.msra.mxu0 %v7174_v10  ;;  %v2263_v10 = vsel %vm390_vm2, %v2261_v63, %v6474_v53  ;;  %v134_v31 = vld [vmem:[%s9042_s3] sm:$0xff] }
 0x161   :  { %2420 = vmatprep.mubr.f32.mxu1 %v2271_v30  ;;  %v4387_v47 = vpop.f32.mrb[0].mxu1  ;;  %5950 = vmatprep.subr.bf16.mxu0 %v7187_v24  ;;  %v151_v30 = vld [vmem:[%s9042_s3 + $0x88] sm:$0xff] }
 0x162   :  { %v4388_v29 = vpop.f32.mrb[1].mxu1 }
 0x163   :  { %2341 = vmatmul.mubr.f32.vlgmr.msra.gmra.mrb[32].mxu0 %v2258_v25  ;;  %v4389_v59 = vadd.f32 %v4388_v29, %v4387_v47  ;;  %v152_v29 = vld [vmem:[%s9042_s3 + $0x90] sm:$0xff] }
 0x164   :  { %2421 = vmatmul.mubr.f32.gmra.mrb[30].mxu1 %v2267_v0  ;;  %2345 = vmatprep.mubr.f32.mxu0 %v2263_v10  ;;  %v135_v0 = vld [vmem:[%s9042_s3 + $0x8] sm:$0xff]  ;;  %v136_v10 = vld [vmem:[%s9042_s3 + $0x10] sm:$0xff] }
 0x165   :  { %v552_v46 = vadd.f32 %v4389_v59, %v477_v36  ;;  %5952 = vmatpush3.bf16.msra.mxu0 %v7187_v24  ;;  %v7958_v24 = vpack.c.bf16 %v169_v48, %v168_v39  ;;  %v8016_v25 = vpack.c.bf16 %v135_v0, %v134_v31  ;;  %v153_v36 = vld [vmem:[%s9042_s3 + $0x98] sm:$0xff]  ;;  %v8036_v5 = vpack.c.bf16 %v137_v17, %v136_v10  ;;  %v138_v39 = vld [vmem:[%s9042_s3 + $0x20] sm:$0xff]  ;;  %v139_v48 = vld [vmem:[%s9042_s3 + $0x28] sm:$0xff] }
 0x166   :  { %5954 = vmatprep.subr.bf16.mxu0 %v7385_v18  ;;  %v8028_v59 = vpack.c.bf16 %v153_v36, %v152_v29  ;;  %v146_v0 = vld [vmem:[%s9042_s3 + $0x60] sm:$0xff]  ;;  %v147_v29 = vld [vmem:[%s9042_s3 + $0x68] sm:$0xff] }
 0x167   :  { %v627_v27 = vadd.f32 %v626_v19, %v552_v46  ;;  %2346 = vmatmul.mubr.f32.gmra.mrb[34].mxu0 %v2259_v2  ;;  %v150_v19 = vld [vmem:[%s9042_s3 + $0x80] sm:$0xff]  ;;  %v155_v2 = vld [vmem:[%s9042_s3 + $0xa8] sm:$0xff]  ;;  %v8128_v36 = vpack.c.bf16 %v147_v29, %v146_v0 }
 0x168   :  { %5395 = vmatprep.mubr.msk.f32.mxu0 %vm405_vm4, %v7848_v7  ;;  %v8011_v47 = vpack.c.bf16 %v151_v30, %v150_v19  ;;  %v154_v46 = vld [vmem:[%s9042_s3 + $0xa0] sm:$0xff] }
 0x169   :  { %5956 = vmatpush3.bf16.msra.mxu0 %v7385_v18  ;;  %v635_v26 = vmax.f32 %v627_v27, 0.0  ;;  %v8046_v27 = vpack.c.bf16 %v155_v2, %v154_v46  ;;  %v164_v2 = vld [vmem:[%s9042_s3 + $0xf0] sm:$0xff] }
 0x16a   :  { %5990 = vmatprep.subr.bf16.mxu0 %v7946_v58  ;;  %5958 = vmatprep.subr.bf16.mxu1 %v8011_v47 }
 0x16b   :  { %v2513_v7 = vrot.slane %v635_v26, 1  ;;  %v2506_v51 = vrot.slane %v635_v26, 2  ;;  %5960 = vmatpush3.bf16.msra.mxu1 %v8016_v25 }
 0x16c   :  { %5396 = vmatmul.mubr.msk.f32.vlgmr.msra.gmra.mrb[36].mxu0 %vm405_vm4, %v2255_v43  ;;  %5962 = vmatprep.subr.bf16.mxu1 %v8028_v59 }
 0x16d   :  { %5992 = vmatpush3.bf16.msra.mxu0 %v7946_v58 }
 0x16e   :  { %5994 = vmatprep.subr.bf16.mxu0 %v7958_v24 }
 0x16f   :  { %5964 = vmatpush3.bf16.msra.mxu1 %v8036_v5 }
 0x170   :  { %5966 = vmatprep.subr.bf16.mxu1 %v8046_v27 }
 0x171   :  { %5996 = vmatpush3.bf16.msra.mxu0 %v7958_v24 }
 0x172   :  { %5998 = vmatprep.subr.bf16.mxu0 %v8011_v47 }
 0x174   :  { %v4390_v16 = vpop.f32.mrb[2].mxu1 }
 0x175   :  { %v4391_v60 = vpop.f32.mrb[3].mxu1 }
 0x176   :  { %v4392_v22 = vadd.f32 %v4391_v60, %v4390_v16  ;;  %v8054_v16 = vpack.c.bf16 %v139_v48, %v138_v39  ;;  %v156_v60 = vld [vmem:[%s9042_s3 + $0xb0] sm:$0xff]  ;;  %v165_v39 = vld [vmem:[%s9042_s3 + $0xf8] sm:$0xff] }
 0x178   :  { %v557_v15 = vadd.f32 %v4392_v22, %v482_v12  ;;  %5968 = vmatpush3.bf16.msra.mxu1 %v8054_v16  ;;  %v157_v12 = vld [vmem:[%s9042_s3 + $0xb8] sm:$0xff] }
 0x179   :  { %v8064_v22 = vpack.c.bf16 %v157_v12, %v156_v60  ;;  %v8138_v12 = vpack.c.bf16 %v165_v39, %v164_v2 }
 0x17a   :  { %v632_v18 = vadd.f32 %v5331_v6, %v557_v15  ;;  %v140_v15 = vld [vmem:[%s9042_s3 + $0x30] sm:$0xff] }
 0x17b   :  { %5970 = vmatprep.subr.bf16.mxu1 %v8064_v22 }
 0x17c   :  { %v7965_v4 = vmax.f32 %v632_v18, 0.0 }
 0x17d   :  { %v4469_v62 = vpop.f32.mrb[6].mxu0 }
 0x17e   :  { %v9060_v56 = vrot.slane %v7965_v4, 2  ;;  %v4470_v54 = vpop.f32.mrb[7].mxu0  ;;  %v2515_v49 = vrot.slane %v7965_v4, 3  ;;  %v2519_v11 = vrot.slane %v7965_v4, 4 }
 0x17f   :  { %v4471_v13 = vadd.f32 %v4470_v54, %v4469_v62  ;;  %v158_v54 = vld [vmem:[%s9042_s3 + $0xc0] sm:$0xff] }
 0x180   :  { %v2517_v61 = vsel %vm2511_vm9, %v2513_v7, %v2515_v49  ;;  %v7974_v52 = vsel %vm2511_vm9, %v2506_v51, %v2519_v11  ;;  %v2508_v42 = vsel %vm2505_vm10, %v2506_v51, %v9060_v56 }
 0x181   :  { %v4431_v35 = vpop.f32.mrb[4].mxu1  ;;  %v4472_v38 = vpop.f32.mrb[8].mxu0  ;;  %v7980_v40 = vsel %vm2511_vm9, %v635_v26, %v2508_v42  ;;  %v141_v26 = vld [vmem:[%s9042_s3 + $0x38] sm:$0xff]  ;;  %v143_v42 = vld [vmem:[%s9042_s3 + $0x48] sm:$0xff] }
 0x182   :  { %v4432_v33 = vpop.f32.mrb[5].mxu1  ;;  %v4473_v57 = vpop.f32.mrb[9].mxu0  ;;  %v8072_v18 = vpack.c.bf16 %v141_v26, %v140_v15  ;;  %v148_v15 = vld [vmem:[%s9042_s3 + $0x70] sm:$0xff]  ;;  %v149_v26 = vld [vmem:[%s9042_s3 + $0x78] sm:$0xff] }
 0x183   :  { %v4433_v1 = vadd.f32 %v4432_v33, %v4431_v35  ;;  %v4474_v34 = vadd.f32 %v4473_v57, %v4472_v38  ;;  %v160_v35 = vld [vmem:[%s9042_s3 + $0xd0] sm:$0xff]  ;;  %v161_v33 = vld [vmem:[%s9042_s3 + $0xd8] sm:$0xff] }
 0x184   :  { %5972 = vmatpush3.bf16.msra.mxu1 %v8072_v18 }
 0x185   :  { %v788_v41 = vadd.f32 %v4433_v1, %v7924_v37  ;;  %v4434_v50 = vpop.f32.mrb[6].mxu1 }
 0x186   :  { %v5342_v55 = vpop.f32.mrb[10].mxu0  ;;  %v4435_v3 = vpop.f32.mrb[7].mxu1 }
 0x187   :  { %v4436_v9 = vadd.f32 %v4435_v3, %v4434_v50  ;;  %v863_v14 = vadd.f32 %v4471_v13, %v788_v41  ;;  %v937_v21 = vpop.f32.mrb[11].mxu0 }
 0x189   :  { %v793_v23 = vadd.f32 %v4436_v9, %v7924_v37  ;;  %v938_v28 = vadd.f32 %v937_v21, %v863_v14  ;;  %v144_v9 = vld [vmem:[%s9042_s3 + $0x50] sm:$0xff]  ;;  %v145_v14 = vld [vmem:[%s9042_s3 + $0x58] sm:$0xff] }
 0x18a   :  { %v8109_v21 = vpack.c.bf16 %v145_v14, %v144_v9 }
 0x18b   :  { %v868_v32 = vadd.f32 %v4474_v34, %v793_v23  ;;  %v7984_v44 = vmax.f32 %v938_v28, 0.0  ;;  %v8099_v34 = vpack.c.bf16 %v161_v33, %v160_v35 }
 0x18d   :  { %v943_v43 = vadd.f32 %v5342_v55, %v868_v32  ;;  %v2524_v20 = vrot.slane %v7984_v44, 2  ;;  %v162_v32 = vld [vmem:[%s9042_s3 + $0xe0] sm:$0xff] }
 0x18f   :  { %v7986_v53 = vmax.f32 %v943_v43, 0.0  ;;  %v163_v43 = vld [vmem:[%s9042_s3 + $0xe8] sm:$0xff] }
 0x190   :  { %v8119_v30 = vpack.c.bf16 %v163_v43, %v162_v32  ;;  %v2530_v43 = vrot.slane %v7984_v44, 1 }
 0x191   :  { %v7990_v45 = vrot.slane %v7986_v53, 4 }
 0x193   :  { %v7996_v6 = vsel %vm2511_vm9, %v2524_v20, %v7990_v45  ;;  %v7999_v8 = vpack.i.bf16 %v2515_v49, %v7990_v45  ;;  %v159_v49 = vld [vmem:[%s9042_s3 + $0xc8] sm:$0xff] }
 0x194   :  { %v6475_v63 = vpack.i.bf16 %v2517_v61, %v7996_v6  ;;  %v8082_v13 = vpack.c.bf16 %v159_v49, %v158_v54  ;;  %v142_v61 = vld [vmem:[%s9042_s3 + $0x40] sm:$0xff]  ;;  %s6697_s3 = smov 96  }
 0x195   :  { %v8093_v38 = vpack.c.bf16 %v143_v42, %v142_v61 }
 0x196   :  { %6476 = vrot.lane.b32.xlu1 %v6475_v63, %s6696_s28  ;;  %5974 = vmatprep.subr.bf16.mxu1 %v8082_v13 }
 0x197   :  { %5976 = vmatpush3.bf16.msra.mxu1 %v8093_v38 }
 0x198   :  { %5978 = vmatprep.subr.bf16.mxu1 %v8099_v34 }
 0x19b   :  { %5980 = vmatpush3.bf16.msra.mxu1 %v8109_v21 }
 0x19c   :  { %5982 = vmatprep.subr.bf16.mxu1 %v8119_v30 }
 0x19f   :  { %5984 = vmatpush3.bf16.msra.mxu1 %v8128_v36 }
 0x1a0   :  { %5986 = vmatprep.subr.bf16.mxu1 %v8138_v12 }
 0x1a2   :  { %v4551_v62 = vpop.f32.mrb[8].mxu1 }
 0x1a3   :  { %v4552_v7 = vpop.f32.mrb[9].mxu1 }
 0x1a4   :  { %v4553_v51 = vadd.f32 %v4552_v7, %v4551_v62  ;;  %v8147_v62 = vrot.slane %v7986_v53, 2  ;;  %v8149_v7 = vpack.c.bf16 %v149_v26, %v148_v15 }
 0x1a6   :  { %v4513_v57 = vpop.f32.mrb[12].mxu0  ;;  %v4554_v1 = vpop.f32.mrb[10].mxu1  ;;  %5988 = vmatpush3.bf16.msra.mxu1 %v8149_v7  ;;  %v2526_v42 = vsel %vm2505_vm10, %v2524_v20, %v8147_v62 }
 0x1a7   :  { %v4514_v41 = vpop.f32.mrb[13].mxu0  ;;  %v4555_v50 = vpop.f32.mrb[11].mxu1  ;;  %6030 = vmatprep.subr.bf16.mxu1 %v7946_v58 }
 0x1a8   :  { %v4515_v55 = vadd.f32 %v4514_v41, %v4513_v57  ;;  %v4556_v3 = vadd.f32 %v4555_v50, %v4554_v1 }
 0x1aa   :  { %v1099_v23 = vadd.f32 %v4515_v55, %v7924_v37  ;;  %v4516_v28 = vpop.f32.mrb[14].mxu0  ;;  %v8172_v55 = vsel %vm2511_vm9, %v7984_v44, %v2526_v42 }
 0x1ab   :  { %v4517_v19 = vpop.f32.mrb[15].mxu0 }
 0x1ac   :  { %v4518_v31 = vadd.f32 %v4517_v19, %v4516_v28  ;;  %v1174_v63 = vadd.f32 %v4553_v51, %v1099_v23 }
 0x1ae   :  { %v1104_v10 = vadd.f32 %v4518_v31, %v7924_v37  ;;  %v5353_v17 = vpop.f32.mrb[16].mxu0 }
 0x1af   :  { %v1248_v46 = vpop.f32.mrb[17].mxu0 }
 0x1b0   :  { %v1179_v48 = vadd.f32 %v4556_v3, %v1104_v10  ;;  %v1249_v60 = vadd.f32 %v1248_v46, %v1174_v63 }
 0x1b2   :  { %v1254_v54 = vadd.f32 %v5353_v17, %v1179_v48  ;;  %v1257_v49 = vmax.f32 %v1249_v60, 0.0 }
 0x1b4   :  { %v1258_v51 = vmax.f32 %v1254_v54, 0.0  ;;  %v2541_v61 = vrot.slane %v1257_v49, 2  ;;  %v2547_v1 = vrot.slane %v1257_v49, 1 }
 0x1b6   :  { %v8158_v35 = vrot.slane %v1258_v51, 2  ;;  %v8160_v33 = vrot.slane %v1258_v51, 3  ;;  %v8162_v57 = vrot.slane %v1258_v51, 4 }
 0x1b8   :  { %v2543_v41 = vsel %vm2505_vm10, %v2541_v61, %v8158_v35  ;;  %v8168_v50 = vsel %vm2511_vm9, %v2541_v61, %v8162_v57  ;;  %v8176_v20 = vsel %vm2511_vm9, %v2547_v1, %v8160_v33  ;;  %v6550_v28 = vpack.i.bf16 %v8162_v57, %v7990_v45 }
 0x1b9   :  { %v8179_v3 = vsel %vm2511_vm9, %v1257_v49, %v2543_v41  ;;  %5406 = vmatprep.mubr.msk.f32.mxu0 %vm405_vm4, %v8168_v50  ;;  %v6480_v9 = vpack.i.bf16 %v8172_v55, %v8176_v20  ;;  %v6510_v23 = vpack.i.bf16 %v8168_v50, %v7996_v6  ;;  %v8206_v6 = vrot.slane %v7986_v53, 3 }
 0x1ba   :  { %5407 = vmatmul.mubr.msk.f32.vlgmr.msra.gmra.mrb[38].mxu0 %vm405_vm4, %v8162_v57  ;;  %v6485_v14 = vpack.i.bf16 %v7974_v52, %v8179_v3  ;;  %v6495_v52 = vpack.i.bf16 %v2519_v11, %v8158_v35  ;;  %v6500_v32 = vpack.i.bf16 %v8147_v62, %v8160_v33 }
 0x1bb   :  { %6481 = vrot.lane.b32.xlu1 %v6480_v9, %s6697_s3  ;;  %6000 = vmatpush3.bf16.msra.mxu0 %v8016_v25  ;;  %v6515_v46 = vpack.i.bf16 %v8160_v33, %v8206_v6 }
 0x1bc   :  { %6486 = vrot.lane.b32.xlu0 %v6485_v14, %s6698_s27  ;;  %6002 = vmatprep.subr.bf16.mxu0 %v8028_v59 }
 0x1bf   :  { %6496 = vrot.lane.b32.xlu1 %v6495_v52, %s6698_s27  ;;  %6004 = vmatpush3.bf16.msra.mxu0 %v8036_v5 }
 0x1c0   :  { %6491 = vrot.lane.b32.xlu0 %v7999_v8, %s6696_s28  ;;  %6006 = vmatprep.subr.bf16.mxu0 %v8046_v27  ;;  %v8216_v8 = vsel %vm2511_vm9, %v2530_v43, %v8206_v6 }
 0x1c1   :  { %v6505_v53 = vpack.i.bf16 %v8176_v20, %v8216_v8 }
 0x1c3   :  { %v4595_v19 = vpop.f32.mrb[12].mxu1  ;;  %6008 = vmatpush3.bf16.msra.mxu0 %v8054_v16 }
 0x1c4   :  { %v4596_v11 = vpop.f32.mrb[13].mxu1  ;;  %6501 = vrot.lane.b32.xlu0 %v6500_v32, %s6697_s3  ;;  %6010 = vmatprep.subr.bf16.mxu0 %v8064_v22 }
 0x1c5   :  { %v4597_v31 = vadd.f32 %v4596_v11, %v4595_v19 }
 0x1c7   :  { %v4598_v63 = vpop.f32.mrb[14].mxu1  ;;  %6012 = vmatpush3.bf16.msra.mxu0 %v8072_v18  ;;  %v1410_v39 = vadd.f32 %v4597_v31, %v7924_v37 }
 0x1c8   :  { %v4599_v44 = vpop.f32.mrb[15].mxu1  ;;  %6506 = vrot.lane.b32.xlu0 %v6505_v53, %s6696_s28  ;;  %6014 = vmatprep.subr.bf16.mxu0 %v8082_v13 }
 0x1c9   :  { %v4600_v0 = vadd.f32 %v4599_v44, %v4598_v63 }
 0x1cb   :  { %v5364_v29 = vpop.f32.mrb[16].mxu1  ;;  %6016 = vmatpush3.bf16.msra.mxu0 %v8093_v38  ;;  %v1415_v54 = vadd.f32 %v4600_v0, %v7924_v37 }
 0x1cc   :  { %6511 = vrot.lane.b32.xlu0 %v6510_v23, %s6698_s27  ;;  %v1559_v10 = vpop.f32.mrb[17].mxu1  ;;  %6018 = vmatprep.subr.bf16.mxu0 %v8099_v34 }
 0x1ce   :  { %v4633_v17 = vpop.f32.mrb[18].mxu0 }
 0x1cf   :  { %v4634_v2 = vpop.f32.mrb[19].mxu0  ;;  %6020 = vmatpush3.bf16.msra.mxu0 %v8109_v21 }
 0x1d0   :  { %v4635_v48 = vadd.f32 %v4634_v2, %v4633_v17  ;;  %6516 = vrot.lane.b32.xlu0 %v6515_v46, %s6696_s28  ;;  %6022 = vmatprep.subr.bf16.mxu0 %v8119_v30 }
 0x1d2   :  { %v1485_v60 = vadd.f32 %v4635_v48, %v1410_v39  ;;  %v4636_v15 = vpop.f32.mrb[20].mxu0 }
 0x1d3   :  { %v4637_v26 = vpop.f32.mrb[21].mxu0  ;;  %6024 = vmatpush3.bf16.msra.mxu0 %v8128_v36 }
 0x1d4   :  { %v1560_v49 = vadd.f32 %v1559_v10, %v1485_v60  ;;  %v4638_v51 = vadd.f32 %v4637_v26, %v4636_v15  ;;  %6026 = vmatprep.subr.bf16.mxu0 %v8138_v12 }
 0x1d6   :  { %v1490_v61 = vadd.f32 %v4638_v51, %v1415_v54  ;;  %v1568_v42 = vmax.f32 %v1560_v49, 0.0 }
 0x1d7   :  { %6028 = vmatpush3.bf16.msra.mxu0 %v8149_v7 }
 0x1d8   :  { %v1565_v1 = vadd.f32 %v5364_v29, %v1490_v61  ;;  %6070 = vmatprep.subr.bf16.mxu0 %v7946_v58  ;;  %v2771_v9 = vrot.slane %v1568_v42, 2 }
 0x1da   :  { %v1569_v41 = vmax.f32 %v1565_v1, 0.0 }
 0x1dc   :  { %v8237_v14 = vrot.slane %v1569_v41, 2  ;;  %v8239_v23 = vrot.slane %v1569_v41, 4  ;;  %v8268_v1 = vrot.slane %v1569_v41, 3 }
 0x1de   :  { %v6520_v52 = vpack.i.bf16 %v8239_v23, %v8162_v57  ;;  %v2773_v32 = vsel %vm2505_vm10, %v2771_v9, %v8237_v14  ;;  %v8250_v19 = vsel %vm2511_vm9, %v2771_v9, %v8239_v23  ;;  %v6560_v53 = vpack.i.bf16 %v8237_v14, %v8158_v35 }
 0x1df   :  { %v8246_v43 = vsel %vm2511_vm9, %v1568_v42, %v2773_v32  ;;  %v6525_v31 = vpack.i.bf16 %v8250_v19, %v8168_v50 }
 0x1e0   :  { %6521 = vrot.lane.b32.xlu1 %v6520_v52, %s6696_s28  ;;  %v6530_v11 = vpack.i.bf16 %v8246_v43, %v8179_v3  ;;  %v2777_v52 = vrot.slane %v1568_v42, 1 }
 0x1e2   :  { %6531 = vrot.lane.b32.xlu0 %v6530_v11, %s6697_s3 }
 0x1e4   :  { %6526 = vrot.lane.b32.xlu1 %v6525_v31, %s6696_s28 }
 0x1e6   :  { %6551 = vrot.lane.b32.xlu0 %v6550_v28, %s6698_s27 }
 0x1ea   :  { %6561 = vrot.lane.b32.xlu0 %v6560_v53, %s6697_s3 }
 0x1eb   :  { %v4715_v63 = vpop.f32.mrb[18].mxu1 }
 0x1ec   :  { %v4716_v44 = vpop.f32.mrb[19].mxu1 }
 0x1ed   :  { %v4717_v0 = vadd.f32 %v4716_v44, %v4715_v63 }
 0x1ee   :  { %v4677_v29 = vpop.f32.mrb[22].mxu0 }
 0x1ef   :  { %v4678_v10 = vpop.f32.mrb[23].mxu0 }
 0x1f0   :  { %v4679_v17 = vadd.f32 %v4678_v10, %v4677_v29 }
 0x1f1   :  { %v4718_v46 = vpop.f32.mrb[20].mxu1 }
 0x1f2   :  { %v1721_v50 = vadd.f32 %v4679_v17, %v7924_v37  ;;  %v4680_v2 = vpop.f32.mrb[24].mxu0  ;;  %v4719_v39 = vpop.f32.mrb[21].mxu1 }
 0x1f3   :  { %v4681_v48 = vpop.f32.mrb[25].mxu0  ;;  %v4720_v60 = vadd.f32 %v4719_v39, %v4718_v46 }
 0x1f4   :  { %v4682_v45 = vadd.f32 %v4681_v48, %v4680_v2  ;;  %v1796_v57 = vadd.f32 %v4717_v0, %v1721_v50  ;;  %v8280_v0 = vsel %vm2511_vm9, %v2777_v52, %v8268_v1 }
 0x1f6   :  { %v1726_v28 = vadd.f32 %v4682_v45, %v7924_v37  ;;  %v5375_v15 = vpop.f32.mrb[26].mxu0 }
 0x1f7   :  { %v1870_v26 = vpop.f32.mrb[27].mxu0 }
 0x1f8   :  { %v1801_v54 = vadd.f32 %v4720_v60, %v1726_v28  ;;  %v1871_v49 = vadd.f32 %v1870_v26, %v1796_v57 }
 0x1fa   :  { %v1876_v51 = vadd.f32 %v5375_v15, %v1801_v54  ;;  %v1879_v61 = vmax.f32 %v1871_v49, 0.0 }
 0x1fc   :  { %v1880_v9 = vmax.f32 %v1876_v51, 0.0  ;;  %v2996_v32 = vrot.slane %v1879_v61, 2  ;;  %v3002_v63 = vrot.slane %v1879_v61, 1 }
 0x1fe   :  { %v8270_v11 = vrot.slane %v1880_v9, 2  ;;  %v8272_v31 = vrot.slane %v1880_v9, 3  ;;  %v8274_v53 = vrot.slane %v1880_v9, 4 }
 0x200   :  { %9086 = vst [vmem:[#allocation5_spill] sm:$0xff] %v8270_v11  ;;  %v2998_v44 = vsel %vm2505_vm10, %v2996_v32, %v8270_v11  ;;  %v8284_v41 = vsel %vm2511_vm9, %v3002_v63, %v8272_v31  ;;  %v8293_v10 = vsel %vm2511_vm9, %v2996_v32, %v8274_v53  ;;  %v6545_v50 = vpack.i.bf16 %v8270_v11, %v8237_v14 }
 0x201   :  { %v6535_v42 = vpack.i.bf16 %v8284_v41, %v8280_v0  ;;  %v8289_v29 = vsel %vm2511_vm9, %v1879_v61, %v2998_v44  ;;  %v6570_v46 = vpack.i.bf16 %v8293_v10, %v8250_v19  ;;  %v6575_v2 = vpack.i.bf16 %v8272_v31, %v8268_v1 }
 0x202   :  { %v6540_v17 = vpack.i.bf16 %v8289_v29, %v8246_v43 }
 0x203   :  { %6536 = vrot.lane.b32.xlu1 %v6535_v42, %s6697_s3  ;;  %6566 = vrot.lane.b32.xlu0 %v6535_v42, %s6696_s28 }
 0x207   :  { %6541 = vrot.lane.b32.xlu1 %v6540_v17, %s6698_s27  ;;  %6571 = vrot.lane.b32.xlu0 %v6570_v46, %s6698_s27 }
 0x20b   :  { %v4759_v39 = vpop.f32.mrb[22].mxu1  ;;  %6546 = vrot.lane.b32.xlu1 %v6545_v50, %s6698_s27  ;;  %6576 = vrot.lane.b32.xlu0 %v6575_v2, %s6696_s28 }
 0x20c   :  { %v4760_v48 = vpop.f32.mrb[23].mxu1 }
 0x20d   :  { %v4761_v60 = vadd.f32 %v4760_v48, %v4759_v39 }
 0x20f   :  { %v4762_v45 = vpop.f32.mrb[24].mxu1  ;;  %6556 = vrot.lane.b32.xlu1 %v6575_v2, %s6697_s3  ;;  %v2032_v51 = vadd.f32 %v4761_v60, %v7924_v37 }
 0x210   :  { %v4763_v57 = vpop.f32.mrb[25].mxu1 }
 0x211   :  { %v4764_v28 = vadd.f32 %v4763_v57, %v4762_v45 }
 0x213   :  { %v5386_v15 = vpop.f32.mrb[26].mxu1  ;;  %v2037_v63 = vadd.f32 %v4764_v28, %v7924_v37 }
 0x214   :  { %v2181_v26 = vpop.f32.mrb[27].mxu1 }
 0x216   :  { %v4797_v54 = vpop.f32.mrb[28].mxu0 }
 0x217   :  { %v4798_v49 = vpop.f32.mrb[29].mxu0 }
 0x218   :  { %v4799_v61 = vadd.f32 %v4798_v49, %v4797_v54 }
 0x21a   :  { %v2107_v9 = vadd.f32 %v4799_v61, %v2032_v51  ;;  %v4800_v52 = vpop.f32.mrb[30].mxu0 }
 0x21b   :  { %v4801_v32 = vpop.f32.mrb[31].mxu0 }
 0x21c   :  { %v2182_v44 = vadd.f32 %v2181_v26, %v2107_v9  ;;  %v4802_v42 = vadd.f32 %v4801_v32, %v4800_v52  ;;  %v6477_v26 = vpop.permute.xlu1 %6476  ;;  %v6610_v9 = vpack.i.bf16 %v8274_v53, %v8239_v23 }
 0x21d   :  { %v6479_v51 = vunpack.i.h.bf16 %v6477_v26  ;;  %v6478_v61 = vunpack.i.l.bf16 %v6477_v26 }
 0x21e   :  { %v2112_v17 = vadd.f32 %v4802_v42, %v2037_v63  ;;  %v8312_v46 = vmax.f32 %v2182_v44, 0.0 }
 0x21f   :  { %v2598_v63 = vsel %vm405_vm4, %v7980_v40, %v6479_v51 }
 0x220   :  { %v2187_v50 = vadd.f32 %v5386_v15, %v2112_v17  ;;  %v3220_v39 = vrot.slane %v8312_v46, 2 }
 0x222   :  { %v8314_v2 = vmax.f32 %v2187_v50, 0.0 }
 0x224   :  { %v8318_v48 = vrot.slane %v8314_v2, 2  ;;  %v8321_v60 = vrot.slane %v8314_v2, 4 }
 0x226   :  { %v6580_v45 = vpack.i.bf16 %v8321_v60, %v8274_v53  ;;  %v3222_v57 = vsel %vm2505_vm10, %v3220_v39, %v8318_v48  ;;  %v8333_v15 = vsel %vm2511_vm9, %v3220_v39, %v8321_v60  ;;  %v6620_v39 = vpack.i.bf16 %v8318_v48, %v8270_v11 }
 0x227   :  { %v8329_v28 = vsel %vm2511_vm9, %v8312_v46, %v3222_v57  ;;  %v6585_v49 = vpack.i.bf16 %v8333_v15, %v8293_v10 }
 0x228   :  { %6581 = vrot.lane.b32.xlu1 %v6580_v45, %s6696_s28  ;;  %v6590_v54 = vpack.i.bf16 %v8329_v28, %v8289_v29  ;;  %v2606_v45 = vsel %vm405_vm4, %v8216_v8, %v6478_v61  ;;  %v9087_v61 = vrot.slane %v7965_v4, 2 }
 0x22a   :  { %6591 = vrot.lane.b32.xlu0 %v6590_v54, %s6697_s3 }
 0x22c   :  { %6586 = vrot.lane.b32.xlu1 %v6585_v49, %s6696_s28 }
 0x22d   :  { %v6482_v52 = vpop.permute.xlu1 %6481 }
 0x22e   :  { %6611 = vrot.lane.b32.xlu0 %v6610_v9, %s6698_s27  ;;  %v6487_v32 = vpop.permute.xlu0 %6486  ;;  %v6484_v17 = vunpack.i.h.bf16 %v6482_v52  ;;  %v6483_v50 = vunpack.i.l.bf16 %v6482_v52 }
 0x22f   :  { %v6489_v44 = vunpack.i.h.bf16 %v6487_v32  ;;  %v6488_v42 = vunpack.i.l.bf16 %v6487_v32 }
 0x231   :  { %v2601_v57 = vsel %vm2600_vm11, %v2598_v63, %v6489_v44  ;;  %v2608_v26 = vsel %vm2600_vm11, %v2606_v45, %v6488_v42  ;;  %v6497_v51 = vpop.permute.xlu1 %6496 }
 0x232   :  { %6621 = vrot.lane.b32.xlu0 %v6620_v39, %s6697_s3  ;;  %v6492_v54 = vpop.permute.xlu0 %6491  ;;  %v2610_v40 = vsel %vm2603_vm12, %v2608_v26, %v6483_v50  ;;  %v2604_v49 = vsel %vm2603_vm12, %v2601_v57, %v6484_v17  ;;  %v6499_v44 = vunpack.i.h.bf16 %v6497_v51  ;;  %v6498_v42 = vunpack.i.l.bf16 %v6497_v51 }
 0x233   :  { %v4879_v9 = vpop.f32.mrb[28].mxu1  ;;  %v6494_v52 = vunpack.i.h.bf16 %v6492_v54  ;;  %v6493_v32 = vunpack.i.l.bf16 %v6492_v54  ;;  %2681 = vmatprep.mubr.f32.mxu1 %v2610_v40 }
 0x234   :  { %v4880_v56 = vpop.f32.mrb[29].mxu1  ;;  %2682 = vmatmul.mubr.f32.vlgmr.msra.gmra.mrb[32].mxu1 %v2604_v49 }
 0x235   :  { %v4881_v11 = vadd.f32 %v4880_v56, %v4879_v9  ;;  %6032 = vmatpush3.bf16.msra.mxu1 %v7946_v58  ;;  %v2607_v8 = vsel %vm405_vm4, %v8206_v6, %v6493_v32  ;;  %v2599_v63 = vsel %vm405_vm4, %v9087_v61, %v6494_v52 }
 0x236   :  { %v4841_v17 = vpop.f32.mrb[32].mxu0  ;;  %v6502_v50 = vpop.permute.xlu0 %6501  ;;  %6034 = vmatprep.subr.bf16.mxu1 %v7958_v24  ;;  %v2609_v40 = vsel %vm2600_vm11, %v2607_v8, %v6498_v42  ;;  %v2602_v6 = vsel %vm2600_vm11, %v2599_v63, %v6499_v44 }
 0x237   :  { %v4882_v39 = vpop.f32.mrb[30].mxu1  ;;  %v6504_v45 = vunpack.i.h.bf16 %v6502_v50  ;;  %v6503_v57 = vunpack.i.l.bf16 %v6502_v50  ;;  %v4842_v26 = vpop.f32.mrb[33].mxu0 }
 0x238   :  { %v4843_v56 = vadd.f32 %v4842_v26, %v4841_v17  ;;  %v4883_v54 = vpop.f32.mrb[31].mxu1 }
 0x239   :  { %v4884_v49 = vadd.f32 %v4883_v54, %v4882_v39  ;;  %v2611_v4 = vsel %vm2603_vm12, %v2609_v40, %v6503_v57  ;;  %v2605_v9 = vsel %vm2603_vm12, %v2602_v6, %v6504_v45  ;;  %6036 = vmatpush3.bf16.msra.mxu1 %v7958_v24 }
 0x23a   :  { %v2343_v51 = vadd.f32 %v4843_v56, %v7924_v37  ;;  %v4844_v52 = vpop.f32.mrb[34].mxu0  ;;  %2686 = vmatprep.mubr.f32.mxu1 %v2611_v4  ;;  %6038 = vmatprep.subr.bf16.mxu1 %v8011_v47 }
 0x23b   :  { %v4845_v32 = vpop.f32.mrb[35].mxu0  ;;  %2687 = vmatmul.mubr.f32.gmra.mrb[34].mxu1 %v2605_v9 }
 0x23c   :  { %v4846_v61 = vadd.f32 %v4845_v32, %v4844_v52  ;;  %5417 = vmatprep.mubr.msk.f32.mxu1 %vm405_vm4, %v8250_v19  ;;  %v2418_v8 = vadd.f32 %v4881_v11, %v2343_v51  ;;  %v8380_v19 = vrot.slane %v8314_v2, 3 }
 0x23e   :  { %v2348_v63 = vadd.f32 %v4846_v61, %v7924_v37  ;;  %v3225_v37 = vrot.slane %v8312_v46, 1 }
 0x23f   :  { %v5397_v44 = vpop.f32.mrb[36].mxu0  ;;  %5418 = vmatmul.mubr.msk.f32.vlgmr.msra.gmra.mrb[36].mxu1 %vm405_vm4, %v8239_v23 }
 0x240   :  { %v2423_v42 = vadd.f32 %v4884_v49, %v2348_v63  ;;  %v2492_v17 = vpop.f32.mrb[37].mxu0  ;;  %6040 = vmatpush3.bf16.msra.mxu1 %v8016_v25  ;;  %v8391_v2 = vsel %vm2511_vm9, %v3225_v37, %v8380_v19 }
 0x241   :  { %v2493_v50 = vadd.f32 %v2492_v17, %v2418_v8  ;;  %6042 = vmatprep.subr.bf16.mxu1 %v8028_v59 }
 0x242   :  { %v2498_v39 = vadd.f32 %v5397_v44, %v2423_v42 }
 0x243   :  { %v2501_v45 = vmax.f32 %v2493_v50, 0.0 }
 0x244   :  { %v8377_v57 = vmax.f32 %v2498_v39, 0.0  ;;  %6044 = vmatpush3.bf16.msra.mxu1 %v8036_v5 }
 0x245   :  { %v3443_v11 = vrot.slane %v2501_v45, 2  ;;  %6046 = vmatprep.subr.bf16.mxu1 %v8046_v27  ;;  %v3448_v54 = vrot.slane %v2501_v45, 1 }
 0x246   :  { %v3444_v23 = vrot.slane %v8377_v57, 2  ;;  %v3450_v26 = vrot.slane %v8377_v57, 3  ;;  %v9062_v56 = vrot.slane %v8377_v57, 4 }
 0x248   :  { %v3445_v40 = vsel %vm2505_vm10, %v3443_v11, %v3444_v23  ;;  %v3452_v6 = vsel %vm2511_vm9, %v3448_v54, %v3450_v26  ;;  %v6605_v46 = vpack.i.bf16 %v3444_v23, %v8318_v48  ;;  %6048 = vmatpush3.bf16.msra.mxu1 %v8054_v16  ;;  %v8402_v9 = vsel %vm2511_vm9, %v3443_v11, %v9062_v56 }
 0x249   :  { %v3447_v49 = vsel %vm2511_vm9, %v2501_v45, %v3445_v40  ;;  %v6595_v4 = vpack.i.bf16 %v3452_v6, %v8391_v2  ;;  %6050 = vmatprep.subr.bf16.mxu1 %v8064_v22  ;;  %v6615_v48 = vpack.i.bf16 %v3450_v26, %v8380_v19 }
 0x24a   :  { %v6600_v51 = vpack.i.bf16 %v3447_v49, %v8329_v28  ;;  %v6507_v28 = vpop.permute.xlu0 %6506 }
 0x24b   :  { %6596 = vrot.lane.b32.xlu1 %v6595_v4, %s6697_s3  ;;  %v6508_v44 = vunpack.i.l.bf16 %v6507_v28  ;;  %v6509_v39 = vunpack.i.h.bf16 %v6507_v28 }
 0x24c   :  { %6052 = vmatpush3.bf16.msra.mxu1 %v8072_v18 }
 0x24d   :  { %6054 = vmatprep.subr.bf16.mxu1 %v8082_v13  ;;  %v2825_v11 = vsel %vm405_vm4, %v8172_v55, %v6508_v44  ;;  %v3049_v28 = vsel %vm405_vm4, %v8179_v3, %v6509_v39 }
 0x24e   :  { %v6512_v52 = vpop.permute.xlu0 %6511 }
 0x24f   :  { %6601 = vrot.lane.b32.xlu1 %v6600_v51, %s6698_s27  ;;  %v6513_v45 = vunpack.i.l.bf16 %v6512_v52  ;;  %v6514_v23 = vunpack.i.h.bf16 %v6512_v52 }
 0x250   :  { %6056 = vmatpush3.bf16.msra.mxu1 %v8093_v38 }
 0x251   :  { %6058 = vmatprep.subr.bf16.mxu1 %v8099_v34  ;;  %v2827_v52 = vsel %vm2600_vm11, %v2825_v11, %v6513_v45 }
 0x252   :  { %v6522_v32 = vpop.permute.xlu1 %6521  ;;  %v6517_v61 = vpop.permute.xlu0 %6516 }
 0x253   :  { %6606 = vrot.lane.b32.xlu1 %v6605_v46, %s6698_s27  ;;  %v6523_v56 = vunpack.i.l.bf16 %v6522_v32  ;;  %v6519_v39 = vunpack.i.h.bf16 %v6517_v61 }
 0x254   :  { %6060 = vmatpush3.bf16.msra.mxu1 %v8109_v21 }
 0x255   :  { %6062 = vmatprep.subr.bf16.mxu1 %v8119_v30 }
 0x256   :  { %v6527_v8 = vpop.permute.xlu1 %6526  ;;  %v6532_v63 = vpop.permute.xlu0 %6531 }
 0x257   :  { %6616 = vrot.lane.b32.xlu1 %v6615_v48, %s6697_s3  ;;  %v6529_v17 = vunpack.i.h.bf16 %v6527_v8  ;;  %v6528_v50 = vunpack.i.l.bf16 %v6527_v8  ;;  %v6534_v54 = vunpack.i.h.bf16 %v6532_v63  ;;  %v6533_v40 = vunpack.i.l.bf16 %v6532_v63 }
 0x258   :  { %6064 = vmatpush3.bf16.msra.mxu1 %v8128_v36  ;;  %v6518_v63 = vunpack.i.l.bf16 %v6517_v61 }
 0x259   :  { %6066 = vmatprep.subr.bf16.mxu1 %v8138_v12  ;;  %v2831_v51 = vsel %vm405_vm4, %v8176_v20, %v6528_v50  ;;  %v3055_v48 = vsel %vm405_vm4, %v8280_v0, %v6529_v17  ;;  %v3051_v20 = vsel %vm2600_vm11, %v3049_v28, %v6514_v23  ;;  %v6524_v50 = vunpack.i.h.bf16 %v6522_v32 }
 0x25a   :  { %v6552_v37 = vpop.permute.xlu0 %6551  ;;  %v2829_v3 = vsel %vm2603_vm12, %v2827_v52, %v6533_v40  ;;  %v3053_v17 = vsel %vm2603_vm12, %v3051_v20, %v6534_v54  ;;  %v2832_v40 = vsel %vm405_vm4, %v8160_v33, %v6523_v56 }
 0x25c   :  { %6068 = vmatpush3.bf16.msra.mxu1 %v8149_v7 }
 0x25d   :  { %6110 = vmatprep.subr.bf16.mxu1 %v7946_v58 }
 0x25e   :  { %v6562_v0 = vpop.permute.xlu0 %6561 }
 0x25f   :  { %v6564_v23 = vunpack.i.h.bf16 %v6562_v0  ;;  %v6563_v32 = vunpack.i.l.bf16 %v6562_v0 }
 0x275   :  { %v6537_v42 = vpop.permute.xlu1 %6536 }
 0x276   :  { %v6539_v49 = vunpack.i.h.bf16 %v6537_v42  ;;  %v6538_v4 = vunpack.i.l.bf16 %v6537_v42 }
 0x279   :  { %v6542_v26 = vpop.permute.xlu1 %6541 }
 0x27a   :  { %v6544_v6 = vunpack.i.h.bf16 %v6542_v26  ;;  %v6543_v46 = vunpack.i.l.bf16 %v6542_v26 }
 0x27c   :  { %v2833_v8 = vsel %vm2600_vm11, %v2831_v51, %v6543_v46  ;;  %v3057_v55 = vsel %vm2600_vm11, %v3055_v48, %v6544_v6  ;;  %v6553_v6 = vunpack.i.l.bf16 %v6552_v37  ;;  %v6554_v46 = vunpack.i.h.bf16 %v6552_v37 }
 0x27d   :  { %v6547_v44 = vpop.permute.xlu1 %6546  ;;  %v2835_v26 = vsel %vm2603_vm12, %v2833_v8, %v6538_v4  ;;  %v3059_v42 = vsel %vm2603_vm12, %v3057_v55, %v6539_v49  ;;  %v2826_v4 = vsel %vm405_vm4, %v8147_v62, %v6518_v63  ;;  %v3056_v37 = vsel %vm405_vm4, %v8268_v1, %v6524_v50 }
 0x27e   :  { %2906 = vmatprep.mubr.f32.mxu0 %v2835_v26  ;;  %3130 = vmatprep.mubr.f32.mxu1 %v3059_v42  ;;  %v6549_v45 = vunpack.i.h.bf16 %v6547_v44  ;;  %v6548_v11 = vunpack.i.l.bf16 %v6547_v44  ;;  %v2828_v28 = vsel %vm2600_vm11, %v2826_v4, %v6553_v6  ;;  %v3050_v62 = vsel %vm405_vm4, %v8158_v35, %v6519_v39 }
 0x27f   :  { %2907 = vmatmul.mubr.f32.vlgmr.msra.gmra.mrb[40].mxu0 %v2829_v3  ;;  %3131 = vmatmul.mubr.f32.vlgmr.msra.gmra.mrb[38].mxu1 %v3053_v17  ;;  %v3052_v52 = vsel %vm2600_vm11, %v3050_v62, %v6554_v46  ;;  %v2830_v33 = vsel %vm2603_vm12, %v2828_v28, %v6563_v32 }
 0x280   :  { %6072 = vmatpush3.bf16.msra.mxu0 %v7946_v58  ;;  %6112 = vmatpush3.bf16.msra.mxu1 %v7946_v58  ;;  %v2834_v51 = vsel %vm2600_vm11, %v2832_v40, %v6548_v11  ;;  %v3058_v48 = vsel %vm2600_vm11, %v3056_v37, %v6549_v45  ;;  %v3054_v1 = vsel %vm2603_vm12, %v3052_v52, %v6564_v23  ;;  %v9088_v52 = vld [vmem:[#allocation5_spill] sm:$0xff] }
 0x281   :  { %v6557_v49 = vpop.permute.xlu1 %6556  ;;  %6074 = vmatprep.subr.bf16.mxu0 %v7958_v24  ;;  %6114 = vmatprep.subr.bf16.mxu1 %v7958_v24 }
 0x282   :  { %v6559_v61 = vunpack.i.h.bf16 %v6557_v49  ;;  %v6558_v54 = vunpack.i.l.bf16 %v6557_v49 }
 0x284   :  { %v2836_v8 = vsel %vm2603_vm12, %v2834_v51, %v6558_v54  ;;  %v3060_v55 = vsel %vm2603_vm12, %v3058_v48, %v6559_v61  ;;  %6076 = vmatpush3.bf16.msra.mxu0 %v7958_v24  ;;  %6116 = vmatpush3.bf16.msra.mxu1 %v7958_v24 }
 0x285   :  { %2911 = vmatprep.mubr.f32.mxu0 %v2836_v8  ;;  %3135 = vmatprep.mubr.f32.mxu1 %v3060_v55 }
 0x286   :  { %2912 = vmatmul.mubr.f32.gmra.mrb[42].mxu0 %v2830_v33  ;;  %3136 = vmatmul.mubr.f32.gmra.mrb[40].mxu1 %v3054_v1 }
 0x287   :  { %5428 = vmatprep.mubr.msk.f32.mxu0 %vm405_vm4, %v8293_v10  ;;  %5439 = vmatprep.mubr.msk.f32.mxu1 %vm405_vm4, %v8333_v15 }
 0x288   :  { %6078 = vmatprep.subr.bf16.mxu0 %v8011_v47  ;;  %6118 = vmatprep.subr.bf16.mxu1 %v8011_v47  ;;  %v6567_v47 = vpop.permute.xlu0 %6566 }
 0x28a   :  { %5429 = vmatmul.mubr.msk.f32.vlgmr.msra.gmra.mrb[44].mxu0 %vm405_vm4, %v8274_v53  ;;  %5440 = vmatmul.mubr.msk.f32.vlgmr.msra.gmra.mrb[42].mxu1 %vm405_vm4, %v8321_v60 }
 0x28b   :  { %6080 = vmatpush3.bf16.msra.mxu0 %v8016_v25  ;;  %6120 = vmatpush3.bf16.msra.mxu1 %v8016_v25 }
 0x28c   :  { %6082 = vmatprep.subr.bf16.mxu0 %v8028_v59  ;;  %6122 = vmatprep.subr.bf16.mxu1 %v8028_v59  ;;  %v6572_v25 = vpop.permute.xlu0 %6571 }
 0x28d   :  { %v8472_v35 = vpop.f32.mrb[38].mxu0 }
 0x28e   :  { %v8474_v10 = vpop.f32.mrb[39].mxu0 }
 0x28f   :  { %6084 = vmatpush3.bf16.msra.mxu0 %v8036_v5  ;;  %6124 = vmatpush3.bf16.msra.mxu1 %v8036_v5 }
 0x290   :  { %6086 = vmatprep.subr.bf16.mxu0 %v8046_v27  ;;  %6126 = vmatprep.subr.bf16.mxu1 %v8046_v27  ;;  %v6577_v5 = vpop.permute.xlu0 %6576 }
 0x291   :  { %v6579_v46 = vunpack.i.h.bf16 %v6577_v5  ;;  %v6578_v23 = vunpack.i.l.bf16 %v6577_v5 }
 0x293   :  { %6088 = vmatpush3.bf16.msra.mxu0 %v8054_v16  ;;  %6128 = vmatpush3.bf16.msra.mxu1 %v8054_v16  ;;  %v3496_v33 = vsel %vm405_vm4, %v9088_v52, %v6579_v46  ;;  %v175_v46 = vld [vmem:[%s9044_s5 + $0x28] sm:$0xff] }
 0x294   :  { %6090 = vmatprep.subr.bf16.mxu0 %v8064_v22  ;;  %6130 = vmatprep.subr.bf16.mxu1 %v8064_v22 }
 0x297   :  { %6092 = vmatpush3.bf16.msra.mxu0 %v8072_v18  ;;  %6132 = vmatpush3.bf16.msra.mxu1 %v8072_v18 }
 0x298   :  { %6094 = vmatprep.subr.bf16.mxu0 %v8082_v13  ;;  %6134 = vmatprep.subr.bf16.mxu1 %v8082_v13 }
 0x29a   :  { %v6582_v59 = vpop.permute.xlu1 %6581 }
 0x29b   :  { %6096 = vmatpush3.bf16.msra.mxu0 %v8093_v38  ;;  %6136 = vmatpush3.bf16.msra.mxu1 %v8093_v38  ;;  %v6569_v38 = vunpack.i.h.bf16 %v6567_v47  ;;  %v6583_v45 = vunpack.i.l.bf16 %v6582_v59 }
 0x29c   :  { %6098 = vmatprep.subr.bf16.mxu0 %v8099_v34  ;;  %6138 = vmatprep.subr.bf16.mxu1 %v8099_v34  ;;  %v6592_v16 = vpop.permute.xlu0 %6591  ;;  %v6568_v34 = vunpack.i.l.bf16 %v6567_v47 }
 0x29d   :  { %v6594_v53 = vunpack.i.h.bf16 %v6592_v16  ;;  %v6593_v60 = vunpack.i.l.bf16 %v6592_v16  ;;  %v3495_v42 = vsel %vm405_vm4, %v8289_v29, %v6569_v38  ;;  %v3279_v28 = vsel %vm405_vm4, %v8272_v31, %v6583_v45  ;;  %v191_v45 = vld [vmem:[%s9044_s5 + $0xa8] sm:$0xff] }
 0x29e   :  { %v6587_v27 = vpop.permute.xlu1 %6586  ;;  %v3272_v20 = vsel %vm405_vm4, %v8246_v43, %v6568_v34 }
 0x29f   :  { %6100 = vmatpush3.bf16.msra.mxu0 %v8109_v21  ;;  %6140 = vmatpush3.bf16.msra.mxu1 %v8109_v21  ;;  %v6589_v18 = vunpack.i.h.bf16 %v6587_v27  ;;  %v6588_v13 = vunpack.i.l.bf16 %v6587_v27 }
 0x2a0   :  { %6102 = vmatprep.subr.bf16.mxu0 %v8119_v30  ;;  %6142 = vmatprep.subr.bf16.mxu1 %v8119_v30  ;;  %v6612_v21 = vpop.permute.xlu0 %6611  ;;  %v6574_v30 = vunpack.i.h.bf16 %v6572_v25 }
 0x2a1   :  { %v3278_v44 = vsel %vm405_vm4, %v8284_v41, %v6588_v13  ;;  %v3501_v26 = vsel %vm405_vm4, %v8391_v2, %v6589_v18  ;;  %v6584_v2 = vunpack.i.h.bf16 %v6582_v59  ;;  %v6614_v4 = vunpack.i.h.bf16 %v6612_v21 }
 0x2a2   :  { %v3497_v6 = vsel %vm2600_vm11, %v3495_v42, %v6574_v30  ;;  %v6613_v61 = vunpack.i.l.bf16 %v6612_v21  ;;  %v170_v42 = vld [vmem:[%s9044_s5] sm:$0xff] }
 0x2a3   :  { %6104 = vmatpush3.bf16.msra.mxu0 %v8128_v36  ;;  %6144 = vmatpush3.bf16.msra.mxu1 %v8128_v36  ;;  %v6573_v36 = vunpack.i.l.bf16 %v6572_v25  ;;  %v3499_v29 = vsel %vm2603_vm12, %v3497_v6, %v6594_v53  ;;  %v3502_v62 = vsel %vm405_vm4, %v8380_v19, %v6584_v2  ;;  %v3498_v31 = vsel %vm2600_vm11, %v3496_v33, %v6614_v4  ;;  %v173_v6 = vld [vmem:[%s9044_s5 + $0x18] sm:$0xff]  ;;  %v190_v2 = vld [vmem:[%s9044_s5 + $0xa0] sm:$0xff]  ;;  %v180_v33 = vld [vmem:[%s9044_s5 + $0x50] sm:$0xff] }
 0x2a4   :  { %6106 = vmatprep.subr.bf16.mxu0 %v8138_v12  ;;  %6146 = vmatprep.subr.bf16.mxu1 %v8138_v12  ;;  %v6622_v11 = vpop.permute.xlu0 %6621 }
 0x2a5   :  { %v3274_v41 = vsel %vm2600_vm11, %v3272_v20, %v6573_v36  ;;  %v6624_v54 = vunpack.i.h.bf16 %v6622_v11  ;;  %v6623_v40 = vunpack.i.l.bf16 %v6622_v11 }
 0x2a6   :  { %v3276_v43 = vsel %vm2603_vm12, %v3274_v41, %v6593_v60  ;;  %v172_v41 = vld [vmem:[%s9044_s5 + $0x10] sm:$0xff] }
 0x2a7   :  { %6108 = vmatpush3.bf16.msra.mxu0 %v8149_v7  ;;  %6148 = vmatpush3.bf16.msra.mxu1 %v8149_v7  ;;  %v3500_v59 = vsel %vm2603_vm12, %v3498_v31, %v6624_v54  ;;  %v8603_v11 = vpack.c.bf16 %v173_v6, %v172_v41  ;;  %v177_v54 = vld [vmem:[%s9044_s5 + $0x38] sm:$0xff] }
 0x2a8   :  { %6150 = vmatprep.subr.bf16.mxu0 %v7946_v58 }
 0x2bd   :  { %v6597_v22 = vpop.permute.xlu1 %6596 }
 0x2be   :  { %v6599_v56 = vunpack.i.h.bf16 %v6597_v22  ;;  %v6598_v63 = vunpack.i.l.bf16 %v6597_v22 }
 0x2c1   :  { %v6602_v12 = vpop.permute.xlu1 %6601 }
 0x2c2   :  { %v6604_v7 = vunpack.i.h.bf16 %v6602_v12  ;;  %v6603_v15 = vunpack.i.l.bf16 %v6602_v12 }
 0x2c4   :  { %v3280_v50 = vsel %vm2600_vm11, %v3278_v44, %v6603_v15  ;;  %v3503_v0 = vsel %vm2600_vm11, %v3501_v26, %v6604_v7  ;;  %v187_v26 = vld [vmem:[%s9044_s5 + $0x88] sm:$0xff] }
 0x2c5   :  { %v6607_v3 = vpop.permute.xlu1 %6606  ;;  %v3282_v17 = vsel %vm2603_vm12, %v3280_v50, %v6598_v63  ;;  %v3505_v39 = vsel %vm2603_vm12, %v3503_v0, %v6599_v56  ;;  %v171_v50 = vld [vmem:[%s9044_s5 + $0x8] sm:$0xff]  ;;  %v188_v0 = vld [vmem:[%s9044_s5 + $0x90] sm:$0xff] }
 0x2c6   :  { %3353 = vmatprep.mubr.f32.mxu0 %v3282_v17  ;;  %3576 = vmatprep.mubr.f32.mxu1 %v3505_v39  ;;  %v6609_v32 = vunpack.i.h.bf16 %v6607_v3  ;;  %v6608_v49 = vunpack.i.l.bf16 %v6607_v3  ;;  %v189_v3 = vld [vmem:[%s9044_s5 + $0x98] sm:$0xff]  ;;  %v8583_v17 = vpack.c.bf16 %v171_v50, %v170_v42 }
 0x2c7   :  { %3354 = vmatmul.mubr.f32.vlgmr.msra.gmra.mrb[46].mxu0 %v3276_v43  ;;  %3577 = vmatmul.mubr.f32.vlgmr.msra.gmra.mrb[44].mxu1 %v3499_v29  ;;  %v8585_v39 = vpack.c.bf16 %v189_v3, %v188_v0  ;;  %v8607_v43 = vpack.c.bf16 %v191_v45, %v190_v2  ;;  %v174_v29 = vld [vmem:[%s9044_s5 + $0x20] sm:$0xff] }
 0x2c8   :  { %6152 = vmatpush3.bf16.msra.mxu0 %v7946_v58  ;;  %v3281_v8 = vsel %vm2600_vm11, %v3279_v28, %v6608_v49  ;;  %v3504_v55 = vsel %vm2600_vm11, %v3502_v62, %v6609_v32  ;;  %v3273_v58 = vsel %vm405_vm4, %v8237_v14, %v6578_v23  ;;  %v9089_v14 = vrot.slane %v8377_v57, 4  ;;  %v192_v23 = vld [vmem:[%s9044_s5 + $0xb0] sm:$0xff]  ;;  %v193_v32 = vld [vmem:[%s9044_s5 + $0xb8] sm:$0xff]  ;;  %v178_v28 = vld [vmem:[%s9044_s5 + $0x40] sm:$0xff] }
 0x2c9   :  { %v6617_v37 = vpop.permute.xlu1 %6616  ;;  %6154 = vmatprep.subr.bf16.mxu0 %v7958_v24  ;;  %v3275_v25 = vsel %vm2600_vm11, %v3273_v58, %v6613_v61  ;;  %v8623_v49 = vpack.c.bf16 %v175_v46, %v174_v29  ;;  %v8627_v4 = vpack.c.bf16 %v193_v32, %v192_v23  ;;  %v176_v61 = vld [vmem:[%s9044_s5 + $0x30] sm:$0xff]  ;;  %v179_v62 = vld [vmem:[%s9044_s5 + $0x48] sm:$0xff] }
 0x2ca   :  { %v6619_v51 = vunpack.i.h.bf16 %v6617_v37  ;;  %v6618_v48 = vunpack.i.l.bf16 %v6617_v37  ;;  %v3277_v19 = vsel %vm2603_vm12, %v3275_v25, %v6623_v40  ;;  %v194_v40 = vld [vmem:[%s9044_s5 + $0xc0] sm:$0xff]  ;;  %v195_v37 = vld [vmem:[%s9044_s5 + $0xc8] sm:$0xff]  ;;  %v8663_v58 = vpack.c.bf16 %v179_v62, %v178_v28 }
 0x2cb   :  { %v199_v25 = vld [vmem:[%s9044_s5 + $0xe8] sm:$0xff] }
 0x2cc   :  { %v3283_v1 = vsel %vm2603_vm12, %v3281_v8, %v6618_v48  ;;  %v3506_v47 = vsel %vm2603_vm12, %v3504_v55, %v6619_v51  ;;  %6156 = vmatpush3.bf16.msra.mxu0 %v7958_v24  ;;  %v8546_v24 = vld [vmem:[%s9043_s4] ss:$0 sm:$0xff]  ;;  %v8643_v51 = vpack.c.bf16 %v177_v54, %v176_v61  ;;  %v8647_v48 = vpack.c.bf16 %v195_v37, %v194_v40  ;;  %v196_v8 = vld [vmem:[%s9044_s5 + $0xd0] sm:$0xff]  ;;  %v197_v55 = vld [vmem:[%s9044_s5 + $0xd8] sm:$0xff] }
 0x2cd   :  { %3358 = vmatprep.mubr.f32.mxu0 %v3283_v1  ;;  %3581 = vmatprep.mubr.f32.mxu1 %v3506_v47  ;;  %v8667_v52 = vpack.c.bf16 %v197_v55, %v196_v8  ;;  %v181_v1 = vld [vmem:[%s9044_s5 + $0x58] sm:$0xff]  ;;  %v198_v47 = vld [vmem:[%s9044_s5 + $0xe0] sm:$0xff] }
 0x2ce   :  { %3359 = vmatmul.mubr.f32.gmra.mrb[48].mxu0 %v3277_v19  ;;  %3582 = vmatmul.mubr.f32.gmra.mrb[46].mxu1 %v3500_v59  ;;  %v8683_v31 = vpack.c.bf16 %v181_v1, %v180_v33  ;;  %v8687_v19 = vpack.c.bf16 %v199_v25, %v198_v47  ;;  %v182_v59 = vld [vmem:[%s9044_s5 + $0x60] sm:$0xff] }
 0x2cf   :  { %5450 = vmatprep.mubr.msk.f32.mxu0 %vm405_vm4, %v8402_v9 }
 0x2d2   :  { %5451 = vmatmul.mubr.msk.f32.vlgmr.msra.gmra.mrb[50].mxu0 %vm405_vm4, %v9089_v14  ;;  %v183_v14 = vld [vmem:[%s9044_s5 + $0x68] sm:$0xff] }
 0x307   :  { %v4923_v5 = vpop.f32.mrb[32].mxu1 }
 0x308   :  { %v4924_v27 = vpop.f32.mrb[33].mxu1 }
 0x309   :  { %v4925_v16 = vadd.f32 %v4924_v27, %v4923_v5  ;;  %v8697_v5 = vpack.c.bf16 %v183_v14, %v182_v59 }
 0x30b   :  { %v2684_v22 = vadd.f32 %v4925_v16, %v8546_v24 }
 0x30d   :  { %v2759_v18 = vadd.f32 %v8474_v10, %v2684_v22 }
 0x30e   :  { %v4926_v13 = vpop.f32.mrb[34].mxu1 }
 0x30f   :  { %v4927_v38 = vpop.f32.mrb[35].mxu1  ;;  %v2767_v30 = vmax.f32 %v2759_v18, 0.0 }
 0x310   :  { %v4928_v34 = vadd.f32 %v4927_v38, %v4926_v13 }
 0x311   :  { %v3673_v53 = vrot.slane %v2767_v30, 2  ;;  %v3666_v15 = vrot.slane %v2767_v30, 1 }
 0x312   :  { %v2689_v9 = vadd.f32 %v4928_v34, %v8546_v24  ;;  %v8551_v57 = vpop.f32.mrb[36].mxu1 }
 0x313   :  { %v8553_v21 = vpop.f32.mrb[37].mxu1 }
 0x314   :  { %v2764_v36 = vadd.f32 %v8472_v35, %v2689_v9  ;;  %v186_v35 = vld [vmem:[%s9044_s5 + $0x80] sm:$0xff] }
 0x315   :  { %v8572_v20 = vpack.c.bf16 %v187_v26, %v186_v35 }
 0x316   :  { %v2768_v12 = vmax.f32 %v2764_v36, 0.0 }
 0x317   :  { %6158 = vmatprep.subr.bf16.mxu0 %v8572_v20  ;;  %6190 = vmatprep.subr.bf16.mxu1 %v8572_v20 }
 0x318   :  { %v3667_v60 = vrot.slane %v2768_v12, 1  ;;  %v3674_v7 = vrot.slane %v2768_v12, 2  ;;  %6160 = vmatpush3.bf16.msra.mxu0 %v8583_v17  ;;  %6192 = vmatpush3.bf16.msra.mxu1 %v8583_v17 }
 0x319   :  { %6162 = vmatprep.subr.bf16.mxu0 %v8585_v39  ;;  %6194 = vmatprep.subr.bf16.mxu1 %v8585_v39 }
 0x31a   :  { %v3675_v10 = vsel %vm2505_vm10, %v3673_v53, %v3674_v7  ;;  %v3668_v56 = vsel %vm297_vm0, %v3666_v15, %v3667_v60 }
 0x31b   :  { %v3677_v63 = vsel %vm3670_vm13, %v3666_v15, %v3675_v10  ;;  %v8560_v44 = vsel %vm3670_vm13, %v2767_v30, %v3668_v56  ;;  %v200_v15 = vld [vmem:[%s9044_s5 + $0xf0] sm:$0xff]  ;;  %v201_v10 = vld [vmem:[%s9044_s5 + $0xf8] sm:$0xff] }
 0x31c   :  { %3692 = vrot.lane.b32.xlu0 %v3677_v63, %s6698_s27  ;;  %6164 = vmatpush3.bf16.msra.mxu0 %v8603_v11  ;;  %v8711_v56 = vpack.c.bf16 %v201_v10, %v200_v15  ;;  %v185_v63 = vld [vmem:[%s9044_s5 + $0x78] sm:$0xff] }
 0x31d   :  { %6196 = vmatpush3.bf16.msra.mxu1 %v8603_v11  ;;  %6166 = vmatprep.subr.bf16.mxu0 %v8607_v43 }
 0x31e   :  { %6198 = vmatprep.subr.bf16.mxu1 %v8607_v43 }
 0x320   :  { %6168 = vmatpush3.bf16.msra.mxu0 %v8623_v49 }
 0x321   :  { %6200 = vmatpush3.bf16.msra.mxu1 %v8623_v49  ;;  %6170 = vmatprep.subr.bf16.mxu0 %v8627_v4 }
 0x322   :  { %6202 = vmatprep.subr.bf16.mxu1 %v8627_v4 }
 0x324   :  { %6172 = vmatpush3.bf16.msra.mxu0 %v8643_v51 }
 0x325   :  { %6204 = vmatpush3.bf16.msra.mxu1 %v8643_v51  ;;  %6174 = vmatprep.subr.bf16.mxu0 %v8647_v48 }
 0x326   :  { %6206 = vmatprep.subr.bf16.mxu1 %v8647_v48 }
 0x328   :  { %6176 = vmatpush3.bf16.msra.mxu0 %v8663_v58 }
 0x329   :  { %6208 = vmatpush3.bf16.msra.mxu1 %v8663_v58  ;;  %6178 = vmatprep.subr.bf16.mxu0 %v8667_v52 }
 0x32a   :  { %6210 = vmatprep.subr.bf16.mxu1 %v8667_v52 }
 0x32c   :  { %6180 = vmatpush3.bf16.msra.mxu0 %v8683_v31 }
 0x32d   :  { %6212 = vmatpush3.bf16.msra.mxu1 %v8683_v31  ;;  %6182 = vmatprep.subr.bf16.mxu0 %v8687_v19 }
 0x32e   :  { %6214 = vmatprep.subr.bf16.mxu1 %v8687_v19 }
 0x330   :  { %6184 = vmatpush3.bf16.msra.mxu0 %v8697_v5 }
 0x331   :  { %6216 = vmatpush3.bf16.msra.mxu1 %v8697_v5  ;;  %6186 = vmatprep.subr.bf16.mxu0 %v8711_v56 }
 0x332   :  { %6218 = vmatprep.subr.bf16.mxu1 %v8711_v56 }
 0x352   :  { %v4967_v27 = vpop.f32.mrb[40].mxu0  ;;  %v5011_v16 = vpop.f32.mrb[38].mxu1 }
 0x353   :  { %v4968_v22 = vpop.f32.mrb[41].mxu0  ;;  %v5012_v18 = vpop.f32.mrb[39].mxu1 }
 0x354   :  { %v4969_v13 = vadd.f32 %v4968_v22, %v4967_v27  ;;  %v5013_v38 = vadd.f32 %v5012_v18, %v5011_v16 }
 0x356   :  { %v2909_v34 = vadd.f32 %v4969_v13, %v8546_v24  ;;  %v3133_v0 = vadd.f32 %v5013_v38, %v8546_v24 }
 0x358   :  { %v2984_v9 = vadd.f32 %v8553_v21, %v2909_v34  ;;  %v184_v21 = vld [vmem:[%s9044_s5 + $0x70] sm:$0xff] }
 0x359   :  { %v4970_v30 = vpop.f32.mrb[42].mxu0  ;;  %v5014_v36 = vpop.f32.mrb[40].mxu1  ;;  %v8722_v3 = vpack.c.bf16 %v185_v63, %v184_v21 }
 0x35a   :  { %v4971_v12 = vpop.f32.mrb[43].mxu0  ;;  %v5015_v53 = vpop.f32.mrb[41].mxu1  ;;  %v2992_v41 = vmax.f32 %v2984_v9, 0.0 }
 0x35b   :  { %v4972_v60 = vadd.f32 %v4971_v12, %v4970_v30  ;;  %v5016_v7 = vadd.f32 %v5015_v53, %v5014_v36  ;;  %6188 = vmatpush3.bf16.msra.mxu0 %v8722_v3  ;;  %6220 = vmatpush3.bf16.msra.mxu1 %v8722_v3 }
 0x35c   :  { %6222 = vmatprep.subr.bf16.mxu0 %v8572_v20  ;;  %6254 = vmatprep.subr.bf16.mxu1 %v8572_v20  ;;  %v3680_v54 = vrot.slane %v2992_v41, 1  ;;  %v3686_v40 = vrot.slane %v2992_v41, 2 }
 0x35d   :  { %v2914_v35 = vadd.f32 %v4972_v60, %v8546_v24  ;;  %v3138_v26 = vadd.f32 %v5016_v7, %v8546_v24  ;;  %v5430_v42 = vpop.f32.mrb[44].mxu0  ;;  %v5441_v50 = vpop.f32.mrb[42].mxu1 }
 0x35e   :  { %v3207_v6 = vpop.f32.mrb[45].mxu0  ;;  %v3430_v2 = vpop.f32.mrb[43].mxu1 }
 0x35f   :  { %v2989_v45 = vadd.f32 %v8551_v57, %v2914_v35  ;;  %v3213_v29 = vadd.f32 %v5430_v42, %v3138_v26  ;;  %v3208_v46 = vadd.f32 %v3207_v6, %v3133_v0 }
 0x361   :  { %v2993_v23 = vmax.f32 %v2989_v45, 0.0  ;;  %v3217_v32 = vmax.f32 %v3213_v29, 0.0  ;;  %v3216_v61 = vmax.f32 %v3208_v46, 0.0 }
 0x363   :  { %v3681_v37 = vrot.slane %v2993_v23, 1  ;;  %v3687_v28 = vrot.slane %v2993_v23, 2  ;;  %v3774_v62 = vrot.slane %v3217_v32, 1  ;;  %v3780_v8 = vrot.slane %v3217_v32, 2 }
 0x364   :  { %v3773_v57 = vrot.slane %v3216_v61, 1  ;;  %v3779_v55 = vrot.slane %v3216_v61, 2 }
 0x365   :  { %v3688_v33 = vsel %vm2505_vm10, %v3686_v40, %v3687_v28  ;;  %v3682_v1 = vsel %vm297_vm0, %v3680_v54, %v3681_v37 }
 0x366   :  { %v3781_v47 = vsel %vm2505_vm10, %v3779_v55, %v3780_v8  ;;  %v3690_v25 = vsel %vm3670_vm13, %v3680_v54, %v3688_v33  ;;  %v3684_v20 = vsel %vm3670_vm13, %v2992_v41, %v3682_v1  ;;  %v3775_v59 = vsel %vm297_vm0, %v3773_v57, %v3774_v62 }
 0x367   :  { %v3783_v14 = vsel %vm3670_vm13, %v3773_v57, %v3781_v47  ;;  %v3777_v27 = vsel %vm3670_vm13, %v3216_v61, %v3775_v59 }
 0x368   :  { %v6625_v16 = vpack.i.bf16 %v3690_v25, %v3783_v14 }
 0x36a   :  { %6626 = vrot.lane.b32.xlu1 %v6625_v16, %s6698_s27 }
 0x38e   :  { %v3693_v14 = vpop.permute.xlu0 %3692 }
 0x39a   :  { %v5055_v22 = vpop.f32.mrb[46].mxu0  ;;  %v5099_v18 = vpop.f32.mrb[44].mxu1 }
 0x39b   :  { %v5056_v13 = vpop.f32.mrb[47].mxu0  ;;  %v5100_v38 = vpop.f32.mrb[45].mxu1 }
 0x39c   :  { %v5057_v34 = vadd.f32 %v5056_v13, %v5055_v22  ;;  %v5101_v9 = vadd.f32 %v5100_v38, %v5099_v18  ;;  %v3699_v38 = vsel %vm2600_vm11, %v8560_v44, %v3693_v14  ;;  %v217_v14 = vld [vmem:[%s9046_s7 + $0x78] sm:$0xff] }
 0x39e   :  { %v3356_v30 = vadd.f32 %v5057_v34, %v8546_v24  ;;  %v3579_v26 = vadd.f32 %v5101_v9, %v8546_v24 }
 0x3a0   :  { %v3431_v36 = vadd.f32 %v3430_v2, %v3356_v30  ;;  %v206_v30 = vld [vmem:[%s9046_s7 + $0x20] sm:$0xff] }
 0x3a1   :  { %v5058_v12 = vpop.f32.mrb[48].mxu0  ;;  %v5102_v53 = vpop.f32.mrb[46].mxu1 }
 0x3a2   :  { %v5059_v60 = vpop.f32.mrb[49].mxu0  ;;  %v5103_v7 = vpop.f32.mrb[47].mxu1  ;;  %v3439_v42 = vmax.f32 %v3431_v36, 0.0  ;;  %v207_v36 = vld [vmem:[%s9046_s7 + $0x28] sm:$0xff] }
 0x3a3   :  { %v5060_v15 = vadd.f32 %v5059_v60, %v5058_v12  ;;  %v5104_v10 = vadd.f32 %v5103_v7, %v5102_v53  ;;  %v224_v12 = vld [vmem:[%s9046_s7 + $0xb0] sm:$0xff]  ;;  %v225_v53 = vld [vmem:[%s9046_s7 + $0xb8] sm:$0xff]  ;;  %v6295_v60 = vpack.c.bf16 %v207_v36, %v206_v30 }
 0x3a4   :  { %v3861_v23 = vrot.slane %v3439_v42, 1  ;;  %v3867_v32 = vrot.slane %v3439_v42, 2  ;;  %v6297_v7 = vpack.c.bf16 %v225_v53, %v224_v12  ;;  %v238_v12 = vld [vmem:[%s9046_s7 + $0x120] sm:$0xff]  ;;  %v239_v53 = vld [vmem:[%s9046_s7 + $0x128] sm:$0xff] }
 0x3a5   :  { %v3361_v21 = vadd.f32 %v5060_v15, %v8546_v24  ;;  %v3584_v63 = vadd.f32 %v5104_v10, %v8546_v24  ;;  %v5452_v35 = vpop.f32.mrb[50].mxu0  ;;  %v208_v15 = vld [vmem:[%s9046_s7 + $0x30] sm:$0xff]  ;;  %v209_v10 = vld [vmem:[%s9046_s7 + $0x38] sm:$0xff] }
 0x3a6   :  { %v3653_v0 = vpop.f32.mrb[51].mxu0 }
 0x3a7   :  { %v3436_v41 = vadd.f32 %v5441_v50, %v3361_v21  ;;  %v3659_v6 = vadd.f32 %v5452_v35, %v3584_v63  ;;  %v3654_v45 = vadd.f32 %v3653_v0, %v3579_v26  ;;  %v226_v21 = vld [vmem:[%s9046_s7 + $0xc0] sm:$0xff]  ;;  %v227_v63 = vld [vmem:[%s9046_s7 + $0xc8] sm:$0xff]  ;;  %v6299_v35 = vpack.c.bf16 %v209_v10, %v208_v15 }
 0x3a8   :  { %v6301_v26 = vpack.c.bf16 %v227_v63, %v226_v21  ;;  %v211_v0 = vld [vmem:[%s9046_s7 + $0x48] sm:$0xff]  ;;  %v6327_v15 = vpack.c.bf16 %v239_v53, %v238_v12  ;;  %v240_v21 = vld [vmem:[%s9046_s7 + $0x130] sm:$0xff]  ;;  %v241_v63 = vld [vmem:[%s9046_s7 + $0x138] sm:$0xff] }
 0x3a9   :  { %v3440_v29 = vmax.f32 %v3436_v41, 0.0  ;;  %v3663_v2 = vmax.f32 %v3659_v6, 0.0  ;;  %v3662_v46 = vmax.f32 %v3654_v45, 0.0  ;;  %v228_v41 = vld [vmem:[%s9046_s7 + $0xd0] sm:$0xff]  ;;  %v229_v6 = vld [vmem:[%s9046_s7 + $0xd8] sm:$0xff] }
 0x3ab   :  { %v3862_v61 = vrot.slane %v3440_v29, 1  ;;  %v3868_v54 = vrot.slane %v3440_v29, 2  ;;  %v3950_v40 = vrot.slane %v3663_v2, 1  ;;  %v3956_v37 = vrot.slane %v3663_v2, 2  ;;  %v212_v2 = vld [vmem:[%s9046_s7 + $0x50] sm:$0xff] }
 0x3ac   :  { %v3949_v28 = vrot.slane %v3662_v46, 1  ;;  %v3955_v62 = vrot.slane %v3662_v46, 2  ;;  %v6305_v29 = vpack.c.bf16 %v229_v6, %v228_v41  ;;  %v242_v41 = vld [vmem:[%s9046_s7 + $0x140] sm:$0xff]  ;;  %v243_v6 = vld [vmem:[%s9046_s7 + $0x148] sm:$0xff] }
 0x3ad   :  { %v3869_v8 = vsel %vm2505_vm10, %v3867_v32, %v3868_v54  ;;  %v3863_v24 = vsel %vm297_vm0, %v3861_v23, %v3862_v61  ;;  %v230_v32 = vld [vmem:[%s9046_s7 + $0xe0] sm:$0xff]  ;;  %v231_v61 = vld [vmem:[%s9046_s7 + $0xe8] sm:$0xff] }
 0x3ae   :  { %v3957_v57 = vsel %vm2505_vm10, %v3955_v62, %v3956_v37  ;;  %v3871_v50 = vsel %vm3670_vm13, %v3861_v23, %v3869_v8  ;;  %v3865_v55 = vsel %vm3670_vm13, %v3439_v42, %v3863_v24  ;;  %v3951_v33 = vsel %vm297_vm0, %v3949_v28, %v3950_v40  ;;  %v210_v42 = vld [vmem:[%s9046_s7 + $0x40] sm:$0xff]  ;;  %v215_v37 = vld [vmem:[%s9046_s7 + $0x68] sm:$0xff] }
 0x3af   :  { %v3959_v1 = vsel %vm3670_vm13, %v3949_v28, %v3957_v57  ;;  %v3953_v47 = vsel %vm3670_vm13, %v3662_v46, %v3951_v33  ;;  %v6303_v45 = vpack.c.bf16 %v211_v0, %v210_v42  ;;  %v213_v46 = vld [vmem:[%s9046_s7 + $0x58] sm:$0xff]  ;;  %v6309_v54 = vpack.c.bf16 %v231_v61, %v230_v32  ;;  %v214_v40 = vld [vmem:[%s9046_s7 + $0x60] sm:$0xff] }
 0x3b0   :  { %v6630_v25 = vpack.i.bf16 %v3871_v50, %v3959_v1  ;;  %v6307_v23 = vpack.c.bf16 %v213_v46, %v212_v2  ;;  %v8876_v8 = vld [vmem:[%s9045_s6] ss:$0 sm:$0xff]  ;;  %v6311_v24 = vpack.c.bf16 %v215_v37, %v214_v40  ;;  %v233_v33 = vld [vmem:[%s9046_s7 + $0xf8] sm:$0xff]  ;;  %v216_v1 = vld [vmem:[%s9046_s7 + $0x70] sm:$0xff]  ;;  %v6331_v42 = vpack.c.bf16 %v241_v63, %v240_v21 }
 0x3b1   :  { %v6335_v2 = vpack.c.bf16 %v243_v6, %v242_v41  ;;  %v245_v32 = vld [vmem:[%s9046_s7 + $0x158] sm:$0xff]  ;;  %v263_v40 = vld [vmem:[%s9046_s7 + $0x1e8] sm:$0xff] }
 0x3b2   :  { %6631 = vrot.lane.b32.xlu1 %v6630_v25, %s6698_s27 }
 0x3dc   :  { %v6627_v59 = vpop.permute.xlu1 %6626 }
 0x3dd   :  { %v6629_v16 = vunpack.i.h.bf16 %v6627_v59  ;;  %v6628_v22 = vunpack.i.l.bf16 %v6627_v59 }
 0x3df   :  { %v3700_v18 = vsel %vm2600_vm11, %v3684_v20, %v6629_v16  ;;  %v3788_v13 = vsel %vm2600_vm11, %v3777_v27, %v6628_v22  ;;  %v222_v20 = vld [vmem:[%s9046_s7 + $0xa0] sm:$0xff]  ;;  %v223_v27 = vld [vmem:[%s9046_s7 + $0xa8] sm:$0xff]  ;;  %v6315_v16 = vpack.c.bf16 %v217_v14, %v216_v1 }
 0x3e0   :  { %3765 = vmatprep.mubr.f32.mxu0 %v3700_v18  ;;  %3853 = vmatprep.mubr.f32.mxu1 %v3788_v13  ;;  %v6293_v9 = vpack.c.bf16 %v223_v27, %v222_v20  ;;  %v237_v20 = vld [vmem:[%s9046_s7 + $0x118] sm:$0xff]  ;;  %v254_v27 = vld [vmem:[%s9046_s7 + $0x1a0] sm:$0xff] }
 0x3e1   :  { %3766 = vmatmul.mubr.f32.vlgmr.msra.gmra.mrb[52].mxu0 %v3699_v38  ;;  %3854 = vmatmul.mubr.f32.vlgmr.msra.gmra.mrb[48].mxu1 %v3700_v18 }
 0x3e2   :  { %6224 = vmatpush3.bf16.msra.mxu0 %v8583_v17  ;;  %6256 = vmatpush3.bf16.msra.mxu1 %v8583_v17 }
 0x3e3   :  { %6226 = vmatprep.subr.bf16.mxu0 %v8585_v39  ;;  %6258 = vmatprep.subr.bf16.mxu1 %v8585_v39 }
 0x3e6   :  { %6228 = vmatpush3.bf16.msra.mxu0 %v8603_v11  ;;  %6260 = vmatpush3.bf16.msra.mxu1 %v8603_v11 }
 0x3e7   :  { %6230 = vmatprep.subr.bf16.mxu0 %v8607_v43  ;;  %6262 = vmatprep.subr.bf16.mxu1 %v8607_v43 }
 0x3ea   :  { %6232 = vmatpush3.bf16.msra.mxu0 %v8623_v49  ;;  %6264 = vmatpush3.bf16.msra.mxu1 %v8623_v49  ;;  %v218_v49 = vld [vmem:[%s9046_s7 + $0x80] sm:$0xff] }
 0x3eb   :  { %6234 = vmatprep.subr.bf16.mxu0 %v8627_v4  ;;  %6266 = vmatprep.subr.bf16.mxu1 %v8627_v4  ;;  %v219_v4 = vld [vmem:[%s9046_s7 + $0x88] sm:$0xff] }
 0x3ee   :  { %6236 = vmatpush3.bf16.msra.mxu0 %v8643_v51  ;;  %6268 = vmatpush3.bf16.msra.mxu1 %v8643_v51  ;;  %v202_v51 = vld [vmem:[%s9046_s7] sm:$0xff] }
 0x3ef   :  { %6238 = vmatprep.subr.bf16.mxu0 %v8647_v48  ;;  %6270 = vmatprep.subr.bf16.mxu1 %v8647_v48  ;;  %v6285_v48 = vpack.c.bf16 %v219_v4, %v218_v49  ;;  %v250_v4 = vld [vmem:[%s9046_s7 + $0x180] sm:$0xff] }
 0x3f2   :  { %6240 = vmatpush3.bf16.msra.mxu0 %v8663_v58  ;;  %6272 = vmatpush3.bf16.msra.mxu1 %v8663_v58  ;;  %v203_v58 = vld [vmem:[%s9046_s7 + $0x8] sm:$0xff] }
 0x3f3   :  { %6242 = vmatprep.subr.bf16.mxu0 %v8667_v52  ;;  %6274 = vmatprep.subr.bf16.mxu1 %v8667_v52  ;;  %v220_v52 = vld [vmem:[%s9046_s7 + $0x90] sm:$0xff] }
 0x3f6   :  { %6244 = vmatpush3.bf16.msra.mxu0 %v8683_v31  ;;  %6276 = vmatpush3.bf16.msra.mxu1 %v8683_v31  ;;  %v221_v31 = vld [vmem:[%s9046_s7 + $0x98] sm:$0xff] }
 0x3f7   :  { %6246 = vmatprep.subr.bf16.mxu0 %v8687_v19  ;;  %6278 = vmatprep.subr.bf16.mxu1 %v8687_v19  ;;  %v6287_v19 = vpack.c.bf16 %v203_v58, %v202_v51  ;;  %v251_v51 = vld [vmem:[%s9046_s7 + $0x188] sm:$0xff] }
 0x3f8   :  { %v6317_v58 = vpack.c.bf16 %v251_v51, %v250_v4 }
 0x3fa   :  { %6248 = vmatpush3.bf16.msra.mxu0 %v8697_v5  ;;  %6280 = vmatpush3.bf16.msra.mxu1 %v8697_v5  ;;  %v6289_v5 = vpack.c.bf16 %v221_v31, %v220_v52  ;;  %v235_v52 = vld [vmem:[%s9046_s7 + $0x108] sm:$0xff]  ;;  %v252_v31 = vld [vmem:[%s9046_s7 + $0x190] sm:$0xff] }
 0x3fb   :  { %6250 = vmatprep.subr.bf16.mxu0 %v8711_v56  ;;  %6282 = vmatprep.subr.bf16.mxu1 %v8711_v56  ;;  %v204_v56 = vld [vmem:[%s9046_s7 + $0x10] sm:$0xff] }
 0x3fe   :  { %6252 = vmatpush3.bf16.msra.mxu0 %v8722_v3  ;;  %6284 = vmatpush3.bf16.msra.mxu1 %v8722_v3  ;;  %v205_v3 = vld [vmem:[%s9046_s7 + $0x18] sm:$0xff] }
 0x3ff   :  { %6286 = vmatprep.subr.bf16.mxu0 %v6285_v48  ;;  %v6291_v34 = vpack.c.bf16 %v205_v3, %v204_v56  ;;  %v234_v48 = vld [vmem:[%s9046_s7 + $0x100] sm:$0xff]  ;;  %v236_v3 = vld [vmem:[%s9046_s7 + $0x110] sm:$0xff]  ;;  %6318 = vmatprep.subr.bf16.mxu1 %v6317_v58 }
 0x400   :  { %v6323_v30 = vpack.c.bf16 %v237_v20, %v236_v3 }
 0x424   :  { %v6632_v44 = vpop.permute.xlu1 %6631 }
 0x425   :  { %v6634_v17 = vunpack.i.h.bf16 %v6632_v44  ;;  %v6633_v39 = vunpack.i.l.bf16 %v6632_v44 }
 0x427   :  { %v3876_v11 = vsel %vm2600_vm11, %v3865_v55, %v6634_v17  ;;  %v3964_v43 = vsel %vm2600_vm11, %v3953_v47, %v6633_v39  ;;  %v232_v55 = vld [vmem:[%s9046_s7 + $0xf0] sm:$0xff] }
 0x428   :  { %3941 = vmatprep.mubr.f32.mxu0 %v3876_v11  ;;  %4029 = vmatprep.mubr.f32.mxu1 %v3964_v43  ;;  %v6313_v59 = vpack.c.bf16 %v233_v33, %v232_v55 }
 0x429   :  { %3942 = vmatmul.mubr.f32.vlgmr.msra.gmra.mrb[54].mxu0 %v3788_v13  ;;  %4030 = vmatmul.mubr.f32.vlgmr.msra.gmra.mrb[50].mxu1 %v3876_v11 }
 0x42a   :  { %6288 = vmatpush3.bf16.msra.mxu0 %v6287_v19  ;;  %v253_v19 = vld [vmem:[%s9046_s7 + $0x198] sm:$0xff] }
 0x42b   :  { %6290 = vmatprep.subr.bf16.mxu0 %v6289_v5  ;;  %v6319_v5 = vpack.c.bf16 %v235_v52, %v234_v48  ;;  %v6321_v56 = vpack.c.bf16 %v253_v19, %v252_v31 }
 0x42d   :  { %6320 = vmatpush3.bf16.msra.mxu1 %v6319_v5 }
 0x42e   :  { %6292 = vmatpush3.bf16.msra.mxu0 %v6291_v34  ;;  %v255_v34 = vld [vmem:[%s9046_s7 + $0x1a8] sm:$0xff]  ;;  %6322 = vmatprep.subr.bf16.mxu1 %v6321_v56 }
 0x42f   :  { %6294 = vmatprep.subr.bf16.mxu0 %v6293_v9  ;;  %v6325_v36 = vpack.c.bf16 %v255_v34, %v254_v27 }
 0x431   :  { %6324 = vmatpush3.bf16.msra.mxu1 %v6323_v30 }
 0x432   :  { %6296 = vmatpush3.bf16.msra.mxu0 %v6295_v60  ;;  %v256_v60 = vld [vmem:[%s9046_s7 + $0x1b0] sm:$0xff]  ;;  %6326 = vmatprep.subr.bf16.mxu1 %v6325_v36 }
 0x433   :  { %6298 = vmatprep.subr.bf16.mxu0 %v6297_v7  ;;  %v257_v7 = vld [vmem:[%s9046_s7 + $0x1b8] sm:$0xff] }
 0x434   :  { %v6329_v10 = vpack.c.bf16 %v257_v7, %v256_v60 }
 0x435   :  { %6328 = vmatpush3.bf16.msra.mxu1 %v6327_v15 }
 0x436   :  { %6300 = vmatpush3.bf16.msra.mxu0 %v6299_v35  ;;  %v258_v35 = vld [vmem:[%s9046_s7 + $0x1c0] sm:$0xff]  ;;  %6330 = vmatprep.subr.bf16.mxu1 %v6329_v10 }
 0x437   :  { %6302 = vmatprep.subr.bf16.mxu0 %v6301_v26  ;;  %v259_v26 = vld [vmem:[%s9046_s7 + $0x1c8] sm:$0xff] }
 0x438   :  { %v6333_v0 = vpack.c.bf16 %v259_v26, %v258_v35 }
 0x439   :  { %6332 = vmatpush3.bf16.msra.mxu1 %v6331_v42 }
 0x43a   :  { %6304 = vmatpush3.bf16.msra.mxu0 %v6303_v45  ;;  %v260_v45 = vld [vmem:[%s9046_s7 + $0x1d0] sm:$0xff]  ;;  %6334 = vmatprep.subr.bf16.mxu1 %v6333_v0 }
 0x43b   :  { %6306 = vmatprep.subr.bf16.mxu0 %v6305_v29  ;;  %v261_v29 = vld [vmem:[%s9046_s7 + $0x1d8] sm:$0xff] }
 0x43c   :  { %v6337_v46 = vpack.c.bf16 %v261_v29, %v260_v45 }
 0x43d   :  { %6336 = vmatpush3.bf16.msra.mxu1 %v6335_v2 }
 0x43e   :  { %6308 = vmatpush3.bf16.msra.mxu0 %v6307_v23  ;;  %6338 = vmatprep.subr.bf16.mxu1 %v6337_v46  ;;  %v244_v23 = vld [vmem:[%s9046_s7 + $0x150] sm:$0xff] }
 0x43f   :  { %6310 = vmatprep.subr.bf16.mxu0 %v6309_v54  ;;  %v6339_v61 = vpack.c.bf16 %v245_v32, %v244_v23  ;;  %v262_v54 = vld [vmem:[%s9046_s7 + $0x1e0] sm:$0xff] }
 0x440   :  { %v6341_v37 = vpack.c.bf16 %v263_v40, %v262_v54 }
 0x441   :  { %6340 = vmatpush3.bf16.msra.mxu1 %v6339_v61 }
 0x442   :  { %6312 = vmatpush3.bf16.msra.mxu0 %v6311_v24  ;;  %6342 = vmatprep.subr.bf16.mxu1 %v6341_v37 }
 0x443   :  { %6314 = vmatprep.subr.bf16.mxu0 %v6313_v59  ;;  %v265_v59 = vld [vmem:[%s9046_s7 + $0x1f8] sm:$0xff] }
 0x446   :  { %6316 = vmatpush3.bf16.msra.mxu0 %v6315_v16  ;;  %v248_v16 = vld [vmem:[%s9046_s7 + $0x170] sm:$0xff] }
 0x4b4   :  { %v5143_v28 = vpop.f32.mrb[52].mxu0  ;;  %v5178_v62 = vpop.f32.mrb[48].mxu1 }
 0x4b5   :  { %v5144_v57 = vpop.f32.mrb[53].mxu0  ;;  %v5179_v50 = vpop.f32.mrb[49].mxu1 }
 0x4b6   :  { %v5145_v47 = vadd.f32 %v5144_v57, %v5143_v28  ;;  %v5180_v25 = vadd.f32 %v5179_v50, %v5178_v62  ;;  %v246_v28 = vld [vmem:[%s9046_s7 + $0x160] sm:$0xff]  ;;  %v247_v62 = vld [vmem:[%s9046_s7 + $0x168] sm:$0xff] }
 0x4b7   :  { %v6343_v50 = vpack.c.bf16 %v247_v62, %v246_v28 }
 0x4b8   :  { %v8891_v22 = vadd.f32 %v5145_v47, %v8876_v8  ;;  %v8894_v18 = vadd.f32 %v5180_v25, %v8876_v8  ;;  %v264_v25 = vld [vmem:[%s9046_s7 + $0x1f0] sm:$0xff] }
 0x4b9   :  { %6344 = vmatpush3.bf16.msra.mxu1 %v6343_v50  ;;  %v6345_v14 = vpack.c.bf16 %v265_v59, %v264_v25 }
 0x4ba   :  { %v4040_v13 = vrot.slane %v8891_v22, 2  ;;  %v4053_v38 = vrot.slane %v8894_v18, 2  ;;  %v4036_v44 = vrot.slane %v8891_v22, 1  ;;  %v4049_v17 = vrot.slane %v8894_v18, 1 }
 0x4bb   :  { %v4044_v43 = vrot.slane %v8891_v22, 3  ;;  %v4057_v49 = vrot.slane %v8894_v18, 3  ;;  %6346 = vmatprep.subr.bf16.mxu1 %v6345_v14 }
 0x4bc   :  { %v6640_v39 = vpack.i.bf16 %v4040_v13, %v4053_v38  ;;  %v6635_v11 = vpack.i.bf16 %v4036_v44, %v4049_v17  ;;  %v249_v13 = vld [vmem:[%s9046_s7 + $0x178] sm:$0xff] }
 0x4bd   :  { %v6645_v9 = vpack.i.bf16 %v4044_v43, %v4057_v49  ;;  %v6347_v17 = vpack.c.bf16 %v249_v13, %v248_v16 }
 0x4be   :  { %6641 = vrot.lane.b32.xlu1 %v6640_v39, %s6698_s27  ;;  %6636 = vrot.lane.b32.xlu0 %v6635_v11, %s6696_s28 }
 0x4bf   :  { %6348 = vmatpush3.bf16.msra.mxu1 %v6347_v17 }
 0x4c2   :  { %6646 = vrot.lane.b32.xlu0 %v6645_v9, %s6697_s3 }
 0x4fc   :  { %v5213_v24 = vpop.f32.mrb[54].mxu0  ;;  %v5248_v57 = vpop.f32.mrb[50].mxu1 }
 0x4fd   :  { %v5214_v55 = vpop.f32.mrb[55].mxu0  ;;  %v5249_v33 = vpop.f32.mrb[51].mxu1 }
 0x4fe   :  { %v5215_v1 = vadd.f32 %v5214_v55, %v5213_v24  ;;  %v5250_v47 = vadd.f32 %v5249_v33, %v5248_v57  ;;  %v4292_v57 = vld [vmem:[%s9047_s8] ss:$0 sm:$0xff] }
 0x500   :  { %v3944_v38 = vadd.f32 %v5215_v1, %v8876_v8  ;;  %v4032_v44 = vadd.f32 %v5250_v47, %v8876_v8 }
 0x502   :  { %v4062_v39 = vrot.slane %v3944_v38, 1  ;;  %v4075_v11 = vrot.slane %v4032_v44, 1  ;;  %v4066_v43 = vrot.slane %v3944_v38, 2  ;;  %v4079_v49 = vrot.slane %v4032_v44, 2 }
 0x503   :  { %v4070_v48 = vrot.slane %v3944_v38, 3  ;;  %v4083_v58 = vrot.slane %v4032_v44, 3 }
 0x504   :  { %v6650_v4 = vpack.i.bf16 %v4062_v39, %v4075_v11  ;;  %v6655_v51 = vpack.i.bf16 %v4066_v43, %v4079_v49 }
 0x505   :  { %v6660_v52 = vpack.i.bf16 %v4070_v48, %v4083_v58 }
 0x506   :  { %6651 = vrot.lane.b32.xlu1 %v6650_v4, %s6696_s28  ;;  %6656 = vrot.lane.b32.xlu0 %v6655_v51, %s6698_s27 }
 0x50a   :  { %6661 = vrot.lane.b32.xlu1 %v6660_v52, %s6697_s3  ;;  %s6699_s3 = smov [#allocation2]  }
 0x50b   :  { %s4265_s27 = sshll.u32 %s6699_s3, 4  ;;  %s4266_s27 = int_to_ptr.vmem [resolvable:$true] %s4265_s27 }
 0x50c   :  { %s6665_s18 = scalar_lea.vmem %s4266_s27, 32  ;;  %p6670_p1 = scmp.lt.s32.totalorder %s4266_s27, %s4266_s27 }
 0x50d   :  { %p6666_p0 = scmp.ne.s32.totalorder %s4266_s27, %s6665_s18  ;;  %p6671_p2 = scmp.lt.s32.totalorder %s6665_s18, %s6665_s18 }
 0x50f   :  { %p6672_p3 = por %p6671_p2, %p6670_p1 }
 0x511   :  { %p6673_p4 = pnand %p6672_p3, %p6666_p0 }
 0x530   :  { %v6642_v31 = vpop.permute.xlu1 %6641  ;;  %v6637_v8 = vpop.permute.xlu0 %6636 }
 0x531   :  { %v6639_v19 = vunpack.i.h.bf16 %v6637_v8  ;;  %v6638_v5 = vunpack.i.l.bf16 %v6637_v8  ;;  %v6644_v56 = vunpack.i.h.bf16 %v6642_v31  ;;  %v6643_v3 = vunpack.i.l.bf16 %v6642_v31 }
 0x533   :  { %v4087_v20 = vsel %vm405_vm4, %v8891_v22, %v6639_v19  ;;  %v4090_v27 = vsel %vm405_vm4, %v8894_v18, %v6638_v5 }
 0x534   :  { %v6647_v34 = vpop.permute.xlu0 %6646  ;;  %v4091_v36 = vsel %vm2600_vm11, %v4090_v27, %v6643_v3  ;;  %v4088_v12 = vsel %vm2600_vm11, %v4087_v20, %v6644_v56 }
 0x535   :  { %v6649_v9 = vunpack.i.h.bf16 %v6647_v34  ;;  %v6648_v30 = vunpack.i.l.bf16 %v6647_v34 }
 0x537   :  { %v4092_v53 = vsel %vm2603_vm12, %v4091_v36, %v6648_v30  ;;  %v4089_v60 = vsel %vm2603_vm12, %v4088_v12, %v6649_v9 }
 0x538   :  { %v4104_v7 = vrot.slane %v4092_v53, 3  ;;  %v4103_v15 = vrot.slane %v4089_v60, 3 }
 0x53a   :  { %v4113_v10 = vsel %vm4111_vm14, %v4092_v53, %v4104_v7  ;;  %v4112_v22 = vsel %vm4111_vm14, %v4089_v60, %v4103_v15 }
 0x53b   :  { %4180 = vmatprep.mubr.f32.mxu0 %v4113_v10 }
 0x53c   :  { %4181 = vmatmul.mubr.f32.vlgmr.msra.gmra.mrb[56].mxu0 %v4112_v22 }
 0x578   :  { %v6652_v18 = vpop.permute.xlu1 %6651  ;;  %v6657_v21 = vpop.permute.xlu0 %6656 }
 0x579   :  { %v6654_v63 = vunpack.i.h.bf16 %v6652_v18  ;;  %v6653_v35 = vunpack.i.l.bf16 %v6652_v18  ;;  %v6659_v26 = vunpack.i.h.bf16 %v6657_v21  ;;  %v6658_v42 = vunpack.i.l.bf16 %v6657_v21 }
 0x57b   :  { %v4093_v0 = vsel %vm405_vm4, %v3944_v38, %v6654_v63  ;;  %v4096_v41 = vsel %vm405_vm4, %v4032_v44, %v6653_v35 }
 0x57c   :  { %v6662_v6 = vpop.permute.xlu1 %6661  ;;  %v4094_v2 = vsel %vm2600_vm11, %v4093_v0, %v6659_v26  ;;  %v4097_v46 = vsel %vm2600_vm11, %v4096_v41, %v6658_v42 }
 0x57d   :  { %v6664_v45 = vunpack.i.h.bf16 %v6662_v6  ;;  %v6663_v29 = vunpack.i.l.bf16 %v6662_v6 }
 0x57f   :  { %v4095_v23 = vsel %vm2603_vm12, %v4094_v2, %v6664_v45  ;;  %v4098_v32 = vsel %vm2603_vm12, %v4097_v46, %v6663_v29 }
 0x580   :  { %v4105_v61 = vrot.slane %v4095_v23, 3  ;;  %v4106_v54 = vrot.slane %v4098_v32, 3 }
 0x582   :  { %v4115_v40 = vsel %vm4111_vm14, %v4098_v32, %v4106_v54  ;;  %v4114_v37 = vsel %vm4111_vm14, %v4095_v23, %v4105_v61 }
 0x583   :  { %4250 = vmatprep.mubr.f32.mxu1 %v4115_v40 }
 0x584   :  { %4251 = vmatmul.mubr.f32.vlgmr.msra.gmra.mrb[52].mxu1 %v4114_v37 }
 0x60f   :  { %v5283_v28 = vpop.f32.mrb[56].mxu0 }
 0x610   :  { %v5284_v62 = vpop.f32.mrb[57].mxu0 }
 0x611   :  { %v5285_v24 = vadd.f32 %v5284_v62, %v5283_v28 }
 0x613   :  { %v4183_v33 = vadd.f32 %v5285_v24, %v4292_v57 }
 0x657   :  { %v5318_v50 = vpop.f32.mrb[52].mxu1 }
 0x658   :  { %v5319_v55 = vpop.f32.mrb[53].mxu1 }
 0x659   :  { %v5320_v1 = vadd.f32 %v5319_v55, %v5318_v50 }
 0x65b   :  { %v4253_v47 = vadd.f32 %v5320_v1, %v4183_v33 }
 0x65d   :  { %v4256_v25 = vmax.f32 %v4253_v47, 0.0 }
 0x65f   :  { %4258 = vst.msk [vmem:[#allocation2] sm:$0x3] %vm4257_vm15, %v4256_v25 }
 0x660   :  { %6676 = shalt.err (!%p6673_p4)
}
 0x661   :  { %s6677_s16 = scalar_lea.hbm %s9048_s9, 32 }
 0x662   :  { %p6678_p5 = scmp.ne.s32.totalorder %s9048_s9, %s6677_s16  ;;  %p6681_p6 = scmp.lt.u32.totalorder %s6677_s16, %s9048_s9 }
 0x664   :  { %p6683_p7 = pnand %p6681_p6, %p6678_p5 }
 0x666   :  { %6686 = shalt.err (!%p6683_p7)
}
 0x667   :  { %4268 = dma.vmem_to_hbm [thread:$0]  %s4266_s27, 32, %s9048_s9, [#allocation3]  }
 0x668   :  { %6687 = dma.done.wait [#allocation3], 32  }
 0x669   :  { %6688 = vsyncadd [#allocation3], 4294967264 }
 0x66a   :  { %4272 = vsyncpa [#allocation3], 1 }

</bundles_post_ra>
